<compile_context>
chip_gen: v5e
topology: v5e:2x2
jax: 0.10.0
libtpu: 0.0.40
codegen_flags: <defaults>
</compile_context>

<pallas_src>
import functools

import numpy as np
import jax
import jax.numpy as jnp
from jax.experimental import pallas as pl
from jax.experimental.pallas import tpu as pltpu

EPS = 1e-5
_CH_ALIGN = 16                       # bf16 sublane packing
_VMEM_LIMIT = 48 * 1024 * 1024       # below v7x's 64 MiB physical VMEM


def _round_up(x, m):
    return (x + m - 1) // m * m


# ---------------------------------------------------------------------------
# Kernel A1: conv1 as 9 shifted matmuls on the flattened (phase-packed)
# zero-padded input + per-image partial BN statistics from the f32 accumulator.
# ---------------------------------------------------------------------------
def _conv1_kernel(offsets, m_rows, x_ref, w_ref, mask_ref, y_ref, st_ref):
    acc = None
    for j, off in enumerate(offsets):           # static row offsets per tap
        xs = x_ref[0, off:off + m_rows, :]
        p = jnp.dot(xs, w_ref[j], preferred_element_type=jnp.float32)
        acc = p if acc is None else acc + p
    y_ref[0] = acc.astype(y_ref.dtype)
    m = mask_ref[...]                           # (m_rows, 1): 0 on garbage cols
    st_ref[0, 0:1, :] = jnp.sum(acc * m, axis=0, keepdims=True)
    st_ref[0, 1:2, :] = jnp.sum(acc * acc * m, axis=0, keepdims=True)


# ---------------------------------------------------------------------------
# Kernel A2: BN1+ReLU applied in VMEM to the raw (zero-padded, flattened)
# conv1 output, then conv2 as 9 shifted matmuls; optionally the fused 1x1
# projection-shortcut matmul.  Partial BN stats from the f32 accumulators.
# ---------------------------------------------------------------------------
def _conv2_kernel(offsets, m_rows, has_proj, h_ref, sc1_ref, sh1_ref,
                  pmask_ref, w_ref, vmask_ref, *rest):
    if has_proj:
        xsc_ref, wsc_ref, y_ref, ysc_ref, st_ref, h_scr = rest
    else:
        y_ref, st_ref, h_scr = rest

    # BN1 + ReLU fused here (stats were computed from f32 in pass A1);
    # pmask zeroes the conv zero-padding border and tail padding rows.
    h = h_ref[0].astype(jnp.float32) * sc1_ref[...] + sh1_ref[...]
    h = jnp.maximum(h, 0.0) * pmask_ref[...]
    h_scr[...] = h.astype(h_scr.dtype)

    acc = None
    for j, off in enumerate(offsets):
        xs = h_scr[off:off + m_rows, :]
        p = jnp.dot(xs, w_ref[j], preferred_element_type=jnp.float32)
        acc = p if acc is None else acc + p
    y_ref[0] = acc.astype(y_ref.dtype)

    vm = vmask_ref[...]
    st_ref[0, 0:1, :] = jnp.sum(acc * vm, axis=0, keepdims=True)
    st_ref[0, 1:2, :] = jnp.sum(acc * acc * vm, axis=0, keepdims=True)

    if has_proj:
        accs = jnp.dot(xsc_ref[0], wsc_ref[...],
                       preferred_element_type=jnp.float32)
        ysc_ref[0] = accs.astype(ysc_ref.dtype)
        st_ref[0, 2:3, :] = jnp.sum(accs * vm, axis=0, keepdims=True)
        st_ref[0, 3:4, :] = jnp.sum(accs * accs * vm, axis=0, keepdims=True)


# ---------------------------------------------------------------------------
# Kernel B2: out = relu(bn2(y2) + shortcut)
# ---------------------------------------------------------------------------
def _bn_add_relu_kernel(has_proj, y_ref, sc_ref, sh_ref, *rest):
    if has_proj:
        ysc_ref, scs_ref, shs_ref, o_ref = rest
        res = ysc_ref[0].astype(jnp.float32) * scs_ref[...] + shs_ref[...]
    else:
        r_ref, o_ref = rest
        res = r_ref[0].astype(jnp.float32)
    out = y_ref[0].astype(jnp.float32) * sc_ref[...] + sh_ref[...] + res
    o_ref[0] = jnp.maximum(out, 0.0).astype(o_ref.dtype)


def _bn_scale_shift(ch_sum, ch_sumsq, cnt, gamma, beta, eps):
    """Fold training-mode BN into a per-channel scale/shift (f32)."""
    mean = ch_sum / cnt
    var = jnp.maximum(ch_sumsq / cnt - mean * mean, 0.0)
    inv = jax.lax.rsqrt(var + eps)
    scale = gamma * inv
    shift = beta - mean * scale
    return scale.reshape(1, -1), shift.reshape(1, -1)


def _pad_channels(v, n):
    return jnp.pad(v.astype(jnp.float32), (0, n - v.shape[0]))


def skinny_block_forward(x, params, *, stride, eps=EPS):
    """x: (N, H, W, Cin) float32, NHWC.  Training-mode BatchNorm."""
    N, H, W, Cin = x.shape
    C1 = params["w1"].shape[0]
    C2 = params["w2"].shape[0]
    s = stride
    cink = _round_up(Cin, _CH_ALIGN)
    c1p = _round_up(C1, _CH_ALIGN)
    c2p = _round_up(C2, _CH_ALIGN)

    Ho = (H - 1) // s + 1            # = floor((H + 2 - 3)/s) + 1
    Wo = (W - 1) // s + 1
    cnt = float(N * Ho * Wo)         # valid positions per channel (all 3 BNs)

    cparams = pltpu.CompilerParams(
        dimension_semantics=("parallel",), vmem_limit_bytes=_VMEM_LIMIT)

    # ------------- conv1: phase-pack + flatten + 9-tap kernel --------------
    Hp = _round_up(H + 2, s)
    Wp = _round_up(W + 2, s)
    xpad = jnp.pad(x, ((0, 0), (1, Hp - H - 1), (1, Wp - W - 1), (0, 0)))
    Hpp, Wpp = Hp // s, Wp // s
    # phases[r, c][a, b] = xpad[s*a + r, s*b + c]  (pixel-unshuffle by stride)
    xph = xpad.reshape(N, Hpp, s, Wpp, s, Cin).transpose(0, 2, 4, 1, 3, 5)
    xph = xph.reshape(N, s * s, Hpp * Wpp, Cin)
    M1 = Ho * Wpp                               # flat output rows (w/ garbage cols)
    rpp = _round_up(M1 + (2 // s) * Wpp + (2 // s), 16)
    xph = jnp.pad(xph, ((0, 0), (0, 0), (0, rpp - Hpp * Wpp),
                        (0, cink - Cin)))
    xph = xph.reshape(N, s * s * rpp, cink).astype(jnp.bfloat16)
    offs1 = [((dy % s) * s + (dx % s)) * rpp + (dy // s) * Wpp + (dx // s)
             for dy in range(3) for dx in range(3)]
    w1 = jnp.transpose(params["w1"], (2, 3, 1, 0)).reshape(9, Cin, C1)
    w1 = jnp.pad(w1, ((0, 0), (0, cink - Cin), (0, c1p - C1)))
    w1 = w1.astype(jnp.bfloat16)
    mask1 = ((jnp.arange(M1) % Wpp) < Wo).astype(jnp.float32).reshape(M1, 1)

    y1, st1 = pl.pallas_call(
        functools.partial(_conv1_kernel, offs1, M1),
        out_shape=(jax.ShapeDtypeStruct((N, M1, c1p), jnp.bfloat16),
                   jax.ShapeDtypeStruct((N, 2, c1p), jnp.float32)),
        grid=(N,),
        in_specs=[pl.BlockSpec((1, s * s * rpp, cink), lambda n: (n, 0, 0)),
                  pl.BlockSpec((9, cink, c1p), lambda n: (0, 0, 0)),
                  pl.BlockSpec((M1, 1), lambda n: (0, 0))],
        out_specs=(pl.BlockSpec((1, M1, c1p), lambda n: (n, 0, 0)),
                   pl.BlockSpec((1, 2, c1p), lambda n: (n, 0, 0))),
        compiler_params=cparams,
        cost_estimate=pl.CostEstimate(
            flops=int(2 * N * M1 * 9 * cink * c1p), transcendentals=0,
            bytes_accessed=int(xph.size * 2 + w1.size * 2 + N * M1 * c1p * 2)),
    )(xph, w1, mask1)

    sc1, sh1 = _bn_scale_shift(
        jnp.sum(st1[:, 0, :], axis=0), jnp.sum(st1[:, 1, :], axis=0), cnt,
        _pad_channels(params["g1"], c1p), _pad_channels(params["b1"], c1p),
        eps)

    # ------ repack raw y1 into conv2's zero-padded flat layout (plumbing) --
    y1_img = y1.reshape(N, Ho, Wpp, c1p)[:, :, :Wo, :]
    Wp2 = Wo + 2
    h_pad = jnp.pad(y1_img, ((0, 0), (1, 1), (1, 1), (0, 0)))
    M2 = Ho * Wp2
    r2 = _round_up(M2 + 2 * Wp2 + 2, 16)
    h_flat = h_pad.reshape(N, (Ho + 2) * Wp2, c1p)
    h_flat = jnp.pad(h_flat, ((0, 0), (0, r2 - (Ho + 2) * Wp2), (0, 0)))
    h_flat = h_flat.astype(jnp.bfloat16)
    offs2 = [dy * Wp2 + dx for dy in range(3) for dx in range(3)]

    rr = jnp.arange(r2)
    prow, pcol = rr // Wp2, rr % Wp2
    pmask = ((prow >= 1) & (prow <= Ho) & (pcol >= 1) & (pcol <= Wo))
    pmask = pmask.astype(jnp.float32).reshape(r2, 1)
    vmask2 = ((jnp.arange(M2) % Wp2) < Wo).astype(jnp.float32).reshape(M2, 1)

    w2 = jnp.transpose(params["w2"], (2, 3, 1, 0)).reshape(9, C1, C2)
    w2 = jnp.pad(w2, ((0, 0), (0, c1p - C1), (0, c2p - C2)))
    w2 = w2.astype(jnp.bfloat16)

    has_proj = (s != 1) or (Cin != C2)
    inputs = [h_flat, sc1, sh1, pmask, w2, vmask2]
    in_specs = [pl.BlockSpec((1, r2, c1p), lambda n: (n, 0, 0)),
                pl.BlockSpec((1, c1p), lambda n: (0, 0)),
                pl.BlockSpec((1, c1p), lambda n: (0, 0)),
                pl.BlockSpec((r2, 1), lambda n: (0, 0)),
                pl.BlockSpec((9, c1p, c2p), lambda n: (0, 0, 0)),
                pl.BlockSpec((M2, 1), lambda n: (0, 0))]
    out_shape = [jax.ShapeDtypeStruct((N, M2, c2p), jnp.bfloat16)]
    out_specs = [pl.BlockSpec((1, M2, c2p), lambda n: (n, 0, 0))]
    flops2 = 2 * N * M2 * 9 * c1p * c2p
    if has_proj:
        x_sc = x[:, ::s, ::s, :]                           # (N, Ho, Wo, Cin)
        x_sc = jnp.pad(x_sc, ((0, 0), (0, 0), (0, Wp2 - Wo),
                              (0, cink - Cin)))
        x_sc = x_sc.reshape(N, M2, cink).astype(jnp.bfloat16)
        w_sc = jnp.transpose(params["w_sc"], (2, 3, 1, 0)).reshape(Cin, C2)
        w_sc = jnp.pad(w_sc, ((0, cink - Cin), (0, c2p - C2)))
        w_sc = w_sc.astype(jnp.bfloat16)
        inputs += [x_sc, w_sc]
        in_specs += [pl.BlockSpec((1, M2, cink), lambda n: (n, 0, 0)),
                     pl.BlockSpec((cink, c2p), lambda n: (0, 0))]
        out_shape.append(jax.ShapeDtypeStruct((N, M2, c2p), jnp.bfloat16))
        out_specs.append(pl.BlockSpec((1, M2, c2p), lambda n: (n, 0, 0)))
        flops2 += 2 * N * M2 * cink * c2p
    n_stat = 4 if has_proj else 2
    out_shape.append(jax.ShapeDtypeStruct((N, n_stat, c2p), jnp.float32))
    out_specs.append(pl.BlockSpec((1, n_stat, c2p), lambda n: (n, 0, 0)))

    outs = pl.pallas_call(
        functools.partial(_conv2_kernel, offs2, M2, has_proj),
        out_shape=tuple(out_shape),
        grid=(N,),
        in_specs=in_specs,
        out_specs=tuple(out_specs),
        scratch_shapes=[pltpu.VMEM((r2, c1p), jnp.bfloat16)],
        compiler_params=cparams,
        cost_estimate=pl.CostEstimate(
            flops=int(flops2), transcendentals=0,
            bytes_accessed=int(h_flat.size * 2 + w2.size * 2
                               + 2 * N * M2 * c2p * 2)),
    )(*inputs)

    if has_proj:
        y2, ysc, st2 = outs
    else:
        y2, st2 = outs

    sc2, sh2 = _bn_scale_shift(
        jnp.sum(st2[:, 0, :], axis=0), jnp.sum(st2[:, 1, :], axis=0), cnt,
        _pad_channels(params["g2"], c2p), _pad_channels(params["b2"], c2p),
        eps)

    # ------------- pass B: bn2 (+ shortcut bn / identity add) + relu -------
    b_inputs = [y2, sc2, sh2]
    b_specs = [pl.BlockSpec((1, M2, c2p), lambda n: (n, 0, 0)),
               pl.BlockSpec((1, c2p), lambda n: (0, 0)),
               pl.BlockSpec((1, c2p), lambda n: (0, 0))]
    if has_proj:
        scs, shs = _bn_scale_shift(
            jnp.sum(st2[:, 2, :], axis=0), jnp.sum(st2[:, 3, :], axis=0), cnt,
            _pad_channels(params["g_sc"], c2p),
            _pad_channels(params["b_sc"], c2p), eps)
        b_inputs += [ysc, scs, shs]
        b_specs += [pl.BlockSpec((1, M2, c2p), lambda n: (n, 0, 0)),
                    pl.BlockSpec((1, c2p), lambda n: (0, 0)),
                    pl.BlockSpec((1, c2p), lambda n: (0, 0))]
    else:
        # identity shortcut (stride 1, Cin == C2): bf16 residual on the same
        # flat (Ho x Wp2) output grid.
        xres = jnp.pad(x, ((0, 0), (0, 0), (0, Wp2 - W), (0, c2p - Cin)))
        xres = xres.reshape(N, M2, c2p).astype(jnp.bfloat16)
        b_inputs.append(xres)
        b_specs.append(pl.BlockSpec((1, M2, c2p), lambda n: (n, 0, 0)))

    out_flat = pl.pallas_call(
        functools.partial(_bn_add_relu_kernel, has_proj),
        out_shape=jax.ShapeDtypeStruct((N, M2, c2p), jnp.float32),
        grid=(N,),
        in_specs=b_specs,
        out_specs=pl.BlockSpec((1, M2, c2p), lambda n: (n, 0, 0)),
        compiler_params=cparams,
    )(*b_inputs)

    return out_flat.reshape(N, Ho, Wp2, c2p)[:, :, :Wo, :C2]


# ---------------------------------------------------------------------------
# Pure-JAX f32 reference (lax.conv + training-mode BN)
# ---------------------------------------------------------------------------
def ref_forward(x_nhwc, params, *, stride, eps=EPS):
    def conv(x, w, s, pad):
        return jax.lax.conv_general_dilated(
            x, jnp.transpose(w, (2, 3, 1, 0)), (s, s), pad,
            dimension_numbers=("NHWC", "HWIO", "NHWC"),
            precision=jax.lax.Precision.HIGHEST)

    def bn(y, g, b):
        mu = jnp.mean(y, axis=(0, 1, 2), keepdims=True)
        var = jnp.mean(jnp.square(y - mu), axis=(0, 1, 2), keepdims=True)
        return (y - mu) * jax.lax.rsqrt(var + eps) * g + b

    out = jax.nn.relu(bn(conv(x_nhwc, params["w1"], stride, ((1, 1), (1, 1))),
                         params["g1"], params["b1"]))
    out = bn(conv(out, params["w2"], 1, ((1, 1), (1, 1))),
             params["g2"], params["b2"])
    Cin = x_nhwc.shape[-1]
    C2 = params["w2"].shape[0]
    if stride != 1 or Cin != C2:
        sc = bn(conv(x_nhwc, params["w_sc"], stride, ((0, 0), (0, 0))),
                params["g_sc"], params["b_sc"])
    else:
        sc = x_nhwc
    return jax.nn.relu(out + sc)


if __name__ == "__main__":
    key = jax.random.PRNGKey(0)
    ks = jax.random.split(key, 8)

    # ---- Test 1: projection shortcut (stride=2, Cin != Cout) --------------
    N, Cin, H, W = 2, 4, 16, 16
    oc = (8, 8)
    stride = 2
    x_nchw = jax.random.normal(ks[0], (N, Cin, H, W), jnp.float32)
    params = dict(
        w1=0.2 * jax.random.normal(ks[1], (oc[0], Cin, 3, 3), jnp.float32),
        g1=jnp.ones((oc[0],), jnp.float32), b1=jnp.zeros((oc[0],), jnp.float32),
        w2=0.2 * jax.random.normal(ks[2], (oc[1], oc[0], 3, 3), jnp.float32),
        g2=jnp.ones((oc[1],), jnp.float32), b2=jnp.zeros((oc[1],), jnp.float32),
        w_sc=0.2 * jax.random.normal(ks[3], (oc[1], Cin, 1, 1), jnp.float32),
        g_sc=jnp.ones((oc[1],), jnp.float32),
        b_sc=jnp.zeros((oc[1],), jnp.float32),
    )
    x_nhwc = jnp.transpose(x_nchw, (0, 2, 3, 1))
    fwd = jax.jit(functools.partial(skinny_block_forward, stride=stride))
    out = fwd(x_nhwc, params)
    jax.block_until_ready(out)
    ref = ref_forward(x_nhwc, params, stride=stride)
    assert out.shape == (N, H // stride, W // stride, oc[1]), out.shape
    # bf16 matmul operands + bf16 intermediates vs an f32 reference.
    assert np.allclose(np.asarray(out), np.asarray(ref), atol=1e-1, rtol=1e-1)

    # ---- Test 2: identity shortcut (stride=1, Cin == Cout) ----------------
    N2, Cin2, H2, W2 = 2, 8, 8, 8
    oc2 = (8, 8)
    x2_nchw = jax.random.normal(ks[4], (N2, Cin2, H2, W2), jnp.float32)
    params2 = dict(
        w1=0.2 * jax.random.normal(ks[5], (oc2[0], Cin2, 3, 3), jnp.float32),
        g1=jnp.ones((oc2[0],), jnp.float32), b1=jnp.zeros((oc2[0],), jnp.float32),
        w2=0.2 * jax.random.normal(ks[6], (oc2[1], oc2[0], 3, 3), jnp.float32),
        g2=jnp.ones((oc2[1],), jnp.float32), b2=jnp.zeros((oc2[1],), jnp.float32),
    )
    x2_nhwc = jnp.transpose(x2_nchw, (0, 2, 3, 1))
    fwd2 = jax.jit(functools.partial(skinny_block_forward, stride=1))
    out2 = fwd2(x2_nhwc, params2)
    jax.block_until_ready(out2)
    ref2 = ref_forward(x2_nhwc, params2, stride=1)
    assert out2.shape == (N2, H2, W2, oc2[1]), out2.shape
    assert np.allclose(np.asarray(out2), np.asarray(ref2), atol=1e-1, rtol=1e-1)

    print("KERNEL_OK")
</pallas_src>

<mosaic_0001>
module attributes {stable_mosaic.version = 11 : i64} {
  func.func @_conv1_kernel(%arg0: i32, %arg1: memref<1x384x16xbf16, #tpu.memory_space<vmem>>, %arg2: memref<9x16x16xbf16, #tpu.memory_space<vmem>>, %arg3: memref<72x1xf32, #tpu.memory_space<vmem>>, %arg4: memref<1x72x16xbf16, #tpu.memory_space<vmem>>, %arg5: memref<1x2x16xf32, #tpu.memory_space<vmem>>) attributes {dimension_semantics = [#tpu.dimension_semantics<parallel>], iteration_bounds = array<i64: 2>, scalar_prefetch = 0 : i64, scratch_operands = 0 : i64, tpu.core_type = #tpu.core_type<tc>, window_params = [{transform_indices = @transform_0, window_bounds = array<i64: 1, 384, 16>}, {pipeline_mode = #tpu.pipeline_mode<synchronous>, transform_indices = @transform_1, window_bounds = array<i64: 9, 16, 16>}, {pipeline_mode = #tpu.pipeline_mode<synchronous>, transform_indices = @transform_2, window_bounds = array<i64: 72, 1>}, {transform_indices = @transform_3, window_bounds = array<i64: 1, 72, 16>}, {transform_indices = @transform_4, window_bounds = array<i64: 1, 2, 16>}]} {
    %c0 = arith.constant 0 : index
    %c0_0 = arith.constant 0 : index
    %c0_1 = arith.constant 0 : index
    %0 = vector.load %arg1[%c0, %c0_0, %c0_1] : memref<1x384x16xbf16, #tpu.memory_space<vmem>>, vector<1x72x16xbf16>
    %1 = vector.shape_cast %0 : vector<1x72x16xbf16> to vector<72x16xbf16>
    %c0_2 = arith.constant 0 : index
    %c0_3 = arith.constant 0 : index
    %c0_4 = arith.constant 0 : index
    %2 = vector.load %arg2[%c0_2, %c0_3, %c0_4] : memref<9x16x16xbf16, #tpu.memory_space<vmem>>, vector<1x16x16xbf16>
    %3 = vector.shape_cast %2 : vector<1x16x16xbf16> to vector<16x16xbf16>
    %cst = arith.constant dense<0.000000e+00> : vector<72x16xf32>
    %4 = tpu.matmul %1, %3, %cst {dimension_numbers = #tpu.dot_dimension_numbers<[1], [0], [0], [1], [0, 0, 1, 1], [], []>} : vector<72x16xbf16>, vector<16x16xbf16>, vector<72x16xf32> -> vector<72x16xf32>
    %c0_5 = arith.constant 0 : index
    %c96 = arith.constant 96 : index
    %c0_6 = arith.constant 0 : index
    %5 = vector.load %arg1[%c0_5, %c96, %c0_6] : memref<1x384x16xbf16, #tpu.memory_space<vmem>>, vector<1x72x16xbf16>
    %6 = vector.shape_cast %5 : vector<1x72x16xbf16> to vector<72x16xbf16>
    %c1 = arith.constant 1 : index
    %c0_7 = arith.constant 0 : index
    %c0_8 = arith.constant 0 : index
    %7 = vector.load %arg2[%c1, %c0_7, %c0_8] : memref<9x16x16xbf16, #tpu.memory_space<vmem>>, vector<1x16x16xbf16>
    %8 = vector.shape_cast %7 : vector<1x16x16xbf16> to vector<16x16xbf16>
    %cst_9 = arith.constant dense<0.000000e+00> : vector<72x16xf32>
    %9 = tpu.matmul %6, %8, %cst_9 {dimension_numbers = #tpu.dot_dimension_numbers<[1], [0], [0], [1], [0, 0, 1, 1], [], []>} : vector<72x16xbf16>, vector<16x16xbf16>, vector<72x16xf32> -> vector<72x16xf32>
    %10 = arith.addf %4, %9 : vector<72x16xf32>
    %c0_10 = arith.constant 0 : index
    %c1_11 = arith.constant 1 : index
    %c0_12 = arith.constant 0 : index
    %11 = vector.load %arg1[%c0_10, %c1_11, %c0_12] : memref<1x384x16xbf16, #tpu.memory_space<vmem>>, vector<1x72x16xbf16>
    %12 = vector.shape_cast %11 : vector<1x72x16xbf16> to vector<72x16xbf16>
    %c2 = arith.constant 2 : index
    %c0_13 = arith.constant 0 : index
    %c0_14 = arith.constant 0 : index
    %13 = vector.load %arg2[%c2, %c0_13, %c0_14] : memref<9x16x16xbf16, #tpu.memory_space<vmem>>, vector<1x16x16xbf16>
    %14 = vector.shape_cast %13 : vector<1x16x16xbf16> to vector<16x16xbf16>
    %cst_15 = arith.constant dense<0.000000e+00> : vector<72x16xf32>
    %15 = tpu.matmul %12, %14, %cst_15 {dimension_numbers = #tpu.dot_dimension_numbers<[1], [0], [0], [1], [0, 0, 1, 1], [], []>} : vector<72x16xbf16>, vector<16x16xbf16>, vector<72x16xf32> -> vector<72x16xf32>
    %16 = arith.addf %10, %15 : vector<72x16xf32>
    %c0_16 = arith.constant 0 : index
    %c192 = arith.constant 192 : index
    %c0_17 = arith.constant 0 : index
    %17 = vector.load %arg1[%c0_16, %c192, %c0_17] : memref<1x384x16xbf16, #tpu.memory_space<vmem>>, vector<1x72x16xbf16>
    %18 = vector.shape_cast %17 : vector<1x72x16xbf16> to vector<72x16xbf16>
    %c3 = arith.constant 3 : index
    %c0_18 = arith.constant 0 : index
    %c0_19 = arith.constant 0 : index
    %19 = vector.load %arg2[%c3, %c0_18, %c0_19] : memref<9x16x16xbf16, #tpu.memory_space<vmem>>, vector<1x16x16xbf16>
    %20 = vector.shape_cast %19 : vector<1x16x16xbf16> to vector<16x16xbf16>
    %cst_20 = arith.constant dense<0.000000e+00> : vector<72x16xf32>
    %21 = tpu.matmul %18, %20, %cst_20 {dimension_numbers = #tpu.dot_dimension_numbers<[1], [0], [0], [1], [0, 0, 1, 1], [], []>} : vector<72x16xbf16>, vector<16x16xbf16>, vector<72x16xf32> -> vector<72x16xf32>
    %22 = arith.addf %16, %21 : vector<72x16xf32>
    %c0_21 = arith.constant 0 : index
    %c288 = arith.constant 288 : index
    %c0_22 = arith.constant 0 : index
    %23 = vector.load %arg1[%c0_21, %c288, %c0_22] : memref<1x384x16xbf16, #tpu.memory_space<vmem>>, vector<1x72x16xbf16>
    %24 = vector.shape_cast %23 : vector<1x72x16xbf16> to vector<72x16xbf16>
    %c4 = arith.constant 4 : index
    %c0_23 = arith.constant 0 : index
    %c0_24 = arith.constant 0 : index
    %25 = vector.load %arg2[%c4, %c0_23, %c0_24] : memref<9x16x16xbf16, #tpu.memory_space<vmem>>, vector<1x16x16xbf16>
    %26 = vector.shape_cast %25 : vector<1x16x16xbf16> to vector<16x16xbf16>
    %cst_25 = arith.constant dense<0.000000e+00> : vector<72x16xf32>
    %27 = tpu.matmul %24, %26, %cst_25 {dimension_numbers = #tpu.dot_dimension_numbers<[1], [0], [0], [1], [0, 0, 1, 1], [], []>} : vector<72x16xbf16>, vector<16x16xbf16>, vector<72x16xf32> -> vector<72x16xf32>
    %28 = arith.addf %22, %27 : vector<72x16xf32>
    %c0_26 = arith.constant 0 : index
    %c193 = arith.constant 193 : index
    %c0_27 = arith.constant 0 : index
    %29 = vector.load %arg1[%c0_26, %c193, %c0_27] : memref<1x384x16xbf16, #tpu.memory_space<vmem>>, vector<1x72x16xbf16>
    %30 = vector.shape_cast %29 : vector<1x72x16xbf16> to vector<72x16xbf16>
    %c5 = arith.constant 5 : index
    %c0_28 = arith.constant 0 : index
    %c0_29 = arith.constant 0 : index
    %31 = vector.load %arg2[%c5, %c0_28, %c0_29] : memref<9x16x16xbf16, #tpu.memory_space<vmem>>, vector<1x16x16xbf16>
    %32 = vector.shape_cast %31 : vector<1x16x16xbf16> to vector<16x16xbf16>
    %cst_30 = arith.constant dense<0.000000e+00> : vector<72x16xf32>
    %33 = tpu.matmul %30, %32, %cst_30 {dimension_numbers = #tpu.dot_dimension_numbers<[1], [0], [0], [1], [0, 0, 1, 1], [], []>} : vector<72x16xbf16>, vector<16x16xbf16>, vector<72x16xf32> -> vector<72x16xf32>
    %34 = arith.addf %28, %33 : vector<72x16xf32>
    %c0_31 = arith.constant 0 : index
    %c9 = arith.constant 9 : index
    %c0_32 = arith.constant 0 : index
    %35 = vector.load %arg1[%c0_31, %c9, %c0_32] : memref<1x384x16xbf16, #tpu.memory_space<vmem>>, vector<1x72x16xbf16>
    %36 = vector.shape_cast %35 : vector<1x72x16xbf16> to vector<72x16xbf16>
    %c6 = arith.constant 6 : index
    %c0_33 = arith.constant 0 : index
    %c0_34 = arith.constant 0 : index
    %37 = vector.load %arg2[%c6, %c0_33, %c0_34] : memref<9x16x16xbf16, #tpu.memory_space<vmem>>, vector<1x16x16xbf16>
    %38 = vector.shape_cast %37 : vector<1x16x16xbf16> to vector<16x16xbf16>
    %cst_35 = arith.constant dense<0.000000e+00> : vector<72x16xf32>
    %39 = tpu.matmul %36, %38, %cst_35 {dimension_numbers = #tpu.dot_dimension_numbers<[1], [0], [0], [1], [0, 0, 1, 1], [], []>} : vector<72x16xbf16>, vector<16x16xbf16>, vector<72x16xf32> -> vector<72x16xf32>
    %40 = arith.addf %34, %39 : vector<72x16xf32>
    %c0_36 = arith.constant 0 : index
    %c105 = arith.constant 105 : index
    %c0_37 = arith.constant 0 : index
    %41 = vector.load %arg1[%c0_36, %c105, %c0_37] : memref<1x384x16xbf16, #tpu.memory_space<vmem>>, vector<1x72x16xbf16>
    %42 = vector.shape_cast %41 : vector<1x72x16xbf16> to vector<72x16xbf16>
    %c7 = arith.constant 7 : index
    %c0_38 = arith.constant 0 : index
    %c0_39 = arith.constant 0 : index
    %43 = vector.load %arg2[%c7, %c0_38, %c0_39] : memref<9x16x16xbf16, #tpu.memory_space<vmem>>, vector<1x16x16xbf16>
    %44 = vector.shape_cast %43 : vector<1x16x16xbf16> to vector<16x16xbf16>
    %cst_40 = arith.constant dense<0.000000e+00> : vector<72x16xf32>
    %45 = tpu.matmul %42, %44, %cst_40 {dimension_numbers = #tpu.dot_dimension_numbers<[1], [0], [0], [1], [0, 0, 1, 1], [], []>} : vector<72x16xbf16>, vector<16x16xbf16>, vector<72x16xf32> -> vector<72x16xf32>
    %46 = arith.addf %40, %45 : vector<72x16xf32>
    %c0_41 = arith.constant 0 : index
    %c10 = arith.constant 10 : index
    %c0_42 = arith.constant 0 : index
    %47 = vector.load %arg1[%c0_41, %c10, %c0_42] : memref<1x384x16xbf16, #tpu.memory_space<vmem>>, vector<1x72x16xbf16>
    %48 = vector.shape_cast %47 : vector<1x72x16xbf16> to vector<72x16xbf16>
    %c8 = arith.constant 8 : index
    %c0_43 = arith.constant 0 : index
    %c0_44 = arith.constant 0 : index
    %49 = vector.load %arg2[%c8, %c0_43, %c0_44] : memref<9x16x16xbf16, #tpu.memory_space<vmem>>, vector<1x16x16xbf16>
    %50 = vector.shape_cast %49 : vector<1x16x16xbf16> to vector<16x16xbf16>
    %cst_45 = arith.constant dense<0.000000e+00> : vector<72x16xf32>
    %51 = tpu.matmul %48, %50, %cst_45 {dimension_numbers = #tpu.dot_dimension_numbers<[1], [0], [0], [1], [0, 0, 1, 1], [], []>} : vector<72x16xbf16>, vector<16x16xbf16>, vector<72x16xf32> -> vector<72x16xf32>
    %52 = arith.addf %46, %51 : vector<72x16xf32>
    %53 = arith.truncf %52 : vector<72x16xf32> to vector<72x16xbf16>
    %c0_46 = arith.constant 0 : index
    %c0_47 = arith.constant 0 : index
    %c0_48 = arith.constant 0 : index
    %54 = vector.load %arg4[%c0_46, %c0_47, %c0_48] : memref<1x72x16xbf16, #tpu.memory_space<vmem>>, vector<1x72x16xbf16>
    %55 = vector.shape_cast %54 : vector<1x72x16xbf16> to vector<72x16xbf16>
    %56 = vector.shape_cast %53 : vector<72x16xbf16> to vector<1x72x16xbf16>
    tpu.vector_store %arg4[%c0_46, %c0_47, %c0_48], %56 {strides = array<i32>} : memref<1x72x16xbf16, #tpu.memory_space<vmem>>, vector<1x72x16xbf16>,
    %c0_49 = arith.constant 0 : index
    %c0_50 = arith.constant 0 : index
    %57 = vector.load %arg3[%c0_49, %c0_50] : memref<72x1xf32, #tpu.memory_space<vmem>>, vector<72x1xf32>
    %58 = vector.broadcast %57 : vector<72x1xf32> to vector<72x16xf32>
    %59 = arith.mulf %52, %58 : vector<72x16xf32>
    %cst_51 = arith.constant dense<0.000000e+00> : vector<16xf32>
    %60 = vector.multi_reduction <add>, %59, %cst_51 [0] : vector<72x16xf32> to vector<16xf32>
    %61 = vector.shape_cast %60 : vector<16xf32> to vector<1x16xf32>
    %c0_52 = arith.constant 0 : index
    %c0_53 = arith.constant 0 : index
    %c0_54 = arith.constant 0 : index
    %62 = vector.load %arg5[%c0_52, %c0_53, %c0_54] : memref<1x2x16xf32, #tpu.memory_space<vmem>>, vector<1x1x16xf32>
    %63 = vector.shape_cast %62 : vector<1x1x16xf32> to vector<1x16xf32>
    %64 = vector.shape_cast %61 : vector<1x16xf32> to vector<1x1x16xf32>
    tpu.vector_store %arg5[%c0_52, %c0_53, %c0_54], %64 {strides = array<i32>} : memref<1x2x16xf32, #tpu.memory_space<vmem>>, vector<1x1x16xf32>,
    %65 = arith.mulf %52, %52 : vector<72x16xf32>
    %66 = vector.broadcast %57 : vector<72x1xf32> to vector<72x16xf32>
    %67 = arith.mulf %65, %66 : vector<72x16xf32>
    %cst_55 = arith.constant dense<0.000000e+00> : vector<16xf32>
    %68 = vector.multi_reduction <add>, %67, %cst_55 [0] : vector<72x16xf32> to vector<16xf32>
    %69 = vector.shape_cast %68 : vector<16xf32> to vector<1x16xf32>
    %c0_56 = arith.constant 0 : index
    %c1_57 = arith.constant 1 : index
    %c0_58 = arith.constant 0 : index
    %70 = vector.load %arg5[%c0_56, %c1_57, %c0_58] : memref<1x2x16xf32, #tpu.memory_space<vmem>>, vector<1x1x16xf32>
    %71 = vector.shape_cast %70 : vector<1x1x16xf32> to vector<1x16xf32>
    %72 = vector.shape_cast %69 : vector<1x16xf32> to vector<1x1x16xf32>
    tpu.vector_store %arg5[%c0_56, %c1_57, %c0_58], %72 {strides = array<i32>} : memref<1x2x16xf32, #tpu.memory_space<vmem>>, vector<1x1x16xf32>,
    return
  }
  func.func @transform_0(%arg0: i32) -> (i32, i32, i32) {
    %c0_i32 = arith.constant 0 : i32
    %c0_i32_0 = arith.constant 0 : i32
    %c0_i32_1 = arith.constant 0 : i32
    return %arg0, %c0_i32, %c0_i32_0 : i32, i32, i32
  }
  func.func @transform_1(%arg0: i32) -> (i32, i32, i32) {
    %c0_i32 = arith.constant 0 : i32
    %c0_i32_0 = arith.constant 0 : i32
    %c0_i32_1 = arith.constant 0 : i32
    %c0_i32_2 = arith.constant 0 : i32
    return %c0_i32, %c0_i32_0, %c0_i32_1 : i32, i32, i32
  }
  func.func @transform_2(%arg0: i32) -> (i32, i32) {
    %c0_i32 = arith.constant 0 : i32
    %c0_i32_0 = arith.constant 0 : i32
    %c0_i32_1 = arith.constant 0 : i32
    return %c0_i32, %c0_i32_0 : i32, i32
  }
  func.func @transform_3(%arg0: i32) -> (i32, i32, i32) {
    %c0_i32 = arith.constant 0 : i32
    %c0_i32_0 = arith.constant 0 : i32
    %c0_i32_1 = arith.constant 0 : i32
    return %arg0, %c0_i32, %c0_i32_0 : i32, i32, i32
  }
  func.func @transform_4(%arg0: i32) -> (i32, i32, i32) {
    %c0_i32 = arith.constant 0 : i32
    %c0_i32_0 = arith.constant 0 : i32
    %c0_i32_1 = arith.constant 0 : i32
    return %arg0, %c0_i32, %c0_i32_0 : i32, i32, i32
  }
}

module attributes {stable_mosaic.version = 11 : i64} {
  func.func @_conv2_kernel(%arg0: i32, %arg1: memref<1x112x16xbf16, #tpu.memory_space<vmem>>, %arg2: memref<1x16xf32, #tpu.memory_space<vmem>>, %arg3: memref<1x16xf32, #tpu.memory_space<vmem>>, %arg4: memref<112x1xf32, #tpu.memory_space<vmem>>, %arg5: memref<9x16x16xbf16, #tpu.memory_space<vmem>>, %arg6: memref<80x1xf32, #tpu.memory_space<vmem>>, %arg7: memref<1x80x16xbf16, #tpu.memory_space<vmem>>, %arg8: memref<16x16xbf16, #tpu.memory_space<vmem>>, %arg9: memref<1x80x16xbf16, #tpu.memory_space<vmem>>, %arg10: memref<1x80x16xbf16, #tpu.memory_space<vmem>>, %arg11: memref<1x4x16xf32, #tpu.memory_space<vmem>>, %arg12: memref<112x16xbf16, #tpu.memory_space<vmem>>) attributes {dimension_semantics = [#tpu.dimension_semantics<parallel>], iteration_bounds = array<i64: 2>, scalar_prefetch = 0 : i64, scratch_operands = 1 : i64, tpu.core_type = #tpu.core_type<tc>, window_params = [{transform_indices = @transform_0, window_bounds = array<i64: 1, 112, 16>}, {pipeline_mode = #tpu.pipeline_mode<synchronous>, transform_indices = @transform_1, window_bounds = array<i64: 1, 16>}, {pipeline_mode = #tpu.pipeline_mode<synchronous>, transform_indices = @transform_2, window_bounds = array<i64: 1, 16>}, {pipeline_mode = #tpu.pipeline_mode<synchronous>, transform_indices = @transform_3, window_bounds = array<i64: 112, 1>}, {pipeline_mode = #tpu.pipeline_mode<synchronous>, transform_indices = @transform_4, window_bounds = array<i64: 9, 16, 16>}, {pipeline_mode = #tpu.pipeline_mode<synchronous>, transform_indices = @transform_5, window_bounds = array<i64: 80, 1>}, {transform_indices = @transform_6, window_bounds = array<i64: 1, 80, 16>}, {pipeline_mode = #tpu.pipeline_mode<synchronous>, transform_indices = @transform_7, window_bounds = array<i64: 16, 16>}, {transform_indices = @transform_8, window_bounds = array<i64: 1, 80, 16>}, {transform_indices = @transform_9, window_bounds = array<i64: 1, 80, 16>}, {transform_indices = @transform_10, window_bounds = array<i64: 1, 4, 16>}]} {
    %c0 = arith.constant 0 : index
    %c0_0 = arith.constant 0 : index
    %c0_1 = arith.constant 0 : index
    %0 = vector.load %arg1[%c0, %c0_0, %c0_1] : memref<1x112x16xbf16, #tpu.memory_space<vmem>>, vector<1x112x16xbf16>
    %1 = vector.shape_cast %0 : vector<1x112x16xbf16> to vector<112x16xbf16>
    %2 = arith.extf %1 : vector<112x16xbf16> to vector<112x16xf32>
    %c0_2 = arith.constant 0 : index
    %c0_3 = arith.constant 0 : index
    %3 = vector.load %arg2[%c0_2, %c0_3] : memref<1x16xf32, #tpu.memory_space<vmem>>, vector<1x16xf32>
    %4 = vector.broadcast %3 : vector<1x16xf32> to vector<112x16xf32>
    %5 = arith.mulf %2, %4 : vector<112x16xf32>
    %c0_4 = arith.constant 0 : index
    %c0_5 = arith.constant 0 : index
    %6 = vector.load %arg3[%c0_4, %c0_5] : memref<1x16xf32, #tpu.memory_space<vmem>>, vector<1x16xf32>
    %7 = vector.broadcast %6 : vector<1x16xf32> to vector<112x16xf32>
    %8 = arith.addf %5, %7 : vector<112x16xf32>
    %cst = arith.constant 0.000000e+00 : f32
    %9 = vector.broadcast %cst : f32 to vector<112x16xf32>
    %10 = arith.maximumf %8, %9 : vector<112x16xf32>
    %c0_6 = arith.constant 0 : index
    %c0_7 = arith.constant 0 : index
    %11 = vector.load %arg4[%c0_6, %c0_7] : memref<112x1xf32, #tpu.memory_space<vmem>>, vector<112x1xf32>
    %12 = vector.broadcast %11 : vector<112x1xf32> to vector<112x16xf32>
    %13 = arith.mulf %10, %12 : vector<112x16xf32>
    %14 = arith.truncf %13 : vector<112x16xf32> to vector<112x16xbf16>
    %c0_8 = arith.constant 0 : index
    %c0_9 = arith.constant 0 : index
    %15 = vector.load %arg12[%c0_8, %c0_9] : memref<112x16xbf16, #tpu.memory_space<vmem>>, vector<112x16xbf16>
    tpu.vector_store %arg12[%c0_8, %c0_9], %14 {strides = array<i32>} : memref<112x16xbf16, #tpu.memory_space<vmem>>, vector<112x16xbf16>,
    %c0_10 = arith.constant 0 : index
    %c0_11 = arith.constant 0 : index
    %16 = vector.load %arg12[%c0_10, %c0_11] : memref<112x16xbf16, #tpu.memory_space<vmem>>, vector<80x16xbf16>
    %c0_12 = arith.constant 0 : index
    %c0_13 = arith.constant 0 : index
    %c0_14 = arith.constant 0 : index
    %17 = vector.load %arg5[%c0_12, %c0_13, %c0_14] : memref<9x16x16xbf16, #tpu.memory_space<vmem>>, vector<1x16x16xbf16>
    %18 = vector.shape_cast %17 : vector<1x16x16xbf16> to vector<16x16xbf16>
    %cst_15 = arith.constant dense<0.000000e+00> : vector<80x16xf32>
    %19 = tpu.matmul %16, %18, %cst_15 {dimension_numbers = #tpu.dot_dimension_numbers<[1], [0], [0], [1], [0, 0, 1, 1], [], []>} : vector<80x16xbf16>, vector<16x16xbf16>, vector<80x16xf32> -> vector<80x16xf32>
    %c1 = arith.constant 1 : index
    %c0_16 = arith.constant 0 : index
    %20 = vector.load %arg12[%c1, %c0_16] : memref<112x16xbf16, #tpu.memory_space<vmem>>, vector<80x16xbf16>
    %c1_17 = arith.constant 1 : index
    %c0_18 = arith.constant 0 : index
    %c0_19 = arith.constant 0 : index
    %21 = vector.load %arg5[%c1_17, %c0_18, %c0_19] : memref<9x16x16xbf16, #tpu.memory_space<vmem>>, vector<1x16x16xbf16>
    %22 = vector.shape_cast %21 : vector<1x16x16xbf16> to vector<16x16xbf16>
    %cst_20 = arith.constant dense<0.000000e+00> : vector<80x16xf32>
    %23 = tpu.matmul %20, %22, %cst_20 {dimension_numbers = #tpu.dot_dimension_numbers<[1], [0], [0], [1], [0, 0, 1, 1], [], []>} : vector<80x16xbf16>, vector<16x16xbf16>, vector<80x16xf32> -> vector<80x16xf32>
    %24 = arith.addf %19, %23 : vector<80x16xf32>
    %c2 = arith.constant 2 : index
    %c0_21 = arith.constant 0 : index
    %25 = vector.load %arg12[%c2, %c0_21] : memref<112x16xbf16, #tpu.memory_space<vmem>>, vector<80x16xbf16>
    %c2_22 = arith.constant 2 : index
    %c0_23 = arith.constant 0 : index
    %c0_24 = arith.constant 0 : index
    %26 = vector.load %arg5[%c2_22, %c0_23, %c0_24] : memref<9x16x16xbf16, #tpu.memory_space<vmem>>, vector<1x16x16xbf16>
    %27 = vector.shape_cast %26 : vector<1x16x16xbf16> to vector<16x16xbf16>
    %cst_25 = arith.constant dense<0.000000e+00> : vector<80x16xf32>
    %28 = tpu.matmul %25, %27, %cst_25 {dimension_numbers = #tpu.dot_dimension_numbers<[1], [0], [0], [1], [0, 0, 1, 1], [], []>} : vector<80x16xbf16>, vector<16x16xbf16>, vector<80x16xf32> -> vector<80x16xf32>
    %29 = arith.addf %24, %28 : vector<80x16xf32>
    %c10 = arith.constant 10 : index
    %c0_26 = arith.constant 0 : index
    %30 = vector.load %arg12[%c10, %c0_26] : memref<112x16xbf16, #tpu.memory_space<vmem>>, vector<80x16xbf16>
    %c3 = arith.constant 3 : index
    %c0_27 = arith.constant 0 : index
    %c0_28 = arith.constant 0 : index
    %31 = vector.load %arg5[%c3, %c0_27, %c0_28] : memref<9x16x16xbf16, #tpu.memory_space<vmem>>, vector<1x16x16xbf16>
    %32 = vector.shape_cast %31 : vector<1x16x16xbf16> to vector<16x16xbf16>
    %cst_29 = arith.constant dense<0.000000e+00> : vector<80x16xf32>
    %33 = tpu.matmul %30, %32, %cst_29 {dimension_numbers = #tpu.dot_dimension_numbers<[1], [0], [0], [1], [0, 0, 1, 1], [], []>} : vector<80x16xbf16>, vector<16x16xbf16>, vector<80x16xf32> -> vector<80x16xf32>
    %34 = arith.addf %29, %33 : vector<80x16xf32>
    %c11 = arith.constant 11 : index
    %c0_30 = arith.constant 0 : index
    %35 = vector.load %arg12[%c11, %c0_30] : memref<112x16xbf16, #tpu.memory_space<vmem>>, vector<80x16xbf16>
    %c4 = arith.constant 4 : index
    %c0_31 = arith.constant 0 : index
    %c0_32 = arith.constant 0 : index
    %36 = vector.load %arg5[%c4, %c0_31, %c0_32] : memref<9x16x16xbf16, #tpu.memory_space<vmem>>, vector<1x16x16xbf16>
    %37 = vector.shape_cast %36 : vector<1x16x16xbf16> to vector<16x16xbf16>
    %cst_33 = arith.constant dense<0.000000e+00> : vector<80x16xf32>
    %38 = tpu.matmul %35, %37, %cst_33 {dimension_numbers = #tpu.dot_dimension_numbers<[1], [0], [0], [1], [0, 0, 1, 1], [], []>} : vector<80x16xbf16>, vector<16x16xbf16>, vector<80x16xf32> -> vector<80x16xf32>
    %39 = arith.addf %34, %38 : vector<80x16xf32>
    %c12 = arith.constant 12 : index
    %c0_34 = arith.constant 0 : index
    %40 = vector.load %arg12[%c12, %c0_34] : memref<112x16xbf16, #tpu.memory_space<vmem>>, vector<80x16xbf16>
    %c5 = arith.constant 5 : index
    %c0_35 = arith.constant 0 : index
    %c0_36 = arith.constant 0 : index
    %41 = vector.load %arg5[%c5, %c0_35, %c0_36] : memref<9x16x16xbf16, #tpu.memory_space<vmem>>, vector<1x16x16xbf16>
    %42 = vector.shape_cast %41 : vector<1x16x16xbf16> to vector<16x16xbf16>
    %cst_37 = arith.constant dense<0.000000e+00> : vector<80x16xf32>
    %43 = tpu.matmul %40, %42, %cst_37 {dimension_numbers = #tpu.dot_dimension_numbers<[1], [0], [0], [1], [0, 0, 1, 1], [], []>} : vector<80x16xbf16>, vector<16x16xbf16>, vector<80x16xf32> -> vector<80x16xf32>
    %44 = arith.addf %39, %43 : vector<80x16xf32>
    %c20 = arith.constant 20 : index
    %c0_38 = arith.constant 0 : index
    %45 = vector.load %arg12[%c20, %c0_38] : memref<112x16xbf16, #tpu.memory_space<vmem>>, vector<80x16xbf16>
    %c6 = arith.constant 6 : index
    %c0_39 = arith.constant 0 : index
    %c0_40 = arith.constant 0 : index
    %46 = vector.load %arg5[%c6, %c0_39, %c0_40] : memref<9x16x16xbf16, #tpu.memory_space<vmem>>, vector<1x16x16xbf16>
    %47 = vector.shape_cast %46 : vector<1x16x16xbf16> to vector<16x16xbf16>
    %cst_41 = arith.constant dense<0.000000e+00> : vector<80x16xf32>
    %48 = tpu.matmul %45, %47, %cst_41 {dimension_numbers = #tpu.dot_dimension_numbers<[1], [0], [0], [1], [0, 0, 1, 1], [], []>} : vector<80x16xbf16>, vector<16x16xbf16>, vector<80x16xf32> -> vector<80x16xf32>
    %49 = arith.addf %44, %48 : vector<80x16xf32>
    %c21 = arith.constant 21 : index
    %c0_42 = arith.constant 0 : index
    %50 = vector.load %arg12[%c21, %c0_42] : memref<112x16xbf16, #tpu.memory_space<vmem>>, vector<80x16xbf16>
    %c7 = arith.constant 7 : index
    %c0_43 = arith.constant 0 : index
    %c0_44 = arith.constant 0 : index
    %51 = vector.load %arg5[%c7, %c0_43, %c0_44] : memref<9x16x16xbf16, #tpu.memory_space<vmem>>, vector<1x16x16xbf16>
    %52 = vector.shape_cast %51 : vector<1x16x16xbf16> to vector<16x16xbf16>
    %cst_45 = arith.constant dense<0.000000e+00> : vector<80x16xf32>
    %53 = tpu.matmul %50, %52, %cst_45 {dimension_numbers = #tpu.dot_dimension_numbers<[1], [0], [0], [1], [0, 0, 1, 1], [], []>} : vector<80x16xbf16>, vector<16x16xbf16>, vector<80x16xf32> -> vector<80x16xf32>
    %54 = arith.addf %49, %53 : vector<80x16xf32>
    %c22 = arith.constant 22 : index
    %c0_46 = arith.constant 0 : index
    %55 = vector.load %arg12[%c22, %c0_46] : memref<112x16xbf16, #tpu.memory_space<vmem>>, vector<80x16xbf16>
    %c8 = arith.constant 8 : index
    %c0_47 = arith.constant 0 : index
    %c0_48 = arith.constant 0 : index
    %56 = vector.load %arg5[%c8, %c0_47, %c0_48] : memref<9x16x16xbf16, #tpu.memory_space<vmem>>, vector<1x16x16xbf16>
    %57 = vector.shape_cast %56 : vector<1x16x16xbf16> to vector<16x16xbf16>
    %cst_49 = arith.constant dense<0.000000e+00> : vector<80x16xf32>
    %58 = tpu.matmul %55, %57, %cst_49 {dimension_numbers = #tpu.dot_dimension_numbers<[1], [0], [0], [1], [0, 0, 1, 1], [], []>} : vector<80x16xbf16>, vector<16x16xbf16>, vector<80x16xf32> -> vector<80x16xf32>
    %59 = arith.addf %54, %58 : vector<80x16xf32>
    %60 = arith.truncf %59 : vector<80x16xf32> to vector<80x16xbf16>
    %c0_50 = arith.constant 0 : index
    %c0_51 = arith.constant 0 : index
    %c0_52 = arith.constant 0 : index
    %61 = vector.load %arg9[%c0_50, %c0_51, %c0_52] : memref<1x80x16xbf16, #tpu.memory_space<vmem>>, vector<1x80x16xbf16>
    %62 = vector.shape_cast %61 : vector<1x80x16xbf16> to vector<80x16xbf16>
    %63 = vector.shape_cast %60 : vector<80x16xbf16> to vector<1x80x16xbf16>
    tpu.vector_store %arg9[%c0_50, %c0_51, %c0_52], %63 {strides = array<i32>} : memref<1x80x16xbf16, #tpu.memory_space<vmem>>, vector<1x80x16xbf16>,
    %c0_53 = arith.constant 0 : index
    %c0_54 = arith.constant 0 : index
    %64 = vector.load %arg6[%c0_53, %c0_54] : memref<80x1xf32, #tpu.memory_space<vmem>>, vector<80x1xf32>
    %65 = vector.broadcast %64 : vector<80x1xf32> to vector<80x16xf32>
    %66 = arith.mulf %59, %65 : vector<80x16xf32>
    %cst_55 = arith.constant dense<0.000000e+00> : vector<16xf32>
    %67 = vector.multi_reduction <add>, %66, %cst_55 [0] : vector<80x16xf32> to vector<16xf32>
    %68 = vector.shape_cast %67 : vector<16xf32> to vector<1x16xf32>
    %c0_56 = arith.constant 0 : index
    %c0_57 = arith.constant 0 : index
    %c0_58 = arith.constant 0 : index
    %69 = vector.load %arg11[%c0_56, %c0_57, %c0_58] : memref<1x4x16xf32, #tpu.memory_space<vmem>>, vector<1x1x16xf32>
    %70 = vector.shape_cast %69 : vector<1x1x16xf32> to vector<1x16xf32>
    %71 = vector.shape_cast %68 : vector<1x16xf32> to vector<1x1x16xf32>
    tpu.vector_store %arg11[%c0_56, %c0_57, %c0_58], %71 {strides = array<i32>} : memref<1x4x16xf32, #tpu.memory_space<vmem>>, vector<1x1x16xf32>,
    %72 = arith.mulf %59, %59 : vector<80x16xf32>
    %73 = vector.broadcast %64 : vector<80x1xf32> to vector<80x16xf32>
    %74 = arith.mulf %72, %73 : vector<80x16xf32>
    %cst_59 = arith.constant dense<0.000000e+00> : vector<16xf32>
    %75 = vector.multi_reduction <add>, %74, %cst_59 [0] : vector<80x16xf32> to vector<16xf32>
    %76 = vector.shape_cast %75 : vector<16xf32> to vector<1x16xf32>
    %c0_60 = arith.constant 0 : index
    %c1_61 = arith.constant 1 : index
    %c0_62 = arith.constant 0 : index
    %77 = vector.load %arg11[%c0_60, %c1_61, %c0_62] : memref<1x4x16xf32, #tpu.memory_space<vmem>>, vector<1x1x16xf32>
    %78 = vector.shape_cast %77 : vector<1x1x16xf32> to vector<1x16xf32>
    %79 = vector.shape_cast %76 : vector<1x16xf32> to vector<1x1x16xf32>
    tpu.vector_store %arg11[%c0_60, %c1_61, %c0_62], %79 {strides = array<i32>} : memref<1x4x16xf32, #tpu.memory_space<vmem>>, vector<1x1x16xf32>,
    %c0_63 = arith.constant 0 : index
    %c0_64 = arith.constant 0 : index
    %c0_65 = arith.constant 0 : index
    %80 = vector.load %arg7[%c0_63, %c0_64, %c0_65] : memref<1x80x16xbf16, #tpu.memory_space<vmem>>, vector<1x80x16xbf16>
    %81 = vector.shape_cast %80 : vector<1x80x16xbf16> to vector<80x16xbf16>
    %c0_66 = arith.constant 0 : index
    %c0_67 = arith.constant 0 : index
    %82 = vector.load %arg8[%c0_66, %c0_67] : memref<16x16xbf16, #tpu.memory_space<vmem>>, vector<16x16xbf16>
    %cst_68 = arith.constant dense<0.000000e+00> : vector<80x16xf32>
    %83 = tpu.matmul %81, %82, %cst_68 {dimension_numbers = #tpu.dot_dimension_numbers<[1], [0], [0], [1], [0, 0, 1, 1], [], []>} : vector<80x16xbf16>, vector<16x16xbf16>, vector<80x16xf32> -> vector<80x16xf32>
    %84 = arith.truncf %83 : vector<80x16xf32> to vector<80x16xbf16>
    %c0_69 = arith.constant 0 : index
    %c0_70 = arith.constant 0 : index
    %c0_71 = arith.constant 0 : index
    %85 = vector.load %arg10[%c0_69, %c0_70, %c0_71] : memref<1x80x16xbf16, #tpu.memory_space<vmem>>, vector<1x80x16xbf16>
    %86 = vector.shape_cast %85 : vector<1x80x16xbf16> to vector<80x16xbf16>
    %87 = vector.shape_cast %84 : vector<80x16xbf16> to vector<1x80x16xbf16>
    tpu.vector_store %arg10[%c0_69, %c0_70, %c0_71], %87 {strides = array<i32>} : memref<1x80x16xbf16, #tpu.memory_space<vmem>>, vector<1x80x16xbf16>,
    %88 = vector.broadcast %64 : vector<80x1xf32> to vector<80x16xf32>
    %89 = arith.mulf %83, %88 : vector<80x16xf32>
    %cst_72 = arith.constant dense<0.000000e+00> : vector<16xf32>
    %90 = vector.multi_reduction <add>, %89, %cst_72 [0] : vector<80x16xf32> to vector<16xf32>
    %91 = vector.shape_cast %90 : vector<16xf32> to vector<1x16xf32>
    %c0_73 = arith.constant 0 : index
    %c2_74 = arith.constant 2 : index
    %c0_75 = arith.constant 0 : index
    %92 = vector.load %arg11[%c0_73, %c2_74, %c0_75] : memref<1x4x16xf32, #tpu.memory_space<vmem>>, vector<1x1x16xf32>
    %93 = vector.shape_cast %92 : vector<1x1x16xf32> to vector<1x16xf32>
    %94 = vector.shape_cast %91 : vector<1x16xf32> to vector<1x1x16xf32>
    tpu.vector_store %arg11[%c0_73, %c2_74, %c0_75], %94 {strides = array<i32>} : memref<1x4x16xf32, #tpu.memory_space<vmem>>, vector<1x1x16xf32>,
    %95 = arith.mulf %83, %83 : vector<80x16xf32>
    %96 = vector.broadcast %64 : vector<80x1xf32> to vector<80x16xf32>
    %97 = arith.mulf %95, %96 : vector<80x16xf32>
    %cst_76 = arith.constant dense<0.000000e+00> : vector<16xf32>
    %98 = vector.multi_reduction <add>, %97, %cst_76 [0] : vector<80x16xf32> to vector<16xf32>
    %99 = vector.shape_cast %98 : vector<16xf32> to vector<1x16xf32>
    %c0_77 = arith.constant 0 : index
    %c3_78 = arith.constant 3 : index
    %c0_79 = arith.constant 0 : index
    %100 = vector.load %arg11[%c0_77, %c3_78, %c0_79] : memref<1x4x16xf32, #tpu.memory_space<vmem>>, vector<1x1x16xf32>
    %101 = vector.shape_cast %100 : vector<1x1x16xf32> to vector<1x16xf32>
    %102 = vector.shape_cast %99 : vector<1x16xf32> to vector<1x1x16xf32>
    tpu.vector_store %arg11[%c0_77, %c3_78, %c0_79], %102 {strides = array<i32>} : memref<1x4x16xf32, #tpu.memory_space<vmem>>, vector<1x1x16xf32>,
    return
  }
  func.func @transform_0(%arg0: i32) -> (i32, i32, i32) {
    %c0_i32 = arith.constant 0 : i32
    %c0_i32_0 = arith.constant 0 : i32
    %c0_i32_1 = arith.constant 0 : i32
    return %arg0, %c0_i32, %c0_i32_0 : i32, i32, i32
  }
  func.func @transform_1(%arg0: i32) -> (i32, i32) {
    %c0_i32 = arith.constant 0 : i32
    %c0_i32_0 = arith.constant 0 : i32
    %c0_i32_1 = arith.constant 0 : i32
    return %c0_i32, %c0_i32_0 : i32, i32
  }
  func.func @transform_2(%arg0: i32) -> (i32, i32) {
    %c0_i32 = arith.constant 0 : i32
    %c0_i32_0 = arith.constant 0 : i32
    %c0_i32_1 = arith.constant 0 : i32
    return %c0_i32, %c0_i32_0 : i32, i32
  }
  func.func @transform_3(%arg0: i32) -> (i32, i32) {
    %c0_i32 = arith.constant 0 : i32
    %c0_i32_0 = arith.constant 0 : i32
    %c0_i32_1 = arith.constant 0 : i32
    return %c0_i32, %c0_i32_0 : i32, i32
  }
  func.func @transform_4(%arg0: i32) -> (i32, i32, i32) {
    %c0_i32 = arith.constant 0 : i32
    %c0_i32_0 = arith.constant 0 : i32
    %c0_i32_1 = arith.constant 0 : i32
    %c0_i32_2 = arith.constant 0 : i32
    return %c0_i32, %c0_i32_0, %c0_i32_1 : i32, i32, i32
  }
  func.func @transform_5(%arg0: i32) -> (i32, i32) {
    %c0_i32 = arith.constant 0 : i32
    %c0_i32_0 = arith.constant 0 : i32
    %c0_i32_1 = arith.constant 0 : i32
    return %c0_i32, %c0_i32_0 : i32, i32
  }
  func.func @transform_6(%arg0: i32) -> (i32, i32, i32) {
    %c0_i32 = arith.constant 0 : i32
    %c0_i32_0 = arith.constant 0 : i32
    %c0_i32_1 = arith.constant 0 : i32
    return %arg0, %c0_i32, %c0_i32_0 : i32, i32, i32
  }
  func.func @transform_7(%arg0: i32) -> (i32, i32) {
    %c0_i32 = arith.constant 0 : i32
    %c0_i32_0 = arith.constant 0 : i32
    %c0_i32_1 = arith.constant 0 : i32
    return %c0_i32, %c0_i32_0 : i32, i32
  }
  func.func @transform_8(%arg0: i32) -> (i32, i32, i32) {
    %c0_i32 = arith.constant 0 : i32
    %c0_i32_0 = arith.constant 0 : i32
    %c0_i32_1 = arith.constant 0 : i32
    return %arg0, %c0_i32, %c0_i32_0 : i32, i32, i32
  }
  func.func @transform_9(%arg0: i32) -> (i32, i32, i32) {
    %c0_i32 = arith.constant 0 : i32
    %c0_i32_0 = arith.constant 0 : i32
    %c0_i32_1 = arith.constant 0 : i32
    return %arg0, %c0_i32, %c0_i32_0 : i32, i32, i32
  }
  func.func @transform_10(%arg0: i32) -> (i32, i32, i32) {
    %c0_i32 = arith.constant 0 : i32
    %c0_i32_0 = arith.constant 0 : i32
    %c0_i32_1 = arith.constant 0 : i32
    return %arg0, %c0_i32, %c0_i32_0 : i32, i32, i32
  }
}

module attributes {stable_mosaic.version = 11 : i64} {
  func.func @_bn_add_relu_kernel(%arg0: i32, %arg1: memref<1x80x16xbf16, #tpu.memory_space<vmem>>, %arg2: memref<1x16xf32, #tpu.memory_space<vmem>>, %arg3: memref<1x16xf32, #tpu.memory_space<vmem>>, %arg4: memref<1x80x16xbf16, #tpu.memory_space<vmem>>, %arg5: memref<1x16xf32, #tpu.memory_space<vmem>>, %arg6: memref<1x16xf32, #tpu.memory_space<vmem>>, %arg7: memref<1x80x16xf32, #tpu.memory_space<vmem>>) attributes {dimension_semantics = [#tpu.dimension_semantics<parallel>], iteration_bounds = array<i64: 2>, scalar_prefetch = 0 : i64, scratch_operands = 0 : i64, tpu.core_type = #tpu.core_type<tc>, window_params = [{transform_indices = @transform_0, window_bounds = array<i64: 1, 80, 16>}, {pipeline_mode = #tpu.pipeline_mode<synchronous>, transform_indices = @transform_1, window_bounds = array<i64: 1, 16>}, {pipeline_mode = #tpu.pipeline_mode<synchronous>, transform_indices = @transform_2, window_bounds = array<i64: 1, 16>}, {transform_indices = @transform_3, window_bounds = array<i64: 1, 80, 16>}, {pipeline_mode = #tpu.pipeline_mode<synchronous>, transform_indices = @transform_4, window_bounds = array<i64: 1, 16>}, {pipeline_mode = #tpu.pipeline_mode<synchronous>, transform_indices = @transform_5, window_bounds = array<i64: 1, 16>}, {transform_indices = @transform_6, window_bounds = array<i64: 1, 80, 16>}]} {
    %c0 = arith.constant 0 : index
    %c0_0 = arith.constant 0 : index
    %c0_1 = arith.constant 0 : index
    %0 = vector.load %arg4[%c0, %c0_0, %c0_1] : memref<1x80x16xbf16, #tpu.memory_space<vmem>>, vector<1x80x16xbf16>
    %1 = vector.shape_cast %0 : vector<1x80x16xbf16> to vector<80x16xbf16>
    %2 = arith.extf %1 : vector<80x16xbf16> to vector<80x16xf32>
    %c0_2 = arith.constant 0 : index
    %c0_3 = arith.constant 0 : index
    %3 = vector.load %arg5[%c0_2, %c0_3] : memref<1x16xf32, #tpu.memory_space<vmem>>, vector<1x16xf32>
    %4 = vector.broadcast %3 : vector<1x16xf32> to vector<80x16xf32>
    %5 = arith.mulf %2, %4 : vector<80x16xf32>
    %c0_4 = arith.constant 0 : index
    %c0_5 = arith.constant 0 : index
    %6 = vector.load %arg6[%c0_4, %c0_5] : memref<1x16xf32, #tpu.memory_space<vmem>>, vector<1x16xf32>
    %7 = vector.broadcast %6 : vector<1x16xf32> to vector<80x16xf32>
    %8 = arith.addf %5, %7 : vector<80x16xf32>
    %c0_6 = arith.constant 0 : index
    %c0_7 = arith.constant 0 : index
    %c0_8 = arith.constant 0 : index
    %9 = vector.load %arg1[%c0_6, %c0_7, %c0_8] : memref<1x80x16xbf16, #tpu.memory_space<vmem>>, vector<1x80x16xbf16>
    %10 = vector.shape_cast %9 : vector<1x80x16xbf16> to vector<80x16xbf16>
    %11 = arith.extf %10 : vector<80x16xbf16> to vector<80x16xf32>
    %c0_9 = arith.constant 0 : index
    %c0_10 = arith.constant 0 : index
    %12 = vector.load %arg2[%c0_9, %c0_10] : memref<1x16xf32, #tpu.memory_space<vmem>>, vector<1x16xf32>
    %13 = vector.broadcast %12 : vector<1x16xf32> to vector<80x16xf32>
    %14 = arith.mulf %11, %13 : vector<80x16xf32>
    %c0_11 = arith.constant 0 : index
    %c0_12 = arith.constant 0 : index
    %15 = vector.load %arg3[%c0_11, %c0_12] : memref<1x16xf32, #tpu.memory_space<vmem>>, vector<1x16xf32>
    %16 = vector.broadcast %15 : vector<1x16xf32> to vector<80x16xf32>
    %17 = arith.addf %14, %16 : vector<80x16xf32>
    %18 = arith.addf %17, %8 : vector<80x16xf32>
    %cst = arith.constant 0.000000e+00 : f32
    %19 = vector.broadcast %cst : f32 to vector<80x16xf32>
    %20 = arith.maximumf %18, %19 : vector<80x16xf32>
    %c0_13 = arith.constant 0 : index
    %c0_14 = arith.constant 0 : index
    %c0_15 = arith.constant 0 : index
    %21 = vector.load %arg7[%c0_13, %c0_14, %c0_15] : memref<1x80x16xf32, #tpu.memory_space<vmem>>, vector<1x80x16xf32>
    %22 = vector.shape_cast %21 : vector<1x80x16xf32> to vector<80x16xf32>
    %23 = vector.shape_cast %20 : vector<80x16xf32> to vector<1x80x16xf32>
    tpu.vector_store %arg7[%c0_13, %c0_14, %c0_15], %23 {strides = array<i32>} : memref<1x80x16xf32, #tpu.memory_space<vmem>>, vector<1x80x16xf32>,
    return
  }
  func.func @transform_0(%arg0: i32) -> (i32, i32, i32) {
    %c0_i32 = arith.constant 0 : i32
    %c0_i32_0 = arith.constant 0 : i32
    %c0_i32_1 = arith.constant 0 : i32
    return %arg0, %c0_i32, %c0_i32_0 : i32, i32, i32
  }
  func.func @transform_1(%arg0: i32) -> (i32, i32) {
    %c0_i32 = arith.constant 0 : i32
    %c0_i32_0 = arith.constant 0 : i32
    %c0_i32_1 = arith.constant 0 : i32
    return %c0_i32, %c0_i32_0 : i32, i32
  }
  func.func @transform_2(%arg0: i32) -> (i32, i32) {
    %c0_i32 = arith.constant 0 : i32
    %c0_i32_0 = arith.constant 0 : i32
    %c0_i32_1 = arith.constant 0 : i32
    return %c0_i32, %c0_i32_0 : i32, i32
  }
  func.func @transform_3(%arg0: i32) -> (i32, i32, i32) {
    %c0_i32 = arith.constant 0 : i32
    %c0_i32_0 = arith.constant 0 : i32
    %c0_i32_1 = arith.constant 0 : i32
    return %arg0, %c0_i32, %c0_i32_0 : i32, i32, i32
  }
  func.func @transform_4(%arg0: i32) -> (i32, i32) {
    %c0_i32 = arith.constant 0 : i32
    %c0_i32_0 = arith.constant 0 : i32
    %c0_i32_1 = arith.constant 0 : i32
    return %c0_i32, %c0_i32_0 : i32, i32
  }
  func.func @transform_5(%arg0: i32) -> (i32, i32) {
    %c0_i32 = arith.constant 0 : i32
    %c0_i32_0 = arith.constant 0 : i32
    %c0_i32_1 = arith.constant 0 : i32
    return %c0_i32, %c0_i32_0 : i32, i32
  }
  func.func @transform_6(%arg0: i32) -> (i32, i32, i32) {
    %c0_i32 = arith.constant 0 : i32
    %c0_i32_0 = arith.constant 0 : i32
    %c0_i32_1 = arith.constant 0 : i32
    return %arg0, %c0_i32, %c0_i32_0 : i32, i32, i32
  }
}

</mosaic_0001>

<bundles_post_ra>
// kernel: skinny_block_forward.5
= control target key start
LH: loop header
LB: loop body
LE: loop exit
PB: predicated region body
PF: predicated region fallthrough
CT: control target
= control target key end

     0   :  { %s581_s21 = smov 0   ;;  %s701_s0 = inlined_call_operand.vmem [shape: bf16[2,80,16], index: 0, kind: input, shape index: {}]   ;;  %s702_s1 = inlined_call_operand.vmem [shape: f32[1,16], index: 1, kind: input, shape index: {}]   ;;  %s703_s2 = inlined_call_operand.vmem [shape: f32[1,16], index: 2, kind: input, shape index: {}]   ;;  %s704_s3 = inlined_call_operand.vmem [shape: bf16[2,80,16], index: 3, kind: input, shape index: {}]   ;;  %s705_s4 = inlined_call_operand.vmem [shape: f32[1,16], index: 4, kind: input, shape index: {}]   ;;  %s706_s5 = inlined_call_operand.vmem [shape: f32[1,16], index: 5, kind: input, shape index: {}]   ;;  %s707_s6 = inlined_call_operand.vmem [shape: f32[2,80,16], index: 6, kind: output, shape index: {}]  }
   0x1 LB: > { %s466_s22 = sadd.s32 4294967295, %s544_s21   ;;  %p470_p0 = scmp.ge.s32.totalorder %s544_s21, 1  ;;  %s544_s21 = sphi %s581_s21, %s16_s21  }
   0x2   : > { %p222_p1 = scmp.lt.s32.totalorder %s544_s21, 3 }
   0x4   : > { %p223_p2 = pnand %p470_p0, %p222_p1 }
   0x5   : > { %p257_p3 = scmp.lt.s32.totalorder (!%p223_p2), %s466_s22, 1 }
   0x6   : > { %226 = sbr.rel (%p223_p2) target bundleno = 43 (0x2b), region = 44 }
   0xb   : > { %s709_s22 = smov (!%p257_p3, %s466_s22), 1  ;;  %v605_v0 = vld [vmem:[%s705_s4] ss:$0 sm:$0xff]  ;;  %vm388_vm0 = vcmask 130048  }
   0xc   : > { %s524_s23 = smul.u32 40, %s709_s22  ;;  %v610_v1 = vld [vmem:[%s702_s1] ss:$0 sm:$0xff] }
   0xd   : > { %v618_v6 = vld [vmem:[%s706_s5] ss:$0 sm:$0xff]  ;;  %s525_s14 = smul.u32 80, %s709_s22 }
   0xe   : > { %s595_s26 = scalar_lea.vmem %s701_s0, %s524_s23  ;;  %s600_s29 = scalar_lea.vmem %s704_s3, %s524_s23  ;;  %v623_v8 = vld [vmem:[%s703_s2] ss:$0 sm:$0xff] }
   0xf   : > { %v477_v2 = vld [vmem:[%s600_s29] sm:$0xff]   ;;  %v516_v4 = vld [vmem:[%s600_s29 + $0x8] sm:$0xff]   ;;  %v517_v24 = vld [vmem:[%s600_s29 + $0x10] sm:$0xff]   ;;  %s648_s17 = scalar_lea.vmem %s707_s6, %s525_s14 }
  0x10   : > { %v497_v3 = vld [vmem:[%s595_s26] sm:$0xff]   ;;  %v478_v5 = vunpack.c.l.bf16 %v477_v2  ;;  %v479_v9 = vunpack.c.h.bf16 %v477_v2  ;;  %v520_v11 = vld [vmem:[%s595_s26 + $0x8] sm:$0xff]   ;;  %v482_v12 = vunpack.c.l.bf16 %v516_v4  ;;  %v483_v14 = vunpack.c.h.bf16 %v516_v4  ;;  %v521_v25 = vld [vmem:[%s595_s26 + $0x10] sm:$0xff]  }
  0x11   : > { %v498_v7 = vunpack.c.l.bf16 %v497_v3  ;;  %v499_v10 = vunpack.c.h.bf16 %v497_v3  ;;  %v502_v13 = vunpack.c.l.bf16 %v520_v11  ;;  %v503_v15 = vunpack.c.h.bf16 %v520_v11  ;;  %v518_v42 = vld [vmem:[%s600_s29 + $0x18] sm:$0xff]   ;;  %v519_v52 = vld [vmem:[%s600_s29 + $0x20] sm:$0xff]  }
  0x12   : > { %v296_v16 = vmul.f32 %v605_v0, %v478_v5  ;;  %v297_v18 = vmul.f32 %v605_v0, %v479_v9  ;;  %v298_v20 = vmul.f32 %v605_v0, %v482_v12  ;;  %v299_v22 = vmul.f32 %v605_v0, %v483_v14  ;;  %v522_v43 = vld [vmem:[%s595_s26 + $0x18] sm:$0xff]   ;;  %v523_v57 = vld [vmem:[%s595_s26 + $0x20] sm:$0xff]  }
  0x13   : > { %v344_v17 = vmul.f32 %v610_v1, %v498_v7  ;;  %v345_v19 = vmul.f32 %v610_v1, %v499_v10  ;;  %v346_v21 = vmul.f32 %v610_v1, %v502_v13  ;;  %v347_v23 = vmul.f32 %v610_v1, %v503_v15 }
  0x14   : > { %v310_v26 = vadd.f32 %v618_v6, %v296_v16  ;;  %v311_v28 = vadd.f32 %v618_v6, %v297_v18  ;;  %v312_v30 = vadd.f32 %v618_v6, %v298_v20  ;;  %v313_v32 = vadd.f32 %v618_v6, %v299_v22 }
  0x15   : > { %v358_v27 = vadd.f32 %v623_v8, %v344_v17  ;;  %v359_v29 = vadd.f32 %v623_v8, %v345_v19  ;;  %v360_v31 = vadd.f32 %v623_v8, %v346_v21  ;;  %v361_v33 = vadd.f32 %v623_v8, %v347_v23 }
  0x16   : > { %v486_v36 = vunpack.c.l.bf16 %v517_v24  ;;  %v506_v37 = vunpack.c.l.bf16 %v521_v25  ;;  %v487_v40 = vunpack.c.h.bf16 %v517_v24  ;;  %v507_v41 = vunpack.c.h.bf16 %v521_v25 }
  0x17   : > { %v368_v34 = vadd.f32 %v358_v27, %v310_v26  ;;  %v369_v35 = vadd.f32 %v359_v29, %v311_v28  ;;  %v370_v38 = vadd.f32 %v360_v31, %v312_v30  ;;  %v371_v39 = vadd.f32 %v361_v33, %v313_v32 }
  0x18   : > { %v300_v46 = vmul.f32 %v605_v0, %v486_v36  ;;  %v348_v47 = vmul.f32 %v610_v1, %v506_v37  ;;  %v301_v50 = vmul.f32 %v605_v0, %v487_v40  ;;  %v349_v51 = vmul.f32 %v610_v1, %v507_v41 }
  0x19   : > { %v378_v44 = vmax.f32 %v368_v34, 0.0  ;;  %v379_v45 = vmax.f32 %v369_v35, 0.0  ;;  %v380_v48 = vmax.f32 %v370_v38, 0.0  ;;  %v381_v49 = vmax.f32 %v371_v39, 0.0 }
  0x1a   : > { %v314_v53 = vadd.f32 %v618_v6, %v300_v46  ;;  %v362_v54 = vadd.f32 %v623_v8, %v348_v47  ;;  %v490_v55 = vunpack.c.l.bf16 %v518_v42  ;;  %v510_v56 = vunpack.c.l.bf16 %v522_v43 }
  0x1b   : > { %389 = vst.msk [vmem:[%s648_s17] sm:$0xff] %vm388_vm0, %v378_v44  ;;  %v315_v58 = vadd.f32 %v618_v6, %v301_v50  ;;  %v363_v59 = vadd.f32 %v623_v8, %v349_v51  ;;  %v491_v60 = vunpack.c.h.bf16 %v518_v42  ;;  %v511_v61 = vunpack.c.h.bf16 %v522_v43 }
  0x1c   : > { %390 = vst.msk [vmem:[%s648_s17 + $0x8] sm:$0xff] %vm388_vm0, %v379_v45  ;;  %v372_v62 = vadd.f32 %v362_v54, %v314_v53  ;;  %v302_v63 = vmul.f32 %v605_v0, %v490_v55  ;;  %v350_v2 = vmul.f32 %v610_v1, %v510_v56  ;;  %v494_v3 = vunpack.c.l.bf16 %v519_v52 }
  0x1d   : > { %391 = vst.msk [vmem:[%s648_s17 + $0x10] sm:$0xff] %vm388_vm0, %v380_v48  ;;  %v373_v4 = vadd.f32 %v363_v59, %v315_v58  ;;  %v303_v5 = vmul.f32 %v605_v0, %v491_v60  ;;  %v351_v7 = vmul.f32 %v610_v1, %v511_v61  ;;  %v514_v9 = vunpack.c.l.bf16 %v523_v57 }
  0x1e   : > { %392 = vst.msk [vmem:[%s648_s17 + $0x18] sm:$0xff] %vm388_vm0, %v381_v49  ;;  %v382_v10 = vmax.f32 %v372_v62, 0.0  ;;  %v316_v11 = vadd.f32 %v618_v6, %v302_v63  ;;  %v364_v12 = vadd.f32 %v623_v8, %v350_v2  ;;  %v304_v13 = vmul.f32 %v605_v0, %v494_v3 }
  0x1f   : > { %v383_v14 = vmax.f32 %v373_v4, 0.0  ;;  %v317_v15 = vadd.f32 %v618_v6, %v303_v5  ;;  %v365_v16 = vadd.f32 %v623_v8, %v351_v7  ;;  %v352_v17 = vmul.f32 %v610_v1, %v514_v9 }
  0x20   : > { %393 = vst.msk [vmem:[%s648_s17 + $0x20] sm:$0xff] %vm388_vm0, %v382_v10  ;;  %v374_v18 = vadd.f32 %v364_v12, %v316_v11  ;;  %v318_v19 = vadd.f32 %v618_v6, %v304_v13  ;;  %v495_v20 = vunpack.c.h.bf16 %v519_v52  ;;  %v515_v21 = vunpack.c.h.bf16 %v523_v57 }
  0x21   : > { %394 = vst.msk [vmem:[%s648_s17 + $0x28] sm:$0xff] %vm388_vm0, %v383_v14  ;;  %v375_v22 = vadd.f32 %v365_v16, %v317_v15  ;;  %v366_v23 = vadd.f32 %v623_v8, %v352_v17 }
  0x22   : > { %v384_v24 = vmax.f32 %v374_v18, 0.0  ;;  %v305_v25 = vmul.f32 %v605_v0, %v495_v20  ;;  %v353_v26 = vmul.f32 %v610_v1, %v515_v21 }
  0x23   : > { %v385_v27 = vmax.f32 %v375_v22, 0.0  ;;  %v376_v28 = vadd.f32 %v366_v23, %v318_v19 }
  0x24   : > { %395 = vst.msk [vmem:[%s648_s17 + $0x30] sm:$0xff] %vm388_vm0, %v384_v24  ;;  %v319_v29 = vadd.f32 %v618_v6, %v305_v25  ;;  %v367_v30 = vadd.f32 %v623_v8, %v353_v26 }
  0x25   : > { %396 = vst.msk [vmem:[%s648_s17 + $0x38] sm:$0xff] %vm388_vm0, %v385_v27  ;;  %v386_v31 = vmax.f32 %v376_v28, 0.0 }
  0x26   : > { %v377_v32 = vadd.f32 %v367_v30, %v319_v29 }
  0x27   : > { %397 = vst.msk [vmem:[%s648_s17 + $0x40] sm:$0xff] %vm388_vm0, %v386_v31 }
  0x28   : > { %v387_v33 = vmax.f32 %v377_v32, 0.0 }
  0x2a   : > { %398 = vst.msk [vmem:[%s648_s17 + $0x48] sm:$0xff] %vm388_vm0, %v387_v33 }
  0x2b PF: > { %s16_s21 = sadd.s32 1, %s544_s21  }
  0x2c   : > { %p13_p4 = scmp.ge.s32.totalorder %s16_s21, 4  }
  0x2e   :  { %15 = sbr.rel (!%p13_p4) target bundleno = 1 (0x1), region = 77 }

// kernel: skinny_block_forward.3
= control target key start
LH: loop header
LB: loop body
LE: loop exit
PB: predicated region body
PF: predicated region fallthrough
CT: control target
= control target key end

     0   :  { %s1805_s15 = smov 0   ;;  %s2100_s0 = inlined_call_operand.vmem [shape: bf16[2,384,16], index: 0, kind: input, shape index: {}]   ;;  %s2101_s1 = inlined_call_operand.vmem [shape: bf16[9,16,16], index: 1, kind: input, shape index: {}]   ;;  %s2102_s2 = inlined_call_operand.vmem [shape: f32[72,1], index: 2, kind: input, shape index: {}]   ;;  %s2103_s3 = inlined_call_operand.vmem [shape: bf16[2,72,16], index: 3, kind: output, shape index: {0}]   ;;  %s2104_s4 = inlined_call_operand.vmem [shape: f32[2,2,16], index: 4, kind: output, shape index: {1}]  }
   0x1 LB: > { %s1460_s16 = sadd.s32 4294967295, %s1777_s15   ;;  %p1464_p0 = scmp.ge.s32.totalorder %s1777_s15, 1  ;;  %s1777_s15 = sphi %s1805_s15, %s15_s15  }
   0x2   : > { %p165_p1 = scmp.lt.s32.totalorder %s1777_s15, 3 }
   0x4   : > { %p166_p2 = pnand %p1464_p0, %p165_p1 }
   0x5   : > { %p195_p3 = scmp.lt.s32.totalorder (!%p166_p2), %s1460_s16, 1 }
   0x6   : > { %169 = sbr.rel (%p166_p2) target bundleno = 352 (0x160), region = 32 }
   0xb   : > { %v1716_v0 = vld [vmem:[%s2101_s1 + $0x8] sm:$0xff]  ;;  %v1722_v1 = vld [vmem:[%s2101_s1 + $0x10] sm:$0xff]  ;;  %v1711_v2 = vld [vmem:[%s2101_s1] sm:$0xff]  ;;  %s2106_s16 = smov (!%p195_p3, %s1460_s16), 1  ;;  %vm262_vm0 = vcmask 130048   ;;  %vm1152_vm2 = vcmask 1046528  }
   0xc   : > { %v1727_v3 = vld [vmem:[%s2101_s1 + $0x18] sm:$0xff]  ;;  %v1732_v4 = vld [vmem:[%s2101_s1 + $0x20] sm:$0xff]  ;;  %1751 = vmatpush.bf16.msra.mxu1 %v1716_v0  ;;  %1752 = vmatpush.bf16.msra.mxu2 %v1716_v0  ;;  %s1754_s27 = smul.u32 192, %s2106_s16  ;;  %v1743_v11 = vld [vmem:[%s2101_s1 + $0x30] sm:$0xff]  ;;  %vm426_vm1 = vsmask.f32 7424 }
   0xd   : > { %1753 = vmatpush.bf16.msra.mxu3 %v1716_v0  ;;  %285 = vmatpush.bf16.msra.mxu0 %v1716_v0  ;;  %v1749_v12 = vld [vmem:[%s2101_s1 + $0x38] sm:$0xff]  ;;  %v1738_v13 = vld [vmem:[%s2101_s1 + $0x28] sm:$0xff]  ;;  %v1750_v14 = vld [vmem:[%s2101_s1 + $0x40] sm:$0xff]  ;;  %s1755_s7 = smul.u32 36, %s2106_s16  ;;  %vm1234_vm3 = vcmask 125952   ;;  %s1467_s11 = sshll.u32 %s2106_s16, 1 }
   0xe   : > { %s1834_s30 = scalar_lea.vmem %s2100_s0, %s1754_s27  ;;  %s208_s14 = scalar_lea.vmem %s2104_s4, %s1467_s11  ;;  %vm1330_vm4 = vcmask 122880  }
   0xf   : > { %v1713_v5 = vld [vmem:[%s1834_s30 + $0x38] sm:$0xff]  ;;  %v1714_v6 = vld [vmem:[%s1834_s30 + $0x40] sm:$0xff]  ;;  %v229_v7 = vld [vmem:[%s1834_s30 + $0x50] sm:$0xf]  ;;  %s2047_s10 = scalar_lea.vmem %s2103_s3, %s1755_s7 }
  0x10   : > { %494 = vmatpush.bf16.msrb.mxu2 %v1722_v1  ;;  %362 = vmatpush.bf16.msrb.mxu1 %v1711_v2  ;;  %v250_v8 = vunpack.c.l.b16 %v229_v7  ;;  %v1712_v9 = vld [vmem:[%s1834_s30 + $0x30] sm:$0xff]  ;;  %v1715_v15 = vld [vmem:[%s1834_s30 + $0x48] sm:$0xff]  ;;  %v1707_v16 = vld [vmem:[%s1834_s30] sm:$0xff] }
  0x11   : > { %592 = vmatpush.bf16.msrb.mxu3 %v1727_v3  ;;  %690 = vmatpush.bf16.msrb.mxu0 %v1732_v4  ;;  %v1717_v17 = vld [vmem:[%s1834_s30] sm:$0xff]  ;;  %v1728_v18 = vld [vmem:[%s1834_s30 + $0x90] sm:$0xff]  ;;  %v1718_v20 = vld [vmem:[%s1834_s30 + $0x8] sm:$0xff] }
  0x12   : > { %1491 = vmatmul.msk.bf16.vlgmr.msra.gmra.mxu1 %vm262_vm0, %v1713_v5  ;;  %1492 = vmatmul.msk.bf16.vlgmr.msra.gmra.mxu2 %vm262_vm0, %v1714_v6  ;;  %v255_v10 = vpack.c.b16 %v250_v8, %v250_v8  ;;  %v1723_v19 = vld [vmem:[%s1834_s30 + $0x60] sm:$0xff]  ;;  %v430_v21 = vshll.u32 %v1717_v17, 16  ;;  %v428_v22 = vshrl.u32 %v1717_v17, 16  ;;  %v435_v24 = vshll.u32 %v1718_v20, 16  ;;  %v1708_v27 = vld [vmem:[%s1834_s30 + $0x8] sm:$0xff]  ;;  %v1729_v29 = vld [vmem:[%s1834_s30 + $0x98] sm:$0xff] }
  0x13   : > { %1490 = vmatmul.msk.bf16.vlgmr.msra.gmra.mxu0 %vm262_vm0, %v1712_v9  ;;  %v1724_v30 = vld [vmem:[%s1834_s30 + $0x68] sm:$0xff]  ;;  %v1719_v31 = vld [vmem:[%s1834_s30 + $0x10] sm:$0xff]  ;;  %v439_v32 = vshrl.u32 %v1718_v20, 16  ;;  %v1730_v38 = vld [vmem:[%s1834_s30 + $0xa0] sm:$0xff] }
  0x14   : > { %1494 = vmatmul.msk.bf16.vlgmr.msra.gmra.mxu3 %vm262_vm0, %v255_v10  ;;  %970 = vmatpush.bf16.msra.mxu2 %v1743_v11  ;;  %v432_v23 = vrot.slane %v430_v21, 1  ;;  %v437_v26 = vrot.slane %v435_v24, 1  ;;  %v443_v33 = vshll.u32 %v1719_v31, 16  ;;  %v1709_v36 = vld [vmem:[%s1834_s30 + $0x10] sm:$0xff]  ;;  %v1720_v40 = vld [vmem:[%s1834_s30 + $0x18] sm:$0xff]  ;;  %v447_v41 = vshrl.u32 %v1719_v31, 16 }
  0x15   : > { %1110 = vmatpush.bf16.msra.mxu3 %v1749_v12  ;;  %830 = vmatpush.bf16.msra.mxu1 %v1738_v13  ;;  %v1725_v39 = vld [vmem:[%s1834_s30 + $0x70] sm:$0xff]  ;;  %v451_v42 = vshll.u32 %v1720_v40, 16  ;;  %v1710_v45 = vld [vmem:[%s1834_s30 + $0x18] sm:$0xff]  ;;  %v1731_v47 = vld [vmem:[%s1834_s30 + $0xa8] sm:$0xff]  ;;  %v455_v53 = vshrl.u32 %v1720_v40, 16 }
  0x16   : > { %1190 = vmatpush.bf16.msra.mxu0 %v1750_v14  ;;  %v433_v25 = vor.u32 %v432_v23, %v428_v22  ;;  %v441_v34 = vor.u32 %v439_v32, %v437_v26  ;;  %v445_v35 = vrot.slane %v443_v33, 1  ;;  %v1540_v48 = vld [vmem:[%s1834_s30 + $0x20] sm:$0xf]  ;;  %v1721_v49 = vld [vmem:[%s1834_s30 + $0x20] sm:$0x10]  ;;  %v1726_v50 = vld [vmem:[%s1834_s30 + $0x78] sm:$0xff] }
  0x17   : > { %v453_v44 = vrot.slane %v451_v42, 1  ;;  %v1541_v51 = vor.u32 %v1721_v49, %v1540_v48  ;;  %v218_v52 = vld [vmem:[%s1834_s30 + $0x20] sm:$0xf]  ;;  %v635_v55 = vld [vmem:[%s1834_s30 + $0xb0] sm:$0xf]  ;;  %v1744_v4 = vld [vmem:[%s1834_s30 + $0x34] sm:$0xff] }
  0x18   : > { %v438_v28 = vsel %vm426_vm1, %v433_v25, %v437_v26  ;;  %v446_v37 = vsel %vm426_vm1, %v441_v34, %v445_v35  ;;  %v449_v43 = vor.u32 %v447_v41, %v445_v35  ;;  %v328_v56 = vunpack.c.l.b16 %v218_v52  ;;  %v537_v57 = vld [vmem:[%s1834_s30 + $0x80] sm:$0xf]  ;;  %v1773_v3 = vld [vmem:[%s1834_s30 + $0x4] sm:$0xe]  ;;  %v1734_v5 = vld [vmem:[%s1834_s30 + $0x68] sm:$0xff] }
  0x19   : > { %v459_v54 = vshll.u32 %v1541_v51, 16  ;;  %v457_v58 = vor.u32 %v455_v53, %v453_v44  ;;  %v656_v60 = vunpack.c.l.b16 %v635_v55  ;;  %v558_v61 = vunpack.c.l.b16 %v537_v57  ;;  %v1733_v0 = vld [vmem:[%s1834_s30 + $0x60] sm:$0xff]  ;;  %v1772_v8 = vld [vmem:[%s1834_s30 + $0x4] sm:$0xf0]  ;;  %v1927_v42 = vld [vmem:[%s1834_s30 + $0x14] sm:$0xff] }
  0x1a   : > { %v454_v46 = vsel %vm426_vm1, %v449_v43, %v453_v44  ;;  %v333_v62 = vpack.c.b16 %v328_v56, %v328_v56  ;;  %v766_v6 = vshll.u32 %v1733_v0, 16  ;;  %v865_v7 = vld [vmem:[%s1834_s30 + $0x4] sm:$0xff]   ;;  %v1745_v9 = vld [vmem:[%s1834_s30 + $0x3c] sm:$0xff]  ;;  %v1046_v10 = vshll.u32 %v1744_v4, 16  ;;  %v1747_v56 = vld [vmem:[%s1834_s30 + $0x4c] sm:$0xff] }
  0x1b   : > { %v461_v59 = vrot.slane %v459_v54, 1  ;;  %v661_v1 = vpack.c.b16 %v656_v60, %v656_v60  ;;  %v563_v2 = vpack.c.b16 %v558_v61, %v558_v61  ;;  %v764_v11 = vshrl.u32 %v1733_v0, 16  ;;  %v1746_v34 = vld [vmem:[%s1834_s30 + $0x44] sm:$0xff]  ;;  %v1736_v55 = vld [vmem:[%s1834_s30 + $0x78] sm:$0xff]  ;;  %v1246_v61 = vld [vmem:[%s2102_s2 + $0x10] sm:$0xff] }
  0x1c   : > { %v768_v12 = vrot.slane %v766_v6, 1  ;;  %v771_v13 = vshll.u32 %v1734_v5, 16  ;;  %v1774_v14 = vor.u32 %v1773_v3, %v1772_v8  ;;  %v1048_v17 = vrot.slane %v1046_v10, 1  ;;  %v1245_v52 = vld [vmem:[%s2102_s2 + $0x8] sm:$0xff]  ;;  %v1949_v0 = vld [vmem:[%s1834_s30 + $0x1c] sm:$0xff] }
  0x1d   : > { %v462_v63 = vsel %vm426_vm1, %v457_v58, %v461_v59  ;;  %v906_v31 = vshll.u32 %v865_v7, 16  ;;  %v775_v32 = vshrl.u32 %v1734_v5, 16  ;;  %v904_v35 = vshrl.u32 %v865_v7, 16 }
  0x1e   : > { %v769_v20 = vor.u32 %v768_v12, %v764_v11  ;;  %v773_v21 = vrot.slane %v771_v13, 1  ;;  %v1153_v22 = vrot.slane %v1774_v14, 1  ;;  %v1055_v40 = vshrl.u32 %v1745_v9, 16  ;;  %v1625_v11 = vld [vmem:[%s1834_s30 + $0x80] sm:$0xf] }
  0x1f   : > { %v1059_v41 = vshll.u32 %v1746_v34, 16  ;;  %v787_v58 = vshll.u32 %v1736_v55, 16  ;;  %v919_v60 = vshll.u32 %v1927_v42, 16  ;;  %v1158_v5 = vrot.slane %v1949_v0, 1  ;;  %v1737_v12 = vld [vmem:[%s1834_s30 + $0x80] sm:$0x10] }
  0x20   : > { %v777_v43 = vor.u32 %v775_v32, %v773_v21 }
  0x21   : > { %v1061_v49 = vrot.slane %v1059_v41, 1 }
  0x22   : > { %1493 = vmatmul.msk.bf16.gmra.mxu2 %vm262_vm0, %v1715_v15  ;;  %1515 = vmatmul.msk.bf16.vlgmr.msrb.gmra.mxu1 %vm262_vm0, %v1707_v16  ;;  %v463_v15 = vshrl.u32 %v1541_v51, 16  ;;  %v1044_v16 = vshrl.u32 %v1744_v4, 16  ;;  %v921_v4 = vrot.slane %v919_v60, 1 }
  0x23   : > { %1600 = vmatmul.msk.bf16.vlgmr.msrb.gmra.mxu0 %vm262_vm0, %v1728_v18  ;;  %v1051_v18 = vshll.u32 %v1745_v9, 16 }
  0x24   : > { %1573 = vmatmul.msk.bf16.vlgmr.msrb.gmra.mxu3 %vm262_vm0, %v1723_v19  ;;  %v1910_v19 = vld [vmem:[%s1834_s30 + $0xc] sm:$0xff]  ;;  %v465_v24 = vor.u32 %v463_v15, %v461_v59  ;;  %v1049_v25 = vor.u32 %v1048_v17, %v1044_v16  ;;  %v1247_v15 = vld [vmem:[%s2102_s2 + $0x18] sm:$0xff]  ;;  %v1626_v17 = vor.u32 %v1737_v12, %v1625_v11 }
  0x25   : > { %v1154_v23 = vrot.slane %v1910_v19, 1  ;;  %v1053_v26 = vrot.slane %v1051_v18, 1  ;;  %v915_v59 = vshrl.u32 %v1910_v19, 16  ;;  %v1683_v18 = vld [vmem:[%s1834_s30 + $0x54] sm:$0xf] }
  0x27   : > { %v1057_v48 = vor.u32 %v1055_v40, %v1053_v26 }
  0x29   : > { %v1062_v54 = vsel %vm426_vm1, %v1057_v48, %v1061_v49 }
  0x32   : > { %1516 = vmatmul.msk.bf16.gmra.mxu1 %vm262_vm0, %v1708_v27  ;;  %1546 = vmatmul.msk.bf16.vlgmr.msrb.gmra.mxu2 %vm262_vm0, %v438_v28  ;;  %v774_v27 = vsel %vm426_vm1, %v769_v20, %v773_v21  ;;  %v1155_v28 = vsel %vm1152_vm2, %v1153_v22, %v1154_v23  ;;  %v791_v21 = vshrl.u32 %v1736_v55, 16  ;;  %v795_v22 = vshll.u32 %v1626_v17, 16 }
  0x33   : > { %1601 = vmatmul.msk.bf16.gmra.mxu0 %vm262_vm0, %v1729_v29  ;;  %v1054_v29 = vsel %vm426_vm1, %v1049_v25, %v1053_v26  ;;  %v923_v25 = vshrl.u32 %v1927_v42, 16  ;;  %v927_v26 = vshll.u32 %v1949_v0, 16 }
  0x34   : > { %1574 = vmatmul.msk.bf16.gmra.mxu3 %vm262_vm0, %v1724_v30  ;;  %v1735_v30 = vld [vmem:[%s1834_s30 + $0x70] sm:$0xff] }
  0x35   : > { %v779_v33 = vshll.u32 %v1735_v30, 16  ;;  %v783_v57 = vshrl.u32 %v1735_v30, 16 }
  0x37   : > { %v781_v44 = vrot.slane %v779_v33, 1 }
  0x42   : > { %1517 = vmatmul.msk.bf16.gmra.mxu1 %vm262_vm0, %v1709_v36  ;;  %1547 = vmatmul.msk.bf16.gmra.mxu2 %vm262_vm0, %v446_v37  ;;  %v908_v36 = vrot.slane %v906_v31, 1  ;;  %v911_v37 = vshll.u32 %v1910_v19, 16  ;;  %v1748_v19 = vld [vmem:[%s1834_s30 + $0x54] sm:$0x10]  ;;  %v1071_v31 = vshrl.u32 %v1747_v56, 16 }
  0x43   : > { %1602 = vmatmul.msk.bf16.gmra.mxu0 %vm262_vm0, %v1730_v38  ;;  %v1244_v38 = vld [vmem:[%s2102_s2] sm:$0xff] }
  0x44   : > { %1575 = vmatmul.msk.bf16.gmra.mxu3 %vm262_vm0, %v1725_v39  ;;  %v1779_v39 = vmov 0  }
  0x45   : > { %1765 = vset.pattern.permute.xlu0 %v1779_v39  ;;  %1766 = vset.pattern.permute.xlu1 %v1779_v39 }
  0x46   : > { %1255 = vperm.xlu0 %1765, %v1244_v38   ;;  %1767 = vset.pattern.permute.xlu2 %v1779_v39 }
  0x47   : > { %1265 = vperm.xlu1 %1766, %v1246_v61  }
  0x4e   : > { %1260 = vperm.xlu0 %1765, %v1245_v52  }
  0x4f   : > { %1270 = vperm.xlu1 %1766, %v1247_v15   ;;  %v1249_v15 = vld [vmem:[%s2102_s2 + $0x28] sm:$0xff] }
  0x52   : > { %1518 = vmatmul.msk.bf16.gmra.mxu1 %vm262_vm0, %v1710_v45  ;;  %1548 = vmatmul.msk.bf16.gmra.mxu2 %vm262_vm0, %v454_v46  ;;  %v909_v45 = vor.u32 %v908_v36, %v904_v35  ;;  %v913_v46 = vrot.slane %v911_v37, 1  ;;  %v797_v35 = vrot.slane %v795_v22, 1  ;;  %v925_v36 = vor.u32 %v923_v25, %v921_v4 }
  0x53   : > { %1603 = vmatmul.msk.bf16.gmra.mxu0 %vm262_vm0, %v1731_v47  ;;  %v1156_v47 = vrot.slane %v1927_v42, 1  ;;  %v929_v37 = vrot.slane %v927_v26, 1 }
  0x54   : > { %1576 = vmatmul.msk.bf16.gmra.mxu3 %vm262_vm0, %v1726_v50  ;;  %v782_v50 = vsel %vm426_vm1, %v777_v43, %v781_v44  ;;  %v914_v51 = vsel %vm426_vm1, %v909_v45, %v913_v46  ;;  %v917_v3 = vor.u32 %v915_v59, %v913_v46  ;;  %v799_v59 = vshrl.u32 %v1626_v17, 16 }
  0x55   : > { %v1157_v53 = vsel %vm1152_vm2, %v1154_v23, %v1156_v47  ;;  %v1159_v14 = vsel %vm1152_vm2, %v1156_v47, %v1158_v5  ;;  %v1684_v23 = vor.u32 %v1748_v19, %v1683_v18 }
  0x56   : > { %v922_v10 = vsel %vm426_vm1, %v917_v3, %v921_v4 }
  0x57   : > { %v1075_v32 = vshll.u32 %v1684_v23, 16 }
  0x59   : > { %v1077_v41 = vrot.slane %v1075_v32, 1 }
  0x62   : > { %1519 = vmatmul.msk.bf16.gmra.mxu1 %vm262_vm0, %v333_v62  ;;  %1549 = vmatmul.msk.bf16.gmra.mxu2 %vm262_vm0, %v462_v63  ;;  %v1063_v62 = vshrl.u32 %v1746_v34, 16  ;;  %v1067_v63 = vshll.u32 %v1747_v56, 16 }
  0x63   : > { %1604 = vmatmul.msk.bf16.gmra.mxu0 %vm262_vm0, %v661_v1  ;;  %v785_v1 = vor.u32 %v783_v57, %v781_v44  ;;  %v930_v44 = vsel %vm426_vm1, %v925_v36, %v929_v37 }
  0x64   : > { %1577 = vmatmul.msk.bf16.gmra.mxu3 %vm262_vm0, %v563_v2  ;;  %v789_v2 = vrot.slane %v787_v58, 1  ;;  %v1065_v6 = vor.u32 %v1063_v62, %v1061_v49  ;;  %v1069_v7 = vrot.slane %v1067_v63, 1  ;;  %v1251_v58 = vld [vmem:[%s2102_s2 + $0x38] sm:$0xff]  ;;  %v1079_v63 = vshrl.u32 %v1684_v23, 16 }
  0x65   : > { %1290 = vperm.xlu1 %1766, %v1251_v58  }
  0x66   : > { %v790_v9 = vsel %vm426_vm1, %v785_v1, %v789_v2  ;;  %v1070_v16 = vsel %vm426_vm1, %v1065_v6, %v1069_v7  ;;  %v793_v34 = vor.u32 %v791_v21, %v789_v2  ;;  %v1073_v40 = vor.u32 %v1071_v31, %v1069_v7  ;;  %v1248_v6 = vld [vmem:[%s2102_s2 + $0x20] sm:$0xff] }
  0x67   : > { %v801_v1 = vor.u32 %v799_v59, %v797_v35  ;;  %v1081_v7 = vor.u32 %v1079_v63, %v1077_v41  ;;  %1275 = vperm.xlu2 %1767, %v1248_v6  }
  0x68   : > { %v798_v43 = vsel %vm426_vm1, %v793_v34, %v797_v35  ;;  %v1078_v49 = vsel %vm426_vm1, %v1073_v40, %v1077_v41 }
  0x6f   : > { %1280 = vperm.xlu2 %1767, %v1249_v15  }
  0x72   : > { %1550 = vmatmul.msk.bf16.gmra.mxu2 %vm262_vm0, %v465_v24  ;;  %1631 = vmatmul.msk.bf16.vlgmr.msra.gmra.mxu1 %vm262_vm0, %v774_v27  ;;  %v1652_v27 = vld [vmem:[%s1834_s30 + $0x24] sm:$0xf] }
  0x73   : > { %1700 = vmatmul.msk.bf16.vlgmr.msra.gmra.mxu0 %vm262_vm0, %v1155_v28  ;;  %v1742_v28 = vld [vmem:[%s1834_s30 + $0x24] sm:$0x10] }
  0x74   : > { %1689 = vmatmul.msk.bf16.vlgmr.msra.gmra.mxu3 %vm262_vm0, %v1054_v29  ;;  %v1979_v33 = vor.u32 %v1742_v28, %v1652_v27  ;;  %v1252_v27 = vld [vmem:[%s2102_s2 + $0x40] sm:$0xff] }
  0x76   : > { %v1160_v38 = vrot.slane %v1979_v33, 1 }
  0x77   : > { %1295 = vperm.xlu2 %1767, %v1252_v27  }
  0x78   : > { %v1161_v48 = vsel %vm1152_vm2, %v1158_v5, %v1160_v38 }
  0x82   : > { %1632 = vmatmul.msk.bf16.gmra.mxu1 %vm262_vm0, %v782_v50  ;;  %1658 = vmatmul.msk.bf16.vlgmr.msra.gmra.mxu2 %vm262_vm0, %v914_v51  ;;  %v1250_v50 = vld [vmem:[%s2102_s2 + $0x30] sm:$0xff] }
  0x83   : > { %1701 = vmatmul.msk.bf16.gmra.mxu0 %vm262_vm0, %v1157_v53  ;;  %1285 = vperm.xlu0 %1765, %v1250_v50   ;;  %v931_v53 = vshrl.u32 %v1949_v0, 16 }
  0x84   : > { %1690 = vmatmul.msk.bf16.gmra.mxu3 %vm262_vm0, %v1062_v54  ;;  %v935_v54 = vshll.u32 %v1979_v33, 16 }
  0x85   : > { %v933_v60 = vor.u32 %v931_v53, %v929_v37 }
  0x86   : > { %v937_v61 = vrot.slane %v935_v54, 1 }
  0x88   : > { %v938_v3 = vsel %vm426_vm1, %v933_v60, %v937_v61 }
  0x8f   : > { %v1952_v8 = vpop.f32.mrf.mxu1 }
  0x90   : > { %v287_v13 = vpop.f32.mrf.mxu0 }
  0x92   : > { %1633 = vmatmul.msk.bf16.gmra.mxu1 %vm262_vm0, %v790_v9  ;;  %1659 = vmatmul.msk.bf16.gmra.mxu2 %vm262_vm0, %v922_v10 }
  0x93   : > { %1702 = vmatmul.msk.bf16.gmra.mxu0 %vm262_vm0, %v1159_v14 }
  0x94   : > { %1691 = vmatmul.msk.bf16.gmra.mxu3 %vm262_vm0, %v1070_v16  ;;  %v939_v16 = vshrl.u32 %v1979_v33, 16 }
  0x95   : > { %v1968_v20 = vpop.f32.mrf.mxu2 }
  0x96   : > { %v941_v21 = vor.u32 %v939_v16, %v937_v61 }
  0x97   : > { %v1971_v24 = vpop.f32.mrf.mxu1  ;;  %v1977_v29 = vpop.f32.mrf.mxu3 }
  0x98   : > { %v289_v30 = vpop.f32.mrf.mxu0 }
  0x9d   : > { %v1982_v39 = vpop.f32.mrf.mxu2 }
  0x9f   : > { %v364_v42 = vpop.f32.mrf.mxu1  ;;  %v309_v46 = vpop.f32.mrf.mxu3 }
  0xa0   : > { %v365_v45 = vadd.f32 %v364_v42, %v287_v13  ;;  %v692_v47 = vpop.f32.mrf.mxu0 }
  0xa2   : > { %1634 = vmatmul.msk.bf16.gmra.mxu1 %vm262_vm0, %v798_v43  ;;  %1660 = vmatmul.msk.bf16.gmra.mxu2 %vm262_vm0, %v930_v44 }
  0xa3   : > { %1703 = vmatmul.msk.bf16.gmra.mxu0 %vm262_vm0, %v1161_v48 }
  0xa4   : > { %1692 = vmatmul.msk.bf16.gmra.mxu3 %vm262_vm0, %v1078_v49 }
  0xa5   : > { %v1994_v51 = vpop.f32.mrf.mxu2 }
  0xa7   : > { %v366_v52 = vpop.f32.mrf.mxu1  ;;  %v594_v56 = vpop.f32.mrf.mxu3 }
  0xa8   : > { %v367_v55 = vadd.f32 %v366_v52, %v289_v30  ;;  %v694_v57 = vpop.f32.mrf.mxu0 }
  0xad   : > { %v304_v62 = vpop.f32.mrf.mxu2 }
  0xaf   : > { %v369_v2 = vpop.f32.mrf.mxu1  ;;  %v596_v4 = vpop.f32.mrf.mxu3 }
  0xb0   : > { %v370_v0 = vadd.f32 %v369_v2, %v1952_v8  ;;  %v697_v5 = vpop.f32.mrf.mxu0 }
  0xb2   : > { %1635 = vmatmul.msk.bf16.gmra.mxu1 %vm262_vm0, %v801_v1  ;;  %1661 = vmatmul.msk.bf16.gmra.mxu2 %vm262_vm0, %v938_v3 }
  0xb3   : > { %1704 = vmatmul.msk.bf16.gmra.mxu0 %vm262_vm0, %v1160_v38 }
  0xb4   : > { %1693 = vmatmul.msk.bf16.gmra.mxu3 %vm262_vm0, %v1081_v7 }
  0xb5   : > { %v496_v9 = vpop.f32.mrf.mxu2 }
  0xb6   : > { %v520_v10 = vadd.f32 %v496_v9, %v365_v45 }
  0xb7   : > { %v371_v11 = vpop.f32.mrf.mxu1  ;;  %v599_v13 = vpop.f32.mrf.mxu3 }
  0xb8   : > { %v618_v8 = vadd.f32 %v594_v56, %v520_v10  ;;  %v372_v12 = vadd.f32 %v371_v11, %v1971_v24  ;;  %v699_v14 = vpop.f32.mrf.mxu0  ;;  %v1256_v27 = vpop.permute.xlu0 %1255 }
  0xba   : > { %v2016_v17 = vadd.f32 %v692_v47, %v618_v8 }
  0xbd   : > { %v498_v18 = vpop.f32.mrf.mxu2 }
  0xbe   : > { %v521_v19 = vadd.f32 %v498_v18, %v367_v55 }
  0xbf   : > { %v374_v22 = vpop.f32.mrf.mxu1  ;;  %v601_v26 = vpop.f32.mrf.mxu3 }
  0xc0   : > { %v619_v23 = vadd.f32 %v596_v4, %v521_v19  ;;  %v375_v25 = vadd.f32 %v374_v22, %v1968_v20  ;;  %v702_v24 = vpop.f32.mrf.mxu0 }
  0xc2   : > { %1662 = vmatmul.msk.bf16.gmra.mxu2 %vm262_vm0, %v941_v21  ;;  %v2023_v28 = vadd.f32 %v694_v57, %v619_v23 }
  0xc5   : > { %v501_v30 = vpop.f32.mrf.mxu2 }
  0xc6   : > { %v522_v31 = vadd.f32 %v501_v30, %v370_v0 }
  0xc7   : > { %v376_v32 = vpop.f32.mrf.mxu1  ;;  %v604_v35 = vpop.f32.mrf.mxu3 }
  0xc8   : > { %v620_v33 = vadd.f32 %v599_v13, %v522_v31  ;;  %v377_v34 = vadd.f32 %v376_v32, %v1982_v39  ;;  %v704_v36 = vpop.f32.mrf.mxu0 }
  0xca   : > { %v2026_v20 = vadd.f32 %v697_v5, %v620_v33 }
  0xcd   : > { %v503_v37 = vpop.f32.mrf.mxu2 }
  0xce   : > { %v523_v38 = vadd.f32 %v503_v37, %v372_v12 }
  0xcf   : > { %v379_v40 = vpop.f32.mrf.mxu1  ;;  %v606_v43 = vpop.f32.mrf.mxu3 }
  0xd0   : > { %v621_v41 = vadd.f32 %v601_v26, %v523_v38  ;;  %v380_v42 = vadd.f32 %v379_v40, %v1994_v51  ;;  %v707_v44 = vpop.f32.mrf.mxu0 }
  0xd2   : > { %v2029_v45 = vadd.f32 %v699_v14, %v621_v41 }
  0xd5   : > { %v506_v46 = vpop.f32.mrf.mxu2 }
  0xd6   : > { %v524_v47 = vadd.f32 %v506_v46, %v375_v25 }
  0xd7   : > { %v381_v48 = vpop.f32.mrf.mxu1  ;;  %v609_v39 = vpop.f32.mrf.mxu3 }
  0xd8   : > { %v622_v49 = vadd.f32 %v604_v35, %v524_v47  ;;  %v382_v50 = vadd.f32 %v381_v48, %v304_v62  ;;  %v709_v52 = vpop.f32.mrf.mxu0 }
  0xda   : > { %v2031_v53 = vadd.f32 %v702_v24, %v622_v49 }
  0xdd   : > { %v508_v54 = vpop.f32.mrf.mxu2 }
  0xde   : > { %v525_v55 = vadd.f32 %v508_v54, %v377_v34 }
  0xdf   : > { %v384_v56 = vpop.f32.mrf.mxu1  ;;  %v611_v51 = vpop.f32.mrf.mxu3 }
  0xe0   : > { %v623_v57 = vadd.f32 %v606_v43, %v525_v55  ;;  %v385_v58 = vadd.f32 %v384_v56, %v1977_v29  ;;  %v712_v59 = vpop.f32.mrf.mxu0  ;;  %v1261_v43 = vpop.permute.xlu0 %1260 }
  0xe2   : > { %v2034_v60 = vadd.f32 %v704_v36, %v623_v57 }
  0xe5   : > { %v511_v61 = vpop.f32.mrf.mxu2 }
  0xe6   : > { %v526_v63 = vadd.f32 %v511_v61, %v380_v42 }
  0xe7   : > { %v386_v1 = vpop.f32.mrf.mxu1  ;;  %v614_v3 = vpop.f32.mrf.mxu3 }
  0xe8   : > { %v624_v2 = vadd.f32 %v609_v39, %v526_v63  ;;  %v714_v62 = vpop.f32.mrf.mxu0 }
  0xea   : > { %v2036_v0 = vadd.f32 %v707_v44, %v624_v2 }
  0xed   : > { %v513_v4 = vpop.f32.mrf.mxu2 }
  0xee   : > { %v527_v5 = vadd.f32 %v513_v4, %v382_v50 }
  0xef   : > { %v832_v6 = vpop.f32.mrf.mxu1  ;;  %v616_v9 = vpop.f32.mrf.mxu3 }
  0xf0   : > { %v625_v7 = vadd.f32 %v611_v51, %v527_v5  ;;  %v1192_v10 = vpop.f32.mrf.mxu0  ;;  %v856_v23 = vadd.f32 %v832_v6, %v2016_v17  ;;  %v1266_v51 = vpop.permute.xlu1 %1265 }
  0xf2   : > { %v2038_v29 = vadd.f32 %v709_v52, %v625_v7 }
  0xf5   : > { %v516_v11 = vpop.f32.mrf.mxu2 }
  0xf6   : > { %v528_v8 = vadd.f32 %v516_v11, %v385_v58 }
  0xf7   : > { %v834_v12 = vpop.f32.mrf.mxu1  ;;  %v1112_v14 = vpop.f32.mrf.mxu3 }
  0xf8   : > { %v626_v13 = vadd.f32 %v614_v3, %v528_v8  ;;  %v1194_v15 = vpop.f32.mrf.mxu0  ;;  %v857_v34 = vadd.f32 %v834_v12, %v2023_v28 }
  0xfa   : > { %v2040_v16 = vadd.f32 %v712_v59, %v626_v13 }
  0xfd   : > { %v518_v18 = vpop.f32.mrf.mxu2 }
  0xff   : > { %v837_v19 = vpop.f32.mrf.mxu1  ;;  %v1114_v21 = vpop.f32.mrf.mxu3 }
 0x100   : > { %v1197_v22 = vpop.f32.mrf.mxu0  ;;  %v858_v47 = vadd.f32 %v837_v19, %v2026_v20 }
 0x105   : > { %v972_v25 = vpop.f32.mrf.mxu2 }
 0x106   : > { %v996_v26 = vadd.f32 %v972_v25, %v856_v23 }
 0x107   : > { %v839_v24 = vpop.f32.mrf.mxu1  ;;  %v1117_v31 = vpop.f32.mrf.mxu3 }
 0x108   : > { %v1136_v30 = vadd.f32 %v1112_v14, %v996_v26  ;;  %v1199_v32 = vpop.f32.mrf.mxu0  ;;  %v859_v62 = vadd.f32 %v839_v24, %v2029_v45  ;;  %v1271_v45 = vpop.permute.xlu1 %1270 }
 0x10a   : > { %v1216_v33 = vadd.f32 %v1192_v10, %v1136_v30 }
 0x10c   : > { %v1225_v35 = vpack.c.bf16 %v1216_v33, %v1216_v33  ;;  %v1332_v38 = vmul.f32 %v1216_v33, %v1216_v33  ;;  %v1298_v44 = vmul.f32 %v1256_v27, %v1216_v33 }
 0x10d   : > { %v974_v17 = vpop.f32.mrf.mxu2 }
 0x10e   : > { %1235 = vst.msk [vmem:[%s2047_s10] sm:$0xf] %vm1234_vm3, %v1225_v35  ;;  %v997_v36 = vadd.f32 %v974_v17, %v857_v34  ;;  %v1341_v48 = vmul.f32 %v1332_v38, %v1256_v27  ;;  %v1307_v52 = vsel %vm262_vm0, %v1298_v44, 0.0  ;;  %v1276_v35 = vpop.permute.xlu2 %1275 }
 0x10f   : > { %v842_v37 = vpop.f32.mrf.mxu1  ;;  %v1119_v41 = vpop.f32.mrf.mxu3 }
 0x110   : > { %v1137_v40 = vadd.f32 %v1114_v21, %v997_v36  ;;  %v1202_v42 = vpop.f32.mrf.mxu0  ;;  %v1350_v59 = vsel %vm262_vm0, %v1341_v48, 0.0 }
 0x112   : > { %v1217_v46 = vadd.f32 %v1194_v15, %v1137_v40 }
 0x114   : > { %v1226_v49 = vpack.c.bf16 %v1217_v46, %v1217_v46  ;;  %v1299_v50 = vmul.f32 %v1261_v43, %v1217_v46  ;;  %v1333_v28 = vmul.f32 %v1217_v46, %v1217_v46 }
 0x115   : > { %v977_v39 = vpop.f32.mrf.mxu2 }
 0x116   : > { %1236 = vst.msk [vmem:[%s2047_s10 + $0x4] sm:$0xf] %vm1234_vm3, %v1226_v49  ;;  %v1308_v54 = vsel %vm262_vm0, %v1299_v50, 0.0  ;;  %v1342_v55 = vmul.f32 %v1333_v28, %v1261_v43  ;;  %v998_v56 = vadd.f32 %v977_v39, %v858_v47 }
 0x117   : > { %v1309_v57 = vadd.f32 %v1308_v54, %v1307_v52  ;;  %v844_v58 = vpop.f32.mrf.mxu1  ;;  %v1122_v63 = vpop.f32.mrf.mxu3 }
 0x118   : > { %v1351_v20 = vsel %vm262_vm0, %v1342_v55, 0.0  ;;  %v1138_v61 = vadd.f32 %v1117_v31, %v998_v56  ;;  %v1204_v1 = vpop.f32.mrf.mxu0  ;;  %v861_v40 = vadd.f32 %v844_v58, %v2034_v60  ;;  %v1281_v60 = vpop.permute.xlu2 %1280 }
 0x119   : > { %v1352_v2 = vadd.f32 %v1351_v20, %v1350_v59 }
 0x11a   : > { %v1218_v3 = vadd.f32 %v1197_v22, %v1138_v61  ;;  %v860_v22 = vadd.f32 %v842_v37, %v2031_v53 }
 0x11c   : > { %v1227_v4 = vpack.c.bf16 %v1218_v3, %v1218_v3  ;;  %v1300_v5 = vmul.f32 %v1266_v51, %v1218_v3  ;;  %v1334_v6 = vmul.f32 %v1218_v3, %v1218_v3 }
 0x11d   : > { %v979_v7 = vpop.f32.mrf.mxu2 }
 0x11e   : > { %1237 = vst.msk [vmem:[%s2047_s10 + $0x8] sm:$0xf] %vm1234_vm3, %v1227_v4  ;;  %v1310_v9 = vsel %vm262_vm0, %v1300_v5, 0.0  ;;  %v1343_v10 = vmul.f32 %v1334_v6, %v1266_v51  ;;  %v999_v11 = vadd.f32 %v979_v7, %v859_v62 }
 0x11f   : > { %v1311_v8 = vadd.f32 %v1310_v9, %v1309_v57  ;;  %v847_v12 = vpop.f32.mrf.mxu1  ;;  %v1124_v15 = vpop.f32.mrf.mxu3 }
 0x120   : > { %v1353_v13 = vsel %vm262_vm0, %v1343_v10, 0.0  ;;  %v1139_v14 = vadd.f32 %v1119_v41, %v999_v11  ;;  %v1207_v18 = vpop.f32.mrf.mxu0  ;;  %v862_v57 = vadd.f32 %v847_v12, %v2036_v0  ;;  %v1286_v9 = vpop.permute.xlu0 %1285 }
 0x121   : > { %v1354_v19 = vadd.f32 %v1353_v13, %v1352_v2 }
 0x122   : > { %v1219_v21 = vadd.f32 %v1199_v32, %v1139_v14 }
 0x124   : > { %v1228_v23 = vpack.c.bf16 %v1219_v21, %v1219_v21  ;;  %v1301_v25 = vmul.f32 %v1271_v45, %v1219_v21  ;;  %v1335_v26 = vmul.f32 %v1219_v21, %v1219_v21 }
 0x125   : > { %v982_v24 = vpop.f32.mrf.mxu2 }
 0x126   : > { %1238 = vst.msk [vmem:[%s2047_s10 + $0xc] sm:$0xf] %vm1234_vm3, %v1228_v23  ;;  %v1312_v27 = vsel %vm262_vm0, %v1301_v25, 0.0  ;;  %v1344_v30 = vmul.f32 %v1335_v26, %v1271_v45  ;;  %v1000_v31 = vadd.f32 %v982_v24, %v860_v22  ;;  %v1291_v26 = vpop.permute.xlu1 %1290 }
 0x127   : > { %v1313_v33 = vadd.f32 %v1312_v27, %v1311_v8  ;;  %v849_v34 = vpop.f32.mrf.mxu1  ;;  %v1127_v32 = vpop.f32.mrf.mxu3 }
 0x128   : > { %v1355_v17 = vsel %vm262_vm0, %v1344_v30, 0.0  ;;  %v1140_v36 = vadd.f32 %v1122_v63, %v1000_v31  ;;  %v1209_v38 = vpop.f32.mrf.mxu0  ;;  %v863_v10 = vadd.f32 %v849_v34, %v2038_v29 }
 0x129   : > { %v1356_v53 = vadd.f32 %v1355_v17, %v1354_v19 }
 0x12a   : > { %v1220_v37 = vadd.f32 %v1202_v42, %v1140_v36 }
 0x12c   : > { %v1229_v41 = vpack.c.bf16 %v1220_v37, %v1220_v37  ;;  %v1302_v43 = vmul.f32 %v1276_v35, %v1220_v37  ;;  %v1336_v44 = vmul.f32 %v1220_v37, %v1220_v37  ;;  %v1296_v37 = vpop.permute.xlu2 %1295 }
 0x12d   : > { %v984_v46 = vpop.f32.mrf.mxu2 }
 0x12e   : > { %1239 = vst.msk [vmem:[%s2047_s10 + $0x10] sm:$0xf] %vm1234_vm3, %v1229_v41  ;;  %v1314_v47 = vsel %vm262_vm0, %v1302_v43, 0.0  ;;  %v1345_v48 = vmul.f32 %v1336_v44, %v1276_v35  ;;  %v1001_v49 = vadd.f32 %v984_v46, %v861_v40 }
 0x12f   : > { %v1315_v50 = vadd.f32 %v1314_v47, %v1313_v33  ;;  %v852_v28 = vpop.f32.mrf.mxu1  ;;  %v1129_v54 = vpop.f32.mrf.mxu3 }
 0x130   : > { %v1357_v39 = vsel %vm262_vm0, %v1345_v48, 0.0  ;;  %v1141_v52 = vadd.f32 %v1124_v15, %v1001_v49  ;;  %v1212_v42 = vpop.f32.mrf.mxu0  ;;  %v864_v29 = vadd.f32 %v852_v28, %v2040_v16 }
 0x131   : > { %v1358_v55 = vadd.f32 %v1357_v39, %v1356_v53 }
 0x132   : > { %v1221_v56 = vadd.f32 %v1204_v1, %v1141_v52 }
 0x134   : > { %v1230_v58 = vpack.c.bf16 %v1221_v56, %v1221_v56  ;;  %v1303_v51 = vmul.f32 %v1281_v60, %v1221_v56  ;;  %v1337_v59 = vmul.f32 %v1221_v56, %v1221_v56 }
 0x135   : > { %v987_v20 = vpop.f32.mrf.mxu2 }
 0x136   : > { %1240 = vst.msk [vmem:[%s2047_s10 + $0x14] sm:$0xf] %vm1234_vm3, %v1230_v58  ;;  %v1316_v61 = vsel %vm262_vm0, %v1303_v51, 0.0  ;;  %v1346_v63 = vmul.f32 %v1337_v59, %v1281_v60  ;;  %v1002_v2 = vadd.f32 %v987_v20, %v862_v57 }
 0x137   : > { %v1317_v3 = vadd.f32 %v1316_v61, %v1315_v50  ;;  %v854_v62 = vpop.f32.mrf.mxu1  ;;  %v1132_v6 = vpop.f32.mrf.mxu3 }
 0x138   : > { %v1359_v4 = vsel %vm262_vm0, %v1346_v63, 0.0  ;;  %v1142_v5 = vadd.f32 %v1127_v32, %v1002_v2  ;;  %v1214_v1 = vpop.f32.mrf.mxu0 }
 0x139   : > { %v1360_v7 = vadd.f32 %v1359_v4, %v1358_v55 }
 0x13a   : > { %v1222_v0 = vadd.f32 %v1207_v18, %v1142_v5 }
 0x13c   : > { %v1231_v11 = vpack.c.bf16 %v1222_v0, %v1222_v0  ;;  %v1304_v8 = vmul.f32 %v1286_v9, %v1222_v0  ;;  %v1338_v12 = vmul.f32 %v1222_v0, %v1222_v0 }
 0x13d   : > { %v989_v13 = vpop.f32.mrf.mxu2 }
 0x13e   : > { %1241 = vst.msk [vmem:[%s2047_s10 + $0x18] sm:$0xf] %vm1234_vm3, %v1231_v11  ;;  %v1318_v14 = vsel %vm262_vm0, %v1304_v8, 0.0  ;;  %v1347_v15 = vmul.f32 %v1338_v12, %v1286_v9  ;;  %v1003_v19 = vadd.f32 %v989_v13, %v863_v10 }
 0x13f   : > { %v1319_v45 = vadd.f32 %v1318_v14, %v1317_v3  ;;  %v1134_v23 = vpop.f32.mrf.mxu3 }
 0x140   : > { %v1361_v21 = vsel %vm262_vm0, %v1347_v15, 0.0  ;;  %v1143_v22 = vadd.f32 %v1129_v54, %v1003_v19 }
 0x141   : > { %v1362_v18 = vadd.f32 %v1361_v21, %v1360_v7 }
 0x142   : > { %v1223_v25 = vadd.f32 %v1209_v38, %v1143_v22 }
 0x144   : > { %v1232_v24 = vpack.c.bf16 %v1223_v25, %v1223_v25  ;;  %v1305_v27 = vmul.f32 %v1291_v26, %v1223_v25  ;;  %v1339_v30 = vmul.f32 %v1223_v25, %v1223_v25 }
 0x145   : > { %v992_v31 = vpop.f32.mrf.mxu2 }
 0x146   : > { %1242 = vst.msk [vmem:[%s2047_s10 + $0x1c] sm:$0xf] %vm1234_vm3, %v1232_v24  ;;  %v1320_v33 = vsel %vm262_vm0, %v1305_v27, 0.0  ;;  %v1348_v34 = vmul.f32 %v1339_v30, %v1291_v26  ;;  %v1004_v35 = vadd.f32 %v992_v31, %v864_v29 }
 0x147   : > { %v1321_v17 = vadd.f32 %v1320_v33, %v1319_v45 }
 0x148   : > { %v1363_v36 = vsel %vm262_vm0, %v1348_v34, 0.0  ;;  %v1144_v32 = vadd.f32 %v1132_v6, %v1004_v35 }
 0x149   : > { %v1364_v53 = vadd.f32 %v1363_v36, %v1362_v18 }
 0x14a   : > { %v1224_v38 = vadd.f32 %v1212_v42, %v1144_v32 }
 0x14c   : > { %v1233_v16 = vpack.c.bf16 %v1224_v38, %v1224_v38  ;;  %v1306_v40 = vmul.f32 %v1296_v37, %v1224_v38  ;;  %v1340_v41 = vmul.f32 %v1224_v38, %v1224_v38 }
 0x14d   : > { %v994_v43 = vpop.f32.mrf.mxu2 }
 0x14e   : > { %1243 = vst.msk [vmem:[%s2047_s10 + $0x20] sm:$0xf] %vm1234_vm3, %v1233_v16  ;;  %v1322_v44 = vsel %vm262_vm0, %v1306_v40, 0.0  ;;  %v1349_v46 = vmul.f32 %v1340_v41, %v1296_v37 }
 0x14f   : > { %v1323_v47 = vadd.f32 %v1322_v44, %v1321_v17 }
 0x150   : > { %v1365_v48 = vsel %vm262_vm0, %v1349_v46, 0.0 }
 0x151   : > { %v1324_v49 = vrot.slane %v1323_v47, 4  ;;  %v1366_v50 = vadd.f32 %v1365_v48, %v1364_v53 }
 0x153   : > { %v1325_v28 = vadd.f32 %v1324_v49, %v1323_v47  ;;  %v1367_v39 = vrot.slane %v1366_v50, 4 }
 0x155   : > { %v1326_v52 = vrot.slane %v1325_v28, 2  ;;  %v1368_v54 = vadd.f32 %v1367_v39, %v1366_v50 }
 0x157   : > { %v1327_v42 = vadd.f32 %v1326_v52, %v1325_v28  ;;  %v1369_v55 = vrot.slane %v1368_v54, 2 }
 0x159   : > { %v1328_v60 = vrot.slane %v1327_v42, 1  ;;  %v1370_v56 = vadd.f32 %v1369_v55, %v1368_v54 }
 0x15b   : > { %v1329_v57 = vadd.f32 %v1328_v60, %v1327_v42  ;;  %v1371_v58 = vrot.slane %v1370_v56, 1 }
 0x15d   : > { %1331 = vst.msk [vmem:[%s208_s14] sm:$0x1] %vm1330_vm4, %v1329_v57  ;;  %v1372_v51 = vadd.f32 %v1371_v58, %v1370_v56 }
 0x15f   : > { %1373 = vst.msk [vmem:[%s208_s14 + $0x1] sm:$0x1] %vm1330_vm4, %v1372_v51 }
 0x160 PF: > { %s15_s15 = sadd.s32 1, %s1777_s15  }
 0x161   : > { %p12_p4 = scmp.ge.s32.totalorder %s15_s15, 4  }
 0x163   :  { %14 = sbr.rel (!%p12_p4) target bundleno = 1 (0x1), region = 82 }

// kernel: skinny_block_forward.4
= control target key start
LH: loop header
LB: loop body
LE: loop exit
PB: predicated region body
PF: predicated region fallthrough
CT: control target
= control target key end

     0   :  { %s2368_s13 = smov 0   ;;  %s3000_s0 = inlined_call_operand.vmem [shape: bf16[2,112,16], index: 0, kind: input, shape index: {}]   ;;  %s3001_s1 = inlined_call_operand.vmem [shape: f32[1,16], index: 1, kind: input, shape index: {}]   ;;  %s3002_s2 = inlined_call_operand.vmem [shape: f32[1,16], index: 2, kind: input, shape index: {}]   ;;  %s3003_s3 = inlined_call_operand.vmem [shape: f32[112,1], index: 3, kind: input, shape index: {}]   ;;  %s3004_s4 = inlined_call_operand.vmem [shape: bf16[9,16,16], index: 4, kind: input, shape index: {}]   ;;  %s3005_s5 = inlined_call_operand.vmem [shape: f32[80,1], index: 5, kind: input, shape index: {}]   ;;  %s3006_s6 = inlined_call_operand.vmem [shape: bf16[2,80,16], index: 6, kind: input, shape index: {}]   ;;  %s3007_s7 = inlined_call_operand.vmem [shape: bf16[16,16], index: 7, kind: input, shape index: {}]   ;;  %s3008_s8 = inlined_call_operand.vmem [shape: bf16[2,80,16], index: 8, kind: output, shape index: {0}]   ;;  %s3009_s9 = inlined_call_operand.vmem [shape: bf16[2,80,16], index: 9, kind: output, shape index: {1}]   ;;  %s3010_s10 = inlined_call_operand.vmem [shape: f32[2,4,16], index: 10, kind: output, shape index: {2}]  }
   0x1 LB: > { %s2032_s14 = sadd.s32 4294967295, %s2310_s13   ;;  %p2036_p0 = scmp.ge.s32.totalorder %s2310_s13, 1  ;;  %s2310_s13 = sphi %s2368_s13, %s21_s13  }
   0x2   : > { %p327_p1 = scmp.lt.s32.totalorder %s2310_s13, 3 }
   0x4   : > { %p328_p2 = pnand %p2036_p0, %p327_p1 }
   0x5   : > { %p379_p3 = scmp.lt.s32.totalorder (!%p328_p2), %s2032_s14, 1 }
   0x6   : > { %331 = sbr.rel (%p328_p2) target bundleno = 506 (0x1fa), region = 52 }
   0xb   : > { %v488_v0 = vld [vmem:[%s3003_s3 + $0x30] sm:$0xff]  ;;  %v482_v2 = vld [vmem:[%s3003_s3] sm:$0xff]  ;;  %v2312_v3 = vmov 0   ;;  %v489_v4 = vld [vmem:[%s3003_s3 + $0x38] sm:$0xff]  ;;  %s3012_s14 = smov (!%p379_p3, %s2032_s14), 1  ;;  %vm594_vm0 = vcmask 125952  }
   0xc   : > { %v484_v1 = vld [vmem:[%s3003_s3 + $0x10] sm:$0xff]  ;;  %2301 = vset.pattern.permute.xlu2 %v2312_v3  ;;  %2300 = vset.pattern.permute.xlu1 %v2312_v3  ;;  %v485_v5 = vld [vmem:[%s3003_s3 + $0x18] sm:$0xff]  ;;  %v483_v6 = vld [vmem:[%s3003_s3 + $0x8] sm:$0xff]  ;;  %s2288_s27 = smul.u32 56, %s3012_s14  ;;  %vm704_vm1 = vcmask 130048   ;;  %vm811_vm3 = vcmask 1046528  }
   0xd   : > { %2299 = vset.pattern.permute.xlu0 %v2312_v3  ;;  %528 = vperm.xlu2 %2301, %v488_v0   ;;  %v486_v7 = vld [vmem:[%s3003_s3 + $0x20] sm:$0xff]  ;;  %v491_v8 = vld [vmem:[%s3003_s3 + $0x48] sm:$0xff]  ;;  %v493_v10 = vld [vmem:[%s3003_s3 + $0x58] sm:$0xff]  ;;  %vm653_vm2 = vsmask.f32 7424  ;;  %vm1139_vm4 = vcmask 1045504  }
   0xe   : > { %508 = vperm.xlu1 %2300, %v484_v1   ;;  %498 = vperm.xlu0 %2299, %v482_v2   ;;  %v490_v9 = vld [vmem:[%s3003_s3 + $0x40] sm:$0xff]  ;;  %v492_v11 = vld [vmem:[%s3003_s3 + $0x50] sm:$0xff]  ;;  %v487_v12 = vld [vmem:[%s3003_s3 + $0x28] sm:$0xff]  ;;  %s2458_s30 = scalar_lea.vmem %s3000_s0, %s2288_s27  ;;  %vm1013_vm5 = vsmask.f32 6400  ;;  %s2696_s19 = smul.u32 40, %s3012_s14 }
   0xf   : > { %v1565_v13 = vld [vmem:[%s3005_s5 + $0x8] sm:$0xff]  ;;  %v1564_v14 = vld [vmem:[%s3005_s5] sm:$0xff]  ;;  %v1567_v17 = vld [vmem:[%s3005_s5 + $0x18] sm:$0xff]  ;;  %vm1341_vm6 = vsmask.f32 5376  ;;  %vm1467_vm7 = vcmask 1044480  }
  0x10   : > { %v494_v15 = vld [vmem:[%s3003_s3 + $0x60] sm:$0xff]  ;;  %v1566_v18 = vld [vmem:[%s3005_s5 + $0x10] sm:$0xff]  ;;  %v1571_v19 = vld [vmem:[%s3005_s5 + $0x38] sm:$0xff]  ;;  %s2707_s22 = scalar_lea.vmem %s3006_s6, %s2696_s19  ;;  %s2817_s25 = scalar_lea.vmem %s3009_s9, %s2696_s19  ;;  %vm1659_vm8 = vcmask 122880  }
  0x11   : > { %v1568_v16 = vld [vmem:[%s3005_s5 + $0x20] sm:$0xff]  ;;  %v1570_v20 = vld [vmem:[%s3005_s5 + $0x30] sm:$0xff]  ;;  %v1569_v21 = vld [vmem:[%s3005_s5 + $0x28] sm:$0xff]  ;;  %s2836_s28 = scalar_lea.vmem %s3008_s8, %s2696_s19  ;;  %s2041_s29 = sshll.u32 %s3012_s14, 2 }
  0x12   : > { %v495_v22 = vld [vmem:[%s3003_s3 + $0x68] sm:$0xff]  ;;  %v1572_v24 = vld [vmem:[%s3005_s5 + $0x40] sm:$0xff]  ;;  %v2279_v25 = vld [vmem:[%s2458_s30 + $0x18] sm:$0xff]   ;;  %s402_s12 = scalar_lea.vmem %s3010_s10, %s2041_s29 }
  0x13   : > { %v1573_v23 = vld [vmem:[%s3005_s5 + $0x48] sm:$0xff]  ;;  %v2259_v26 = vunpack.c.l.bf16 %v2279_v25  ;;  %v2464_v27 = vld [vmem:[%s3001_s1] ss:$0 sm:$0xff]  ;;  %v2260_v31 = vunpack.c.h.bf16 %v2279_v25  ;;  %v2475_v34 = vld [vmem:[%s2458_s30 + $0x10] sm:$0xff]  }
  0x14   : > { %v2470_v29 = vld [vmem:[%s3002_s2] ss:$0 sm:$0xff]  ;;  %v2255_v38 = vunpack.c.l.bf16 %v2475_v34  ;;  %v2485_v43 = vld [vmem:[%s2458_s30 + $0x28] sm:$0xff]  }
  0x15   : > { %533 = vperm.xlu2 %2301, %v489_v4   ;;  %v442_v28 = vmul.f32 %v2464_v27, %v2259_v26  ;;  %v443_v33 = vmul.f32 %v2464_v27, %v2260_v31  ;;  %v2222_v39 = vld [vmem:[%s3004_s4] sm:$0xff]  ;;  %v2277_v44 = vld [vmem:[%s2458_s30 + $0x8] sm:$0xff]   ;;  %v2268_v49 = vunpack.c.h.bf16 %v2485_v43  ;;  %v2229_v31 = vld [vmem:[%s3004_s4 + $0x18] sm:$0xff] }
  0x16   : > { %513 = vperm.xlu1 %2300, %v485_v5   ;;  %503 = vperm.xlu0 %2299, %v483_v6   ;;  %v440_v42 = vmul.f32 %v2464_v27, %v2255_v38  ;;  %v2246_v45 = vld [vmem:[%s2458_s30] sm:$0xff]   ;;  %v2251_v50 = vunpack.c.l.bf16 %v2277_v44  ;;  %v2252_v60 = vunpack.c.h.bf16 %v2277_v44  ;;  %v2223_v61 = vld [vmem:[%s3004_s4 + $0x8] sm:$0xff] }
  0x17   : > { %v460_v30 = vadd.f32 %v2470_v29, %v442_v28  ;;  %v461_v37 = vadd.f32 %v2470_v29, %v443_v33  ;;  %2287 = vmatpush.bf16.msra.mxu3 %v2222_v39  ;;  %777 = vmatpush.bf16.msra.mxu1 %v2222_v39  ;;  %v2247_v51 = vunpack.c.l.bf16 %v2246_v45  ;;  %v447_v54 = vmul.f32 %v2464_v27, %v2268_v49  ;;  %v2282_v49 = vld [vmem:[%s2458_s30 + $0x30] sm:$0xff]  }
  0x18   : > { %v458_v48 = vadd.f32 %v2470_v29, %v440_v42  ;;  %v438_v55 = vmul.f32 %v2464_v27, %v2251_v50  ;;  %v2248_v0 = vunpack.c.h.bf16 %v2246_v45  ;;  %727 = vmatpush.bf16.msra.mxu0 %v2223_v61  ;;  %2286 = vmatpush.bf16.msra.mxu2 %v2223_v61  ;;  %v439_v4 = vmul.f32 %v2464_v27, %v2252_v60 }
  0x19   : > { %v474_v32 = vmax.f32 %v460_v30, 0.0  ;;  %v475_v41 = vmax.f32 %v461_v37, 0.0  ;;  %v436_v56 = vmul.f32 %v2464_v27, %v2247_v51  ;;  %v465_v59 = vadd.f32 %v2470_v29, %v447_v54  ;;  %v2224_v30 = vld [vmem:[%s3004_s4 + $0x10] sm:$0xff] }
  0x1a   : > { %v472_v53 = vmax.f32 %v458_v48, 0.0  ;;  %v456_v62 = vadd.f32 %v2470_v29, %v438_v55  ;;  %v2267_v37 = vunpack.c.l.bf16 %v2485_v43  ;;  %v2271_v55 = vunpack.c.l.bf16 %v2282_v49 }
  0x1b   : > { %v454_v63 = vadd.f32 %v2470_v29, %v436_v56  ;;  %v479_v3 = vmax.f32 %v465_v59, 0.0  ;;  %969 = vmatpush.bf16.msrb.mxu3 %v2229_v31 }
  0x1c   : > { %v470_v5 = vmax.f32 %v456_v62, 0.0  ;;  %851 = vmatpush.bf16.msrb.mxu2 %v2224_v30  ;;  %v446_v45 = vmul.f32 %v2464_v27, %v2267_v37  ;;  %v448_v62 = vmul.f32 %v2464_v27, %v2271_v55  ;;  %v2236_v37 = vld [vmem:[%s3004_s4 + $0x30] sm:$0xff] }
  0x1d   : > { %518 = vperm.xlu2 %2301, %v486_v7   ;;  %v468_v6 = vmax.f32 %v454_v63, 0.0  ;;  %v437_v7 = vmul.f32 %v2464_v27, %v2248_v0 }
  0x1e   : > { %543 = vperm.xlu1 %2300, %v491_v8   ;;  %538 = vperm.xlu0 %2299, %v490_v9   ;;  %v2280_v8 = vld [vmem:[%s2458_s30 + $0x20] sm:$0xff]  }
  0x1f   : > { %v2230_v9 = vld [vmem:[%s3004_s4 + $0x20] sm:$0xff] }
  0x20   : > { %1095 = vmatpush.bf16.msrb.mxu0 %v2230_v9 }
  0x25   : > { %553 = vperm.xlu2 %2301, %v493_v10  }
  0x26   : > { %548 = vperm.xlu1 %2300, %v492_v11   ;;  %523 = vperm.xlu0 %2299, %v487_v12   ;;  %v2231_v11 = vld [vmem:[%s3004_s4 + $0x28] sm:$0xff] }
  0x27   : > { %1179 = vmatpush.bf16.msrb.mxu1 %v2231_v11 }
  0x2d   : > { %1581 = vperm.xlu2 %2301, %v1565_v13  }
  0x2e   : > { %1576 = vperm.xlu1 %2300, %v1564_v14   ;;  %558 = vperm.xlu0 %2299, %v494_v15   ;;  %v457_v15 = vadd.f32 %v2470_v29, %v439_v4 }
  0x30   : > { %v471_v25 = vmax.f32 %v457_v15, 0.0 }
  0x35   : > { %1596 = vperm.xlu2 %2301, %v1568_v16   ;;  %v2264_v16 = vunpack.c.h.bf16 %v2280_v8 }
  0x36   : > { %1591 = vperm.xlu1 %2300, %v1567_v17   ;;  %1586 = vperm.xlu0 %2299, %v1566_v18  }
  0x3d   : > { %1611 = vperm.xlu2 %2301, %v1571_v19   ;;  %v455_v19 = vadd.f32 %v2470_v29, %v437_v7 }
  0x3e   : > { %1606 = vperm.xlu1 %2300, %v1570_v20   ;;  %1601 = vperm.xlu0 %2299, %v1569_v21   ;;  %v2263_v20 = vunpack.c.l.bf16 %v2280_v8 }
  0x3f   : > { %v469_v26 = vmax.f32 %v455_v19, 0.0 }
  0x40   : > { %v444_v28 = vmul.f32 %v2464_v27, %v2263_v20 }
  0x45   : > { %563 = vperm.xlu2 %2301, %v495_v22  }
  0x46   : > { %1621 = vperm.xlu1 %2300, %v1573_v23   ;;  %1616 = vperm.xlu0 %2299, %v1572_v24   ;;  %v445_v24 = vmul.f32 %v2464_v27, %v2264_v16 }
  0x67   : > { %v529_v35 = vpop.permute.xlu2 %528 }
  0x68   : > { %v572_v36 = vmul.f32 %v529_v35, %v474_v32 }
  0x6a   : > { %v586_v40 = vpack.c.bf16 %v572_v36, %v572_v36  ;;  %v463_v36 = vadd.f32 %v2470_v29, %v445_v24 }
  0x6c   : > { %601 = vst.msk [vmem:[#allocation2 + $0x18] sm:$0xf] %vm594_vm0, %v586_v40  ;;  %v462_v40 = vadd.f32 %v2470_v29, %v444_v28 }
  0x6f   : > { %v534_v46 = vpop.permute.xlu2 %533 }
  0x70   : > { %v573_v47 = vmul.f32 %v534_v46, %v475_v41  ;;  %v2256_v41 = vunpack.c.h.bf16 %v2475_v34  ;;  %v477_v46 = vmax.f32 %v463_v36, 0.0 }
  0x72   : > { %v587_v52 = vpack.c.bf16 %v573_v47, %v573_v47  ;;  %v476_v47 = vmax.f32 %v462_v40, 0.0  ;;  %v441_v48 = vmul.f32 %v2464_v27, %v2256_v41 }
  0x74   : > { %602 = vst.msk [vmem:[#allocation2 + $0x1c] sm:$0xf] %vm594_vm0, %v587_v52  ;;  %v464_v52 = vadd.f32 %v2470_v29, %v446_v45  ;;  %v459_v54 = vadd.f32 %v2470_v29, %v441_v48 }
  0x76   : > { %v478_v60 = vmax.f32 %v464_v52, 0.0  ;;  %v473_v61 = vmax.f32 %v459_v54, 0.0 }
  0x77   : > { %v519_v57 = vpop.permute.xlu2 %518 }
  0x78   : > { %v570_v58 = vmul.f32 %v519_v57, %v472_v53 }
  0x7a   : > { %v584_v1 = vpack.c.bf16 %v570_v58, %v570_v58 }
  0x7b   : > { %v2501_v2 = vld [vmem:[#allocation2 + $0x18] sm:$0xff] }
  0x7c   : > { %599 = vst.msk [vmem:[#allocation2 + $0x10] sm:$0xf] %vm594_vm0, %v584_v1  ;;  %2076 = vmatmul.msk.bf16.vlgmr.msra.gmra.mxu3 %vm704_vm1, %v2501_v2  ;;  %v678_v27 = vshll.u32 %v2501_v2, 16 }
  0x7f   : > { %v554_v10 = vpop.permute.xlu2 %553 }
  0x80   : > { %v577_v12 = vmul.f32 %v554_v10, %v479_v3  ;;  %v509_v13 = vpop.permute.xlu1 %508  ;;  %v499_v14 = vpop.permute.xlu0 %498  ;;  %v466_v10 = vadd.f32 %v2470_v29, %v448_v62 }
  0x81   : > { %v568_v17 = vmul.f32 %v509_v13, %v470_v5  ;;  %v566_v18 = vmul.f32 %v499_v14, %v468_v6 }
  0x82   : > { %v591_v21 = vpack.c.bf16 %v577_v12, %v577_v12  ;;  %v480_v16 = vmax.f32 %v466_v10, 0.0 }
  0x83   : > { %v582_v22 = vpack.c.bf16 %v568_v17, %v568_v17  ;;  %v580_v23 = vpack.c.bf16 %v566_v18, %v566_v18  ;;  %v2559_v17 = vrot.slane %v678_v27, 1  ;;  %v682_v18 = vshrl.u32 %v2501_v2, 16 }
  0x84   : > { %606 = vst.msk [vmem:[#allocation2 + $0x2c] sm:$0xf] %vm594_vm0, %v591_v21 }
  0x85   : > { %597 = vst.msk [vmem:[#allocation2 + $0x8] sm:$0xf] %vm594_vm0, %v582_v22  ;;  %v684_v24 = vor.u32 %v682_v18, %v2559_v17 }
  0x86   : > { %595 = vst.msk [vmem:[#allocation2] sm:$0xf] %vm594_vm0, %v580_v23 }
  0x87   : > { %v2528_v32 = vpop.permute.xlu2 %1581 }
  0x88   : > { %v514_v33 = vpop.permute.xlu1 %513  ;;  %v504_v35 = vpop.permute.xlu0 %503 }
  0x89   : > { %v569_v38 = vmul.f32 %v514_v33, %v471_v25  ;;  %v567_v39 = vmul.f32 %v504_v35, %v469_v26  ;;  %v817_v26 = vrot.slane %v2501_v2, 1 }
  0x8b   : > { %v583_v42 = vpack.c.bf16 %v569_v38, %v569_v38  ;;  %v581_v44 = vpack.c.bf16 %v567_v39, %v567_v39 }
  0x8d   : > { %598 = vst.msk [vmem:[#allocation2 + $0xc] sm:$0xf] %vm594_vm0, %v583_v42  ;;  %v2237_v42 = vld [vmem:[%s3004_s4 + $0x38] sm:$0xff] }
  0x8e   : > { %596 = vst.msk [vmem:[#allocation2 + $0x4] sm:$0xf] %vm594_vm0, %v581_v44  ;;  %1423 = vmatpush.bf16.msra.mxu3 %v2237_v42 }
  0x8f   : > { %v2539_v43 = vpop.permute.xlu2 %1596 }
  0x90   : > { %v544_v50 = vpop.permute.xlu1 %543  ;;  %v539_v51 = vpop.permute.xlu0 %538 }
  0x91   : > { %v575_v34 = vmul.f32 %v544_v50, %v477_v46  ;;  %v574_v53 = vmul.f32 %v539_v51, %v476_v47  ;;  %v1216_v47 = vld [vmem:[#allocation2 + $0x8] sm:$0xc] }
  0x93   : > { %v589_v56 = vpack.c.bf16 %v575_v34, %v575_v34  ;;  %v588_v57 = vpack.c.bf16 %v574_v53, %v574_v53  ;;  %v1241_v34 = vunpack.c.l.b16 %v1216_v47 }
  0x94   : > { %v2543_v58 = vld [vmem:[#allocation2 + $0x8] sm:$0xff] }
  0x95   : > { %604 = vst.msk [vmem:[#allocation2 + $0x24] sm:$0xf] %vm594_vm0, %v589_v56  ;;  %v2274_v59 = vld [vmem:[#allocation2] sm:$0xff]   ;;  %v662_v0 = vshll.u32 %v2543_v58, 16  ;;  %v2566_v21 = vld [vmem:[#allocation2 + $0x8] sm:$0xff]   ;;  %v666_v44 = vshrl.u32 %v2543_v58, 16 }
  0x96   : > { %603 = vst.msk [vmem:[#allocation2 + $0x20] sm:$0xf] %vm594_vm0, %v588_v57  ;;  %v657_v63 = vshll.u32 %v2274_v59, 16  ;;  %2073 = vmatmul.msk.bf16.vlgmr.msra.gmra.mxu1 %vm704_vm1, %v2274_v59  ;;  %v655_v3 = vshrl.u32 %v2274_v59, 16  ;;  %v888_v20 = vld [vmem:[#allocation2 + $0x4] sm:$0xe]  ;;  %v914_v30 = vunpack.c.l.b16 %v2566_v21  ;;  %v1242_v49 = vunpack.c.h.b16 %v2566_v21 }
  0x97   : > { %v2550_v1 = vpop.permute.xlu2 %1611  ;;  %v664_v7 = vrot.slane %v662_v0, 1  ;;  %v913_v28 = vunpack.c.l.b16 %v888_v20  ;;  %v2594_v48 = vld [vmem:[#allocation2 + $0xc] sm:$0xff]  ;;  %v2238_v59 = vld [vmem:[%s3004_s4 + $0x40] sm:$0xff] }
  0x98   : > { %v659_v4 = vrot.slane %v657_v63, 1  ;;  %v549_v5 = vpop.permute.xlu1 %548  ;;  %v524_v6 = vpop.permute.xlu0 %523  ;;  %v931_v55 = vrot.slane %v2594_v48, 1  ;;  %v2604_v57 = vpack.c.b16 %v1242_v49, %v1241_v34  ;;  %v2244_v63 = vld [vmem:[%s3007_s7] sm:$0xff] }
  0x99   : > { %v576_v8 = vmul.f32 %v549_v5, %v478_v60  ;;  %v571_v9 = vmul.f32 %v524_v6, %v473_v61  ;;  %v2587_v41 = vpack.c.b16 %v914_v30, %v913_v28  ;;  %v668_v50 = vor.u32 %v666_v44, %v664_v7  ;;  %1772 = vmatpush.bf16.msra.mxu1 %v2244_v63  ;;  %v1132_v27 = vld [vmem:[#allocation2 + $0x4] sm:$0xc] }
  0x9a   : > { %v660_v11 = vor.u32 %v659_v4, %v655_v3  ;;  %v1258_v3 = vrot.slane %v2604_v57, 2  ;;  %v1023_v28 = vshrl.u32 %v2594_v48, 16 }
  0x9b   : > { %v590_v12 = vpack.c.bf16 %v576_v8, %v576_v8  ;;  %v585_v13 = vpack.c.bf16 %v571_v9, %v571_v9  ;;  %v930_v52 = vrot.slane %v2587_v41, 1 }
  0x9c   : > { %v665_v14 = vsel %vm653_vm2, %v660_v11, %v664_v7 }
  0x9d   : > { %605 = vst.msk [vmem:[#allocation2 + $0x28] sm:$0xf] %vm594_vm0, %v590_v12  ;;  %2064 = vmatmul.msk.bf16.vlgmr.msra.gmra.mxu0 %vm704_vm1, %v665_v14  ;;  %v2557_v15 = vld [vmem:[#allocation2 + $0x20] sm:$0xff]  ;;  %v932_v60 = vsel %vm811_vm3, %v930_v52, %v931_v55 }
  0x9e   : > { %600 = vst.msk [vmem:[#allocation2 + $0x14] sm:$0xf] %vm594_vm0, %v585_v13  ;;  %2077 = vmatmul.msk.bf16.gmra.mxu3 %vm704_vm1, %v2557_v15  ;;  %v686_v19 = vshll.u32 %v2557_v15, 16  ;;  %v819_v31 = vrot.slane %v2557_v15, 1  ;;  %v690_v61 = vshrl.u32 %v2557_v15, 16  ;;  %1507 = vmatpush.bf16.msra.mxu0 %v2238_v59  ;;  %v1137_v13 = vunpack.c.l.b16 %v1132_v27 }
  0x9f   : > { %v564_v29 = vpop.permute.xlu2 %563  ;;  %v2283_v12 = vld [vmem:[#allocation2] sm:$0xf0]  ;;  %v2284_v15 = vld [vmem:[#allocation2] sm:$0xe] }
  0xa0   : > { %v559_v22 = vpop.permute.xlu0 %558  ;;  %v688_v25 = vrot.slane %v686_v19, 1  ;;  %v2580_v38 = vsel %vm811_vm3, %v817_v26, %v819_v31  ;;  %v1138_v29 = vpack.c.b16 %v914_v30, %v1137_v13  ;;  %v1141_v30 = vrot.slane %v2594_v48, 2 }
  0xa1   : > { %v578_v23 = vmul.f32 %v559_v22, %v480_v16  ;;  %v2285_v16 = vor.u32 %v2284_v15, %v2283_v12  ;;  %v813_v22 = vrot.slane %v2543_v58, 1 }
  0xa2   : > { %v689_v35 = vsel %vm653_vm2, %v684_v24, %v688_v25  ;;  %v692_v5 = vor.u32 %v690_v61, %v688_v25  ;;  %v1018_v24 = vshll.u32 %v2587_v41, 16  ;;  %v1140_v25 = vrot.slane %v1138_v29, 2 }
  0xa3   : > { %v592_v33 = vpack.c.bf16 %v578_v23, %v578_v23  ;;  %2067 = vmatmul.msk.bf16.vlgmr.msra.gmra.mxu2 %vm704_vm1, %v689_v35  ;;  %v812_v20 = vrot.slane %v2285_v16, 1  ;;  %v1015_v23 = vshrl.u32 %v2587_v41, 16  ;;  %v2227_v41 = vld [vmem:[#allocation2 + $0x1c] sm:$0xff] }
  0xa4   : > { %v621_v36 = vld [vmem:[#allocation2 + $0x28] sm:$0x1]  ;;  %1297 = vmatpush.bf16.msra.mxu2 %v2236_v37  ;;  %v1020_v35 = vrot.slane %v1018_v24, 2  ;;  %v1041_v63 = vshrl.u32 %v2227_v41, 16 }
  0xa5   : > { %607 = vst.msk [vmem:[#allocation2 + $0x30] sm:$0xf] %vm594_vm0, %v592_v33  ;;  %v2583_v39 = vld [vmem:[#allocation2 + $0x10] sm:$0xff]  ;;  %v646_v40 = vunpack.c.l.b16 %v621_v36  ;;  %v1017_v33 = vrot.slane %v1015_v23, 1  ;;  %v1142_v36 = vsel %vm1139_vm4, %v1140_v25, %v1141_v30  ;;  %v1346_v23 = vshll.u32 %v2604_v57, 16 }
  0xa6   : > { %2074 = vmatmul.msk.bf16.gmra.mxu1 %vm704_vm1, %v2543_v58  ;;  %v670_v45 = vshll.u32 %v2583_v39, 16  ;;  %v2600_v56 = vld [vmem:[#allocation2 + $0x10] sm:$0xff]  ;;  %v674_v9 = vshrl.u32 %v2583_v39, 16  ;;  %v1025_v58 = vrot.slane %v1023_v28, 1  ;;  %v815_v47 = vrot.slane %v2583_v39, 1 }
  0xa7   : > { %v652_v46 = vpack.c.b16 %v646_v40, %v646_v40  ;;  %v1259_v4 = vrot.slane %v2600_v56, 2  ;;  %v2631_v10 = vld [vmem:[#allocation2 + $0x14] sm:$0xff]  ;;  %v1021_v40 = vor.u32 %v1020_v35, %v1017_v33  ;;  %v1354_v29 = vshll.u32 %v2600_v56, 16 }
  0xa8   : > { %v672_v51 = vrot.slane %v670_v45, 1  ;;  %v933_v14 = vrot.slane %v2631_v10, 1  ;;  %v935_v45 = vrot.slane %v2227_v41, 1  ;;  %v816_v52 = vsel %vm811_vm3, %v813_v22, %v815_v47 }
  0xa9   : > { %v694_v54 = vshll.u32 %v652_v46, 16  ;;  %v821_v0 = vrot.slane %v652_v46, 1  ;;  %v2624_v7 = vsel %vm1139_vm4, %v1258_v3, %v1259_v4  ;;  %v818_v3 = vsel %vm811_vm3, %v815_v47, %v817_v26 }
  0xaa   : > { %v673_v53 = vsel %vm653_vm2, %v668_v50, %v672_v51  ;;  %v676_v11 = vor.u32 %v674_v9, %v672_v51  ;;  %v934_v19 = vsel %vm811_vm3, %v931_v55, %v933_v14  ;;  %v936_v46 = vsel %vm811_vm3, %v933_v14, %v935_v45  ;;  %v2228_v55 = vld [vmem:[#allocation2 + $0x24] sm:$0xff] }
  0xab   : > { %v696_v62 = vrot.slane %v694_v54, 1  ;;  %v2619_v6 = vsel %vm811_vm3, %v819_v31, %v821_v0  ;;  %v1026_v31 = vshll.u32 %v2594_v48, 16  ;;  %v1032_v48 = vshrl.u32 %v2631_v10, 16 }
  0xac   : > { %v681_v18 = vsel %vm653_vm2, %v676_v11, %v2559_v17  ;;  %v814_v17 = vsel %vm811_vm3, %v812_v20, %v813_v22  ;;  %v1035_v50 = vshll.u32 %v2631_v10, 16  ;;  %v1143_v51 = vrot.slane %v2631_v10, 2 }
  0xad   : > { %2065 = vmatmul.msk.bf16.gmra.mxu0 %vm704_vm1, %v673_v53  ;;  %v697_v8 = vsel %vm653_vm2, %v692_v5, %v696_v62  ;;  %v1028_v37 = vrot.slane %v1026_v31, 2  ;;  %v1034_v34 = vrot.slane %v1032_v48, 1  ;;  %v898_v62 = vld [vmem:[#allocation2 + $0x2c] sm:$0x1]  ;;  %v1044_v0 = vshll.u32 %v2227_v41, 16 }
  0xae   : > { %2111 = vmatmul.msk.bf16.vlgmr.msrb.gmra.mxu3 %vm704_vm1, %v932_v60  ;;  %v1037_v53 = vrot.slane %v1035_v50, 2  ;;  %v1144_v54 = vsel %vm1139_vm4, %v1141_v30, %v1143_v51  ;;  %v937_v60 = vrot.slane %v2228_v55, 1  ;;  %v1145_v5 = vrot.slane %v2227_v41, 2  ;;  %v1006_v31 = vld [vmem:[#allocation2 + $0x2c] sm:$0x3] }
  0xaf   : > { %v1029_v42 = vor.u32 %v1028_v37, %v1025_v58  ;;  %v1043_v10 = vrot.slane %v1041_v63, 1  ;;  %v1046_v27 = vrot.slane %v1044_v0, 2  ;;  %v1050_v26 = vshrl.u32 %v2228_v55, 16 }
  0xb0   : > { %v1038_v59 = vor.u32 %v1037_v53, %v1034_v34  ;;  %v938_v61 = vsel %vm811_vm3, %v935_v45, %v937_v60  ;;  %v1146_v9 = vsel %vm1139_vm4, %v1143_v51, %v1145_v5  ;;  %v1053_v15 = vshll.u32 %v2228_v55, 16 }
  0xb1   : > { %v1030_v44 = vsel %vm1013_vm5, %v1021_v40, %v1029_v42  ;;  %v1047_v12 = vor.u32 %v1046_v27, %v1043_v10  ;;  %v1147_v16 = vrot.slane %v2228_v55, 2  ;;  %v1343_v22 = vshrl.u32 %v2604_v57, 16  ;;  %v2687_v40 = vld [vmem:[#allocation2 + $0x18] sm:$0xff]  ;;  %v2701_v55 = vld [vmem:[#allocation2 + $0x20] sm:$0xff] }
  0xb2   : > { %v1055_v20 = vrot.slane %v1053_v15, 2  ;;  %v1356_v28 = vrot.slane %v1354_v29, 3  ;;  %v1348_v33 = vrot.slane %v1346_v23, 3  ;;  %v1360_v45 = vshrl.u32 %v2687_v40, 16 }
  0xb3   : > { %2068 = vmatmul.msk.bf16.gmra.mxu2 %vm704_vm1, %v697_v8  ;;  %v923_v8 = vunpack.c.l.b16 %v898_v62  ;;  %v1048_v13 = vsel %vm1013_vm5, %v1038_v59, %v1047_v12  ;;  %v1148_v24 = vsel %vm1139_vm4, %v1145_v5, %v1147_v16  ;;  %v1345_v30 = vrot.slane %v1343_v22, 2 }
  0xb4   : > { %v1362_v51 = vrot.slane %v1360_v45, 2  ;;  %v1372_v62 = vshll.u32 %v2701_v55, 16  ;;  %v2241_v45 = vld [vmem:[%s2707_s22 + $0x10] sm:$0xff] }
  0xb5   : > { %v929_v11 = vpack.c.b16 %v923_v8, %v923_v8  ;;  %v1349_v58 = vor.u32 %v1348_v33, %v1345_v30  ;;  %v1471_v33 = vrot.slane %v2687_v40, 3 }
  0xb6   : > { %2075 = vmatmul.msk.bf16.gmra.mxu1 %vm704_vm1, %v2583_v39  ;;  %v1039_v39 = vsel %vm1013_vm5, %v1029_v42, %v1038_v59  ;;  %v1374_v8 = vrot.slane %v1372_v62, 3 }
  0xb7   : > { %v939_v14 = vrot.slane %v929_v11, 1 }
  0xb9   : > { %v940_v2 = vsel %vm811_vm3, %v937_v60, %v939_v14  ;;  %v1460_v60 = vld [vmem:[#allocation2 + $0x8] sm:$0x8] }
  0xba   : > { %v1465_v0 = vunpack.c.l.b16 %v1460_v60 }
  0xbd   : > { %2066 = vmatmul.msk.bf16.gmra.mxu0 %vm704_vm1, %v681_v18  ;;  %v1351_v18 = vshrl.u32 %v2600_v56, 16 }
  0xbe   : > { %2112 = vmatmul.msk.bf16.gmra.mxu3 %vm704_vm1, %v934_v19  ;;  %v1052_v19 = vrot.slane %v1050_v26, 1 }
  0xbf   : > { %v1353_v25 = vrot.slane %v1351_v18, 2 }
  0xc1   : > { %v1357_v35 = vor.u32 %v1356_v28, %v1353_v25  ;;  %v1334_v28 = vld [vmem:[#allocation2 + $0x30] sm:$0x7] }
  0xc3   : > { %2084 = vmatmul.msk.bf16.vlgmr.msrb.gmra.mxu2 %vm704_vm1, %v814_v17  ;;  %v1056_v17 = vor.u32 %v1055_v20, %v1052_v19  ;;  %v1358_v57 = vsel %vm1341_vm6, %v1349_v58, %v1357_v35 }
  0xc6   : > { %2133 = vmatmul.msk.bf16.vlgmr.msrb.gmra.mxu1 %vm704_vm1, %v1142_v36  ;;  %v1011_v36 = vunpack.c.l.b16 %v1006_v31 }
  0xc8   : > { %v1012_v37 = vpack.c.b16 %v1011_v36, %v1011_v36  ;;  %v1339_v36 = vunpack.c.l.b16 %v1334_v28 }
  0xca   : > { %v1059_v41 = vshrl.u32 %v1012_v37, 16  ;;  %v1062_v42 = vshll.u32 %v1012_v37, 16 }
  0xcc   : > { %v1061_v48 = vrot.slane %v1059_v41, 1  ;;  %v1064_v50 = vrot.slane %v1062_v42, 2  ;;  %v1263_v41 = vrot.slane %v2701_v55, 2 }
  0xcd   : > { %2122 = vmatmul.msk.bf16.vlgmr.msrb.gmra.mxu0 %vm704_vm1, %v1030_v44  ;;  %v1149_v44 = vrot.slane %v1012_v37, 2 }
  0xce   : > { %2113 = vmatmul.msk.bf16.gmra.mxu3 %vm704_vm1, %v936_v46  ;;  %v1363_v46 = vshll.u32 %v2687_v40, 16  ;;  %v1065_v34 = vor.u32 %v1064_v50, %v1061_v48 }
  0xcf   : > { %v1150_v47 = vsel %vm1139_vm4, %v1147_v16, %v1149_v44  ;;  %v2240_v16 = vld [vmem:[%s2707_s22 + $0x8] sm:$0xff] }
  0xd0   : > { %v1066_v53 = vsel %vm1013_vm5, %v1056_v17, %v1065_v34 }
  0xd3   : > { %2085 = vmatmul.msk.bf16.gmra.mxu2 %vm704_vm1, %v816_v52  ;;  %v1365_v52 = vrot.slane %v1363_v46, 3 }
  0xd6   : > { %2134 = vmatmul.msk.bf16.gmra.mxu1 %vm704_vm1, %v1144_v54  ;;  %v1366_v54 = vor.u32 %v1365_v52, %v1362_v51 }
  0xdd   : > { %2123 = vmatmul.msk.bf16.gmra.mxu0 %vm704_vm1, %v1039_v39  ;;  %v2239_v39 = vld [vmem:[%s2707_s22] sm:$0xff] }
  0xde   : > { %2114 = vmatmul.msk.bf16.gmra.mxu3 %vm704_vm1, %v938_v61  ;;  %v1369_v61 = vshrl.u32 %v2701_v55, 16 }
  0xe0   : > { %v1371_v5 = vrot.slane %v1369_v61, 2 }
  0xe3   : > { %2086 = vmatmul.msk.bf16.gmra.mxu2 %vm704_vm1, %v818_v3  ;;  %v1466_v3 = vpack.c.b16 %v1242_v49, %v1465_v0  ;;  %v2724_v49 = vld [vmem:[#allocation2 + $0x28] sm:$0xff] }
  0xe4   : > { %v1378_v18 = vshrl.u32 %v2724_v49, 16  ;;  %v1381_v29 = vshll.u32 %v2724_v49, 16 }
  0xe5   : > { %v1468_v11 = vrot.slane %v1466_v3, 3 }
  0xe6   : > { %2135 = vmatmul.msk.bf16.gmra.mxu1 %vm704_vm1, %v1146_v9  ;;  %v1469_v9 = vrot.slane %v2600_v56, 3  ;;  %v1380_v23 = vrot.slane %v1378_v18, 2 }
  0xed   : > { %2124 = vmatmul.msk.bf16.gmra.mxu0 %vm704_vm1, %v1048_v13 }
  0xee   : > { %2115 = vmatmul.msk.bf16.gmra.mxu3 %vm704_vm1, %v940_v2  ;;  %v1261_v2 = vrot.slane %v2687_v40, 2 }
  0xf0   : > { %v1262_v22 = vsel %vm1139_vm4, %v1259_v4, %v1261_v2  ;;  %v1264_v51 = vsel %vm1139_vm4, %v1261_v2, %v1263_v41 }
  0xf3   : > { %2087 = vmatmul.msk.bf16.gmra.mxu2 %vm704_vm1, %v2580_v38  ;;  %v1057_v38 = vsel %vm1013_vm5, %v1047_v12, %v1056_v17  ;;  %v1375_v12 = vor.u32 %v1374_v8, %v1371_v5  ;;  %v1265_v5 = vrot.slane %v2724_v49, 2 }
  0xf5   : > { %v1376_v21 = vsel %vm1341_vm6, %v1366_v54, %v1375_v12 }
  0xf6   : > { %2136 = vmatmul.msk.bf16.gmra.mxu1 %vm704_vm1, %v1148_v24  ;;  %v1383_v24 = vrot.slane %v1381_v29, 3 }
  0xfd   : > { %2125 = vmatmul.msk.bf16.gmra.mxu0 %vm704_vm1, %v1057_v38  ;;  %v1472_v38 = vsel %vm1467_vm7, %v1469_v9, %v1471_v33 }
  0xfe   : > { %2171 = vmatmul.msk.bf16.vlgmr.msra.gmra.mxu3 %vm704_vm1, %v1358_v57  ;;  %v2746_v57 = vpack.c.b16 %v1339_v36, %v1339_v36 }
  0xff   : > { %v794_v59 = vpop.f32.mrf.mxu3 }
 0x100   : > { %v1387_v46 = vshrl.u32 %v2746_v57, 16 }
 0x102   : > { %v1389_v52 = vrot.slane %v1387_v46, 2 }
 0x103   : > { %2088 = vmatmul.msk.bf16.gmra.mxu2 %vm704_vm1, %v2619_v6  ;;  %v1367_v6 = vsel %vm1341_vm6, %v1357_v35, %v1366_v54  ;;  %v1384_v35 = vor.u32 %v1383_v24, %v1380_v23 }
 0x105   : > { %v1385_v58 = vsel %vm1341_vm6, %v1375_v12, %v1384_v35  ;;  %v1266_v12 = vsel %vm1139_vm4, %v1263_v41, %v1265_v5  ;;  %v1477_v41 = vrot.slane %v2746_v57, 3 }
 0x106   : > { %2137 = vmatmul.msk.bf16.gmra.mxu1 %vm704_vm1, %v1150_v47  ;;  %v1390_v47 = vshll.u32 %v2746_v57, 16 }
 0x107   : > { %v796_v10 = vpop.f32.mrf.mxu3 }
 0x108   : > { %v1392_v34 = vrot.slane %v1390_v47, 3 }
 0x10d   : > { %2126 = vmatmul.msk.bf16.gmra.mxu0 %vm704_vm1, %v1066_v53 }
 0x10e   : > { %2172 = vmatmul.msk.bf16.gmra.mxu3 %vm704_vm1, %v1367_v6  ;;  %v1473_v6 = vrot.slane %v2701_v55, 3 }
 0x113   : > { %v779_v63 = vpop.f32.mrf.mxu1  ;;  %2160 = vmatmul.msk.bf16.vlgmr.msra.gmra.mxu2 %vm704_vm1, %v2624_v7  ;;  %v1470_v7 = vsel %vm1467_vm7, %v1468_v11, %v1469_v9 }
 0x116   : > { %2211 = vmatmul.msk.bf16.vlgmr.msra.gmra.mxu1 %vm704_vm1, %v2239_v39  ;;  %v1393_v39 = vor.u32 %v1392_v34, %v1389_v52 }
 0x118   : > { %v1394_v0 = vsel %vm1341_vm6, %v1384_v35, %v1393_v39 }
 0x11a   : > { %v729_v27 = vpop.f32.mrf.mxu0 }
 0x11b   : > { %v2719_v13 = vadd.f32 %v779_v63, %v729_v27  ;;  %v781_v14 = vpop.f32.mrf.mxu1  ;;  %v1474_v63 = vsel %vm1467_vm7, %v1471_v33, %v1473_v6  ;;  %v2243_v33 = vld [vmem:[%s2707_s22 + $0x20] sm:$0xff] }
 0x11d   : > { %2182 = vmatmul.msk.bf16.vlgmr.msra.gmra.mxu0 %vm704_vm1, %v1470_v7 }
 0x11e   : > { %2173 = vmatmul.msk.bf16.gmra.mxu3 %vm704_vm1, %v1376_v21 }
 0x121   : > { %v799_v15 = vpop.f32.mrf.mxu3 }
 0x122   : > { %v731_v26 = vpop.f32.mrf.mxu0 }
 0x123   : > { %v2731_v19 = vadd.f32 %v781_v14, %v731_v26  ;;  %v784_v20 = vpop.f32.mrf.mxu1  ;;  %2161 = vmatmul.msk.bf16.gmra.mxu2 %vm704_vm1, %v1262_v22  ;;  %v1226_v14 = vld [vmem:[#allocation2 + $0x30] sm:$0x3]  ;;  %v1475_v26 = vrot.slane %v2724_v49, 3 }
 0x124   : > { %v1251_v21 = vunpack.c.l.b16 %v1226_v14 }
 0x125   : > { %v1476_v23 = vsel %vm1467_vm7, %v1473_v6, %v1475_v26  ;;  %v1478_v47 = vsel %vm1467_vm7, %v1475_v26, %v1477_v41 }
 0x126   : > { %2212 = vmatmul.msk.bf16.gmra.mxu1 %vm704_vm1, %v2240_v16  ;;  %v744_v25 = vpop.f32.mrf.mxu2 }
 0x127   : > { %v2738_v31 = vadd.f32 %v794_v59, %v744_v25 }
 0x129   : > { %v801_v30 = vpop.f32.mrf.mxu3 }
 0x12a   : > { %v734_v17 = vpop.f32.mrf.mxu0 }
 0x12b   : > { %v2741_v56 = vadd.f32 %v784_v20, %v734_v17  ;;  %v786_v4 = vpop.f32.mrf.mxu1  ;;  %v1257_v20 = vpack.c.b16 %v1251_v21, %v1251_v21 }
 0x12d   : > { %2183 = vmatmul.msk.bf16.gmra.mxu0 %vm704_vm1, %v1472_v38  ;;  %v1267_v28 = vrot.slane %v1257_v20, 2 }
 0x12e   : > { %v746_v37 = vpop.f32.mrf.mxu2  ;;  %2174 = vmatmul.msk.bf16.gmra.mxu3 %vm704_vm1, %v1385_v58 }
 0x12f   : > { %v2750_v42 = vadd.f32 %v796_v10, %v746_v37  ;;  %v2242_v10 = vld [vmem:[%s2707_s22 + $0x18] sm:$0xff]  ;;  %v1268_v36 = vsel %vm1139_vm4, %v1265_v5, %v1267_v28 }
 0x131   : > { %v971_v44 = vpop.f32.mrf.mxu3 }
 0x132   : > { %v736_v40 = vpop.f32.mrf.mxu0 }
 0x133   : > { %v2755_v48 = vadd.f32 %v786_v4, %v736_v40  ;;  %v789_v50 = vpop.f32.mrf.mxu1  ;;  %2162 = vmatmul.msk.bf16.gmra.mxu2 %vm704_vm1, %v1264_v51 }
 0x136   : > { %2213 = vmatmul.msk.bf16.gmra.mxu1 %vm704_vm1, %v2241_v45  ;;  %v749_v53 = vpop.f32.mrf.mxu2 }
 0x137   : > { %v2760_v54 = vadd.f32 %v799_v15, %v749_v53 }
 0x139   : > { %v973_v60 = vpop.f32.mrf.mxu3 }
 0x13a   : > { %v739_v59 = vpop.f32.mrf.mxu0 }
 0x13b   : > { %v2763_v61 = vadd.f32 %v789_v50, %v739_v59  ;;  %v791_v62 = vpop.f32.mrf.mxu1 }
 0x13d   : > { %2184 = vmatmul.msk.bf16.gmra.mxu0 %vm704_vm1, %v1474_v63 }
 0x13e   : > { %v751_v3 = vpop.f32.mrf.mxu2  ;;  %2175 = vmatmul.msk.bf16.gmra.mxu3 %vm704_vm1, %v1394_v0 }
 0x13f   : > { %v2770_v8 = vadd.f32 %v801_v30, %v751_v3 }
 0x141   : > { %v976_v9 = vpop.f32.mrf.mxu3 }
 0x142   : > { %v741_v55 = vpop.f32.mrf.mxu0 }
 0x143   : > { %v792_v27 = vadd.f32 %v791_v62, %v741_v55  ;;  %v1181_v11 = vpop.f32.mrf.mxu1  ;;  %2163 = vmatmul.msk.bf16.gmra.mxu2 %vm704_vm1, %v1266_v12 }
 0x146   : > { %2214 = vmatmul.msk.bf16.gmra.mxu1 %vm704_vm1, %v2242_v10  ;;  %v853_v7 = vpop.f32.mrf.mxu2 }
 0x147   : > { %v878_v2 = vadd.f32 %v853_v7, %v2719_v13 }
 0x149   : > { %v996_v15 = vadd.f32 %v971_v44, %v878_v2  ;;  %v978_v18 = vpop.f32.mrf.mxu3 }
 0x14a   : > { %v1097_v16 = vpop.f32.mrf.mxu0 }
 0x14b   : > { %v1183_v29 = vpop.f32.mrf.mxu1  ;;  %v1122_v22 = vadd.f32 %v1097_v16, %v996_v15 }
 0x14d   : > { %2185 = vmatmul.msk.bf16.gmra.mxu0 %vm704_vm1, %v1476_v23  ;;  %v2780_v24 = vadd.f32 %v1181_v11, %v1122_v22 }
 0x14e   : > { %v855_v25 = vpop.f32.mrf.mxu2 }
 0x14f   : > { %v879_v17 = vadd.f32 %v855_v25, %v2731_v19 }
 0x151   : > { %v997_v13 = vadd.f32 %v973_v60, %v879_v17  ;;  %v981_v49 = vpop.f32.mrf.mxu3 }
 0x152   : > { %v1099_v30 = vpop.f32.mrf.mxu0 }
 0x153   : > { %v1186_v35 = vpop.f32.mrf.mxu1  ;;  %v1123_v4 = vadd.f32 %v1099_v30, %v997_v13  ;;  %2164 = vmatmul.msk.bf16.gmra.mxu2 %vm704_vm1, %v1268_v36 }
 0x155   : > { %v2787_v38 = vadd.f32 %v1183_v29, %v1123_v4 }
 0x156   : > { %2215 = vmatmul.msk.bf16.gmra.mxu1 %vm704_vm1, %v2243_v33  ;;  %v858_v58 = vpop.f32.mrf.mxu2 }
 0x157   : > { %v880_v37 = vadd.f32 %v858_v58, %v2741_v56 }
 0x159   : > { %v998_v19 = vadd.f32 %v976_v9, %v880_v37  ;;  %v983_v44 = vpop.f32.mrf.mxu3 }
 0x15a   : > { %v1102_v40 = vpop.f32.mrf.mxu0 }
 0x15b   : > { %v1188_v45 = vpop.f32.mrf.mxu1  ;;  %v1124_v46 = vadd.f32 %v1102_v40, %v998_v19 }
 0x15d   : > { %2186 = vmatmul.msk.bf16.gmra.mxu0 %vm704_vm1, %v1478_v47  ;;  %v2793_v50 = vadd.f32 %v1186_v35, %v1124_v46 }
 0x15e   : > { %v860_v51 = vpop.f32.mrf.mxu2 }
 0x15f   : > { %v881_v52 = vadd.f32 %v860_v51, %v2755_v48 }
 0x161   : > { %v999_v34 = vadd.f32 %v978_v18, %v881_v52  ;;  %v986_v6 = vpop.f32.mrf.mxu3 }
 0x162   : > { %v1104_v53 = vpop.f32.mrf.mxu0 }
 0x163   : > { %v1191_v56 = vpop.f32.mrf.mxu1  ;;  %v1125_v59 = vadd.f32 %v1104_v53, %v999_v34 }
 0x165   : > { %v2796_v57 = vadd.f32 %v1188_v45, %v1125_v59 }
 0x166   : > { %v863_v60 = vpop.f32.mrf.mxu2 }
 0x167   : > { %v882_v39 = vadd.f32 %v863_v60, %v2763_v61 }
 0x169   : > { %v1000_v62 = vadd.f32 %v981_v49, %v882_v39  ;;  %v988_v0 = vpop.f32.mrf.mxu3 }
 0x16a   : > { %v1107_v63 = vpop.f32.mrf.mxu0 }
 0x16b   : > { %v1193_v3 = vpop.f32.mrf.mxu1  ;;  %v1126_v5 = vadd.f32 %v1107_v63, %v1000_v62 }
 0x16d   : > { %v2799_v55 = vadd.f32 %v1191_v56, %v1126_v5 }
 0x16e   : > { %v865_v9 = vpop.f32.mrf.mxu2 }
 0x16f   : > { %v883_v10 = vadd.f32 %v865_v9, %v792_v27 }
 0x171   : > { %v1001_v48 = vadd.f32 %v983_v44, %v883_v10  ;;  %v991_v12 = vpop.f32.mrf.mxu3 }
 0x172   : > { %v1109_v11 = vpop.f32.mrf.mxu0 }
 0x173   : > { %v1196_v14 = vpop.f32.mrf.mxu1  ;;  %v1127_v7 = vadd.f32 %v1109_v11, %v1001_v48 }
 0x175   : > { %v2801_v21 = vadd.f32 %v1193_v3, %v1127_v7 }
 0x176   : > { %v868_v2 = vpop.f32.mrf.mxu2 }
 0x177   : > { %v884_v26 = vadd.f32 %v868_v2, %v2738_v31 }
 0x179   : > { %v1002_v61 = vadd.f32 %v986_v6, %v884_v26  ;;  %v993_v29 = vpop.f32.mrf.mxu3 }
 0x17a   : > { %v1112_v15 = vpop.f32.mrf.mxu0 }
 0x17b   : > { %v1198_v16 = vpop.f32.mrf.mxu1  ;;  %v1128_v18 = vadd.f32 %v1112_v15, %v1002_v61 }
 0x17d   : > { %v2804_v20 = vadd.f32 %v1196_v14, %v1128_v18 }
 0x17e   : > { %v870_v22 = vpop.f32.mrf.mxu2 }
 0x17f   : > { %v885_v27 = vadd.f32 %v870_v22, %v2750_v42 }
 0x181   : > { %v1003_v23 = vadd.f32 %v988_v0, %v885_v27  ;;  %v1425_v30 = vpop.f32.mrf.mxu3  ;;  %v2843_v0 = vpop.permute.xlu1 %1576 }
 0x182   : > { %v1114_v25 = vpop.f32.mrf.mxu0 }
 0x183   : > { %v1201_v28 = vpop.f32.mrf.mxu1  ;;  %v1129_v17 = vadd.f32 %v1114_v25, %v1003_v23 }
 0x185   : > { %v2807_v13 = vadd.f32 %v1198_v16, %v1129_v17 }
 0x186   : > { %v873_v49 = vpop.f32.mrf.mxu2 }
 0x187   : > { %v886_v31 = vadd.f32 %v873_v49, %v2760_v54 }
 0x189   : > { %v1004_v33 = vadd.f32 %v991_v12, %v886_v31  ;;  %v1427_v41 = vpop.f32.mrf.mxu3 }
 0x18a   : > { %v1117_v35 = vpop.f32.mrf.mxu0 }
 0x18b   : > { %v1203_v36 = vpop.f32.mrf.mxu1  ;;  %v1130_v4 = vadd.f32 %v1117_v35, %v1004_v33 }
 0x18d   : > { %v2810_v58 = vadd.f32 %v1201_v28, %v1130_v4 }
 0x18e   : > { %v875_v37 = vpop.f32.mrf.mxu2 }
 0x18f   : > { %v887_v42 = vadd.f32 %v875_v37, %v2770_v8 }
 0x191   : > { %v1005_v19 = vadd.f32 %v993_v29, %v887_v42  ;;  %v1430_v34 = vpop.f32.mrf.mxu3 }
 0x192   : > { %v1119_v40 = vpop.f32.mrf.mxu0 }
 0x193   : > { %v2819_v54 = vpop.f32.mrf.mxu1  ;;  %v1131_v44 = vadd.f32 %v1119_v40, %v1005_v19 }
 0x194   : > { %v1799_v45 = vpack.c.bf16 %v2819_v54, %v2819_v54 }
 0x195   : > { %v2825_v8 = vadd.f32 %v1203_v36, %v1131_v44 }
 0x196   : > { %1809 = vst.msk [vmem:[%s2817_s25] sm:$0xf] %vm594_vm0, %v1799_v45  ;;  %v1299_v46 = vpop.f32.mrf.mxu2 }
 0x197   : > { %v1324_v47 = vadd.f32 %v1299_v46, %v2780_v24 }
 0x199   : > { %v1450_v51 = vadd.f32 %v1425_v30, %v1324_v47  ;;  %v1432_v48 = vpop.f32.mrf.mxu3  ;;  %v2866_v30 = vpop.permute.xlu0 %1586 }
 0x19a   : > { %v1509_v52 = vpop.f32.mrf.mxu0 }
 0x19b   : > { %v2828_v53 = vpop.f32.mrf.mxu1  ;;  %v1534_v6 = vadd.f32 %v1509_v52, %v1450_v51  ;;  %v2881_v51 = vpop.permute.xlu1 %1591 }
 0x19c   : > { %v1800_v56 = vpack.c.bf16 %v2828_v53, %v2828_v53 }
 0x19d   : > { %v1544_v59 = vpack.c.bf16 %v1534_v6, %v1534_v6  ;;  %v1661_v39 = vmul.f32 %v1534_v6, %v1534_v6  ;;  %v1624_v5 = vmul.f32 %v2843_v0, %v1534_v6 }
 0x19e   : > { %1810 = vst.msk [vmem:[%s2817_s25 + $0x4] sm:$0xf] %vm594_vm0, %v1800_v56  ;;  %v1301_v60 = vpop.f32.mrf.mxu2 }
 0x19f   : > { %1554 = vst.msk [vmem:[%s2836_s28] sm:$0xf] %vm594_vm0, %v1544_v59  ;;  %v1325_v24 = vadd.f32 %v1301_v60, %v2787_v38  ;;  %v1671_v11 = vmul.f32 %v1661_v39, %v2843_v0  ;;  %v1634_v2 = vsel %vm704_vm1, %v1624_v5, 0.0 }
 0x1a1   : > { %v1451_v62 = vadd.f32 %v1427_v41, %v1325_v24  ;;  %v1681_v18 = vsel %vm704_vm1, %v1671_v11, 0.0  ;;  %v1435_v33 = vpop.f32.mrf.mxu3 }
 0x1a2   : > { %v1511_v63 = vpop.f32.mrf.mxu0 }
 0x1a3   : > { %v2845_v3 = vpop.f32.mrf.mxu1  ;;  %v1535_v9 = vadd.f32 %v1511_v63, %v1451_v62 }
 0x1a4   : > { %v1801_v10 = vpack.c.bf16 %v2845_v3, %v2845_v3 }
 0x1a5   : > { %v1545_v12 = vpack.c.bf16 %v1535_v9, %v1535_v9  ;;  %v1625_v38 = vmul.f32 %v2528_v32, %v1535_v9  ;;  %v1662_v14 = vmul.f32 %v1535_v9, %v1535_v9 }
 0x1a6   : > { %1811 = vst.msk [vmem:[%s2817_s25 + $0x8] sm:$0xf] %vm594_vm0, %v1801_v10  ;;  %v1304_v7 = vpop.f32.mrf.mxu2 }
 0x1a7   : > { %1555 = vst.msk [vmem:[%s2836_s28 + $0x4] sm:$0xf] %vm594_vm0, %v1545_v12  ;;  %v1635_v26 = vsel %vm704_vm1, %v1625_v38, 0.0  ;;  %v1672_v61 = vmul.f32 %v1662_v14, %v2528_v32  ;;  %v1326_v15 = vadd.f32 %v1304_v7, %v2793_v50  ;;  %v1856_v12 = vmul.f32 %v2828_v53, %v2828_v53 }
 0x1a8   : > { %v1636_v16 = vadd.f32 %v1635_v26, %v1634_v2  ;;  %v1855_v2 = vmul.f32 %v2819_v54, %v2819_v54 }
 0x1a9   : > { %v1682_v29 = vsel %vm704_vm1, %v1672_v61, 0.0  ;;  %v1452_v22 = vadd.f32 %v1430_v34, %v1326_v15  ;;  %v1437_v24 = vpop.f32.mrf.mxu3 }
 0x1aa   : > { %v1514_v27 = vpop.f32.mrf.mxu0  ;;  %v1683_v23 = vadd.f32 %v1682_v29, %v1681_v18  ;;  %v1866_v18 = vmul.f32 %v1856_v12, %v2528_v32  ;;  %v1857_v29 = vmul.f32 %v2845_v3, %v2845_v3  ;;  %v1607_v12 = vpop.permute.xlu1 %1606 }
 0x1ab   : > { %v2862_v25 = vpop.f32.mrf.mxu1  ;;  %v1536_v28 = vadd.f32 %v1514_v27, %v1452_v22 }
 0x1ac   : > { %v1802_v17 = vpack.c.bf16 %v2862_v25, %v2862_v25 }
 0x1ad   : > { %v1546_v49 = vpack.c.bf16 %v1536_v28, %v1536_v28  ;;  %v1626_v50 = vmul.f32 %v2866_v30, %v1536_v28  ;;  %v1663_v31 = vmul.f32 %v1536_v28, %v1536_v28 }
 0x1ae   : > { %1812 = vst.msk [vmem:[%s2817_s25 + $0xc] sm:$0xf] %vm594_vm0, %v1802_v17  ;;  %v1306_v35 = vpop.f32.mrf.mxu2  ;;  %v1819_v17 = vmul.f32 %v2819_v54, %v2843_v0  ;;  %v1822_v54 = vmul.f32 %v2862_v25, %v2881_v51 }
 0x1af   : > { %1556 = vst.msk [vmem:[%s2836_s28 + $0x8] sm:$0xf] %vm594_vm0, %v1546_v49  ;;  %v1637_v36 = vsel %vm704_vm1, %v1626_v50, 0.0  ;;  %v1673_v4 = vmul.f32 %v1663_v31, %v2866_v30  ;;  %v1327_v37 = vadd.f32 %v1306_v35, %v2796_v57  ;;  %v1865_v31 = vmul.f32 %v1855_v2, %v2843_v0 }
 0x1b0   : > { %v1638_v42 = vadd.f32 %v1637_v36, %v1636_v16  ;;  %v1820_v16 = vmul.f32 %v2828_v53, %v2528_v32  ;;  %v1876_v36 = vsel %vm704_vm1, %v1866_v18, 0.0  ;;  %v1829_v0 = vsel %vm704_vm1, %v1819_v17, 0.0 }
 0x1b1   : > { %v1684_v41 = vsel %vm704_vm1, %v1673_v4, 0.0  ;;  %v1453_v19 = vadd.f32 %v1432_v48, %v1327_v37  ;;  %v1440_v49 = vpop.f32.mrf.mxu3  ;;  %v1821_v4 = vmul.f32 %v2845_v3, %v2866_v30  ;;  %v1867_v37 = vmul.f32 %v1857_v29, %v2866_v30 }
 0x1b2   : > { %v1516_v40 = vpop.f32.mrf.mxu0  ;;  %v1685_v44 = vadd.f32 %v1684_v41, %v1683_v23  ;;  %v1830_v35 = vsel %vm704_vm1, %v1820_v16, 0.0 }
 0x1b3   : > { %v2877_v45 = vpop.f32.mrf.mxu1  ;;  %v1537_v46 = vadd.f32 %v1516_v40, %v1453_v19  ;;  %v1858_v40 = vmul.f32 %v2862_v25, %v2862_v25 }
 0x1b4   : > { %v1803_v47 = vpack.c.bf16 %v2877_v45, %v2877_v45 }
 0x1b5   : > { %v1547_v52 = vpack.c.bf16 %v1537_v46, %v1537_v46  ;;  %v1627_v34 = vmul.f32 %v2881_v51, %v1537_v46  ;;  %v1664_v6 = vmul.f32 %v1537_v46, %v1537_v46  ;;  %v1875_v46 = vsel %vm704_vm1, %v1865_v31, 0.0 }
 0x1b6   : > { %1813 = vst.msk [vmem:[%s2817_s25 + $0x10] sm:$0xf] %vm594_vm0, %v1803_v47  ;;  %v1309_v57 = vpop.f32.mrf.mxu2 }
 0x1b7   : > { %1557 = vst.msk [vmem:[%s2836_s28 + $0xc] sm:$0xf] %vm594_vm0, %v1547_v52  ;;  %v1639_v56 = vsel %vm704_vm1, %v1627_v34, 0.0  ;;  %v1674_v59 = vmul.f32 %v1664_v6, %v2881_v51  ;;  %v1328_v60 = vadd.f32 %v1309_v57, %v2799_v55  ;;  %v1831_v52 = vadd.f32 %v1830_v35, %v1829_v0 }
 0x1b8   : > { %v1640_v39 = vadd.f32 %v1639_v56, %v1638_v42  ;;  %v1877_v34 = vadd.f32 %v1876_v36, %v1875_v46  ;;  %v1832_v6 = vsel %vm704_vm1, %v1821_v4, 0.0  ;;  %v1878_v56 = vsel %vm704_vm1, %v1867_v37, 0.0 }
 0x1b9   : > { %v1686_v62 = vsel %vm704_vm1, %v1674_v59, 0.0  ;;  %v1454_v63 = vadd.f32 %v1435_v33, %v1328_v60  ;;  %v1602_v33 = vpop.permute.xlu0 %1601  ;;  %v1834_v59 = vsel %vm704_vm1, %v1822_v54, 0.0 }
 0x1ba   : > { %v1519_v5 = vpop.f32.mrf.mxu0  ;;  %v1687_v9 = vadd.f32 %v1686_v62, %v1685_v44  ;;  %v1823_v62 = vmul.f32 %v2877_v45, %v2539_v43 }
 0x1bb   : > { %v2892_v10 = vpop.f32.mrf.mxu1  ;;  %v1538_v48 = vadd.f32 %v1519_v5, %v1454_v63 }
 0x1bc   : > { %v1804_v11 = vpack.c.bf16 %v2892_v10, %v2892_v10  ;;  %v1824_v29 = vmul.f32 %v2892_v10, %v1602_v33 }
 0x1bd   : > { %v1548_v38 = vpack.c.bf16 %v1538_v48, %v1538_v48  ;;  %v1628_v55 = vmul.f32 %v2539_v43, %v1538_v48  ;;  %v1665_v14 = vmul.f32 %v1538_v48, %v1538_v48 }
 0x1be   : > { %1814 = vst.msk [vmem:[%s2817_s25 + $0x14] sm:$0xf] %vm594_vm0, %v1804_v11  ;;  %v1311_v7 = vpop.f32.mrf.mxu2  ;;  %v1838_v54 = vsel %vm704_vm1, %v1824_v29, 0.0 }
 0x1bf   : > { %1558 = vst.msk [vmem:[%s2836_s28 + $0x10] sm:$0xf] %vm594_vm0, %v1548_v38  ;;  %v1641_v26 = vsel %vm704_vm1, %v1628_v55, 0.0  ;;  %v1675_v61 = vmul.f32 %v1665_v14, %v2539_v43  ;;  %v1329_v15 = vadd.f32 %v1311_v7, %v2801_v21  ;;  %v1879_v38 = vadd.f32 %v1878_v56, %v1877_v34  ;;  %v1442_v55 = vpop.f32.mrf.mxu3 }
 0x1c0   : > { %v1642_v22 = vadd.f32 %v1641_v26, %v1640_v39  ;;  %v1868_v39 = vmul.f32 %v1858_v40, %v2881_v51  ;;  %v1860_v14 = vmul.f32 %v2892_v10, %v2892_v10 }
 0x1c1   : > { %v1688_v27 = vsel %vm704_vm1, %v1675_v61, 0.0  ;;  %v1455_v23 = vadd.f32 %v1437_v24, %v1329_v15  ;;  %v1836_v61 = vsel %vm704_vm1, %v1823_v62, 0.0 }
 0x1c2   : > { %v1521_v28 = vpop.f32.mrf.mxu0  ;;  %v1689_v50 = vadd.f32 %v1688_v27, %v1687_v9  ;;  %v1833_v9 = vadd.f32 %v1832_v6, %v1831_v52 }
 0x1c3   : > { %v1789_v21 = vpop.f32.mrf.mxu1  ;;  %v1539_v53 = vadd.f32 %v1521_v28, %v1455_v23  ;;  %v1870_v28 = vmul.f32 %v1860_v14, %v1602_v33 }
 0x1c4   : > { %v1805_v32 = vpack.c.bf16 %v1789_v21, %v1789_v21  ;;  %v1835_v51 = vadd.f32 %v1834_v59, %v1833_v9  ;;  %v1861_v16 = vmul.f32 %v1789_v21, %v1789_v21  ;;  %v1825_v17 = vmul.f32 %v1789_v21, %v1607_v12 }
 0x1c5   : > { %v1549_v42 = vpack.c.bf16 %v1539_v53, %v1539_v53  ;;  %v1629_v41 = vmul.f32 %v1602_v33, %v1539_v53  ;;  %v1666_v19 = vmul.f32 %v1539_v53, %v1539_v53 }
 0x1c6   : > { %1815 = vst.msk [vmem:[%s2817_s25 + $0x18] sm:$0xf] %vm594_vm0, %v1805_v32  ;;  %v1314_v44 = vpop.f32.mrf.mxu2  ;;  %v1837_v35 = vadd.f32 %v1836_v61, %v1835_v51  ;;  %v1871_v10 = vmul.f32 %v1861_v16, %v1607_v12 }
 0x1c7   : > { %1559 = vst.msk [vmem:[%s2836_s28 + $0x14] sm:$0xf] %vm594_vm0, %v1549_v42  ;;  %v1643_v3 = vsel %vm704_vm1, %v1629_v41, 0.0  ;;  %v1676_v30 = vmul.f32 %v1666_v19, %v1602_v33  ;;  %v1330_v47 = vadd.f32 %v1314_v44, %v2804_v20  ;;  %v1859_v20 = vmul.f32 %v2877_v45, %v2877_v45  ;;  %v1617_v42 = vpop.permute.xlu0 %1616  ;;  %v1445_v34 = vpop.f32.mrf.mxu3 }
 0x1c8   : > { %v1644_v57 = vadd.f32 %v1643_v3, %v1642_v22  ;;  %v1880_v45 = vsel %vm704_vm1, %v1868_v39, 0.0  ;;  %v1884_v41 = vsel %vm704_vm1, %v1870_v28, 0.0  ;;  %v1840_v19 = vsel %vm704_vm1, %v1825_v17, 0.0 }
 0x1c9   : > { %v1690_v25 = vsel %vm704_vm1, %v1676_v30, 0.0  ;;  %v1456_v60 = vadd.f32 %v1440_v49, %v1330_v47  ;;  %v1869_v15 = vmul.f32 %v1859_v20, %v2539_v43  ;;  %v1881_v31 = vadd.f32 %v1880_v45, %v1879_v38 }
 0x1ca   : > { %v1524_v24 = vpop.f32.mrf.mxu0  ;;  %v1691_v63 = vadd.f32 %v1690_v25, %v1689_v50  ;;  %v1839_v52 = vadd.f32 %v1838_v54, %v1837_v35  ;;  %v1886_v6 = vsel %vm704_vm1, %v1871_v10, 0.0 }
 0x1cb   : > { %v1791_v5 = vpop.f32.mrf.mxu1  ;;  %v1540_v48 = vadd.f32 %v1524_v24, %v1456_v60  ;;  %v1882_v36 = vsel %vm704_vm1, %v1869_v15, 0.0 }
 0x1cc   : > { %v1806_v11 = vpack.c.bf16 %v1791_v5, %v1791_v5  ;;  %v1862_v50 = vmul.f32 %v1791_v5, %v1791_v5  ;;  %v1883_v47 = vadd.f32 %v1882_v36, %v1881_v31  ;;  %v1841_v39 = vadd.f32 %v1840_v19, %v1839_v52 }
 0x1cd   : > { %v1550_v7 = vpack.c.bf16 %v1540_v48, %v1540_v48  ;;  %v1630_v2 = vmul.f32 %v1607_v12, %v1540_v48  ;;  %v1667_v26 = vmul.f32 %v1540_v48, %v1540_v48 }
 0x1ce   : > { %1816 = vst.msk [vmem:[%s2817_s25 + $0x1c] sm:$0xf] %vm594_vm0, %v1806_v11  ;;  %v1316_v18 = vpop.f32.mrf.mxu2  ;;  %v1872_v0 = vmul.f32 %v1862_v50, %v2550_v1  ;;  %v1885_v24 = vadd.f32 %v1884_v41, %v1883_v47 }
 0x1cf   : > { %1560 = vst.msk [vmem:[%s2836_s28 + $0x18] sm:$0xf] %vm594_vm0, %v1550_v7  ;;  %v1645_v22 = vsel %vm704_vm1, %v1630_v2, 0.0  ;;  %v1677_v27 = vmul.f32 %v1667_v26, %v1607_v12  ;;  %v1331_v23 = vadd.f32 %v1316_v18, %v2807_v13  ;;  %v1826_v13 = vmul.f32 %v1791_v5, %v2550_v1  ;;  %v1622_v12 = vpop.permute.xlu1 %1621  ;;  %v1447_v31 = vpop.f32.mrf.mxu3 }
 0x1d0   : > { %v1646_v49 = vadd.f32 %v1645_v22, %v1644_v57  ;;  %v1887_v38 = vadd.f32 %v1886_v6, %v1885_v24 }
 0x1d1   : > { %v1692_v53 = vsel %vm704_vm1, %v1677_v27, 0.0  ;;  %v1457_v32 = vadd.f32 %v1442_v55, %v1331_v23  ;;  %v1842_v56 = vsel %vm704_vm1, %v1826_v13, 0.0 }
 0x1d2   : > { %v1526_v43 = vpop.f32.mrf.mxu0  ;;  %v1693_v4 = vadd.f32 %v1692_v53, %v1691_v63  ;;  %v1888_v63 = vsel %vm704_vm1, %v1872_v0, 0.0  ;;  %v1843_v55 = vadd.f32 %v1842_v56, %v1841_v39 }
 0x1d3   : > { %v1794_v37 = vpop.f32.mrf.mxu1  ;;  %v1541_v33 = vadd.f32 %v1526_v43, %v1457_v32  ;;  %v1889_v26 = vadd.f32 %v1888_v63, %v1887_v38 }
 0x1d4   : > { %v1807_v21 = vpack.c.bf16 %v1794_v37, %v1794_v37  ;;  %v1863_v40 = vmul.f32 %v1794_v37, %v1794_v37  ;;  %v1827_v30 = vmul.f32 %v1794_v37, %v1617_v42 }
 0x1d5   : > { %v1551_v44 = vpack.c.bf16 %v1541_v33, %v1541_v33  ;;  %v1631_v46 = vmul.f32 %v2550_v1, %v1541_v33  ;;  %v1668_v3 = vmul.f32 %v1541_v33, %v1541_v33 }
 0x1d6   : > { %1817 = vst.msk [vmem:[%s2817_s25 + $0x20] sm:$0xf] %vm594_vm0, %v1807_v21  ;;  %v1319_v57 = vpop.f32.mrf.mxu2  ;;  %v1873_v20 = vmul.f32 %v1863_v40, %v1617_v42  ;;  %v1844_v9 = vsel %vm704_vm1, %v1827_v30, 0.0 }
 0x1d7   : > { %1561 = vst.msk [vmem:[%s2836_s28 + $0x1c] sm:$0xf] %vm594_vm0, %v1551_v44  ;;  %v1647_v59 = vsel %vm704_vm1, %v1631_v46, 0.0  ;;  %v1678_v25 = vmul.f32 %v1668_v3, %v2550_v1  ;;  %v1332_v60 = vadd.f32 %v1319_v57, %v2810_v58  ;;  %v1845_v45 = vadd.f32 %v1844_v9, %v1843_v55 }
 0x1d8   : > { %v1648_v62 = vadd.f32 %v1647_v59, %v1646_v49  ;;  %v1890_v61 = vsel %vm704_vm1, %v1873_v20, 0.0 }
 0x1d9   : > { %v1694_v5 = vsel %vm704_vm1, %v1678_v25, 0.0  ;;  %v1458_v48 = vadd.f32 %v1445_v34, %v1332_v60  ;;  %v1891_v28 = vadd.f32 %v1890_v61, %v1889_v26 }
 0x1da   : > { %v1529_v11 = vpop.f32.mrf.mxu0  ;;  %v1695_v14 = vadd.f32 %v1694_v5, %v1693_v4 }
 0x1db   : > { %v1796_v1 = vpop.f32.mrf.mxu1  ;;  %v1542_v51 = vadd.f32 %v1529_v11, %v1458_v48 }
 0x1dc   : > { %v1808_v58 = vpack.c.bf16 %v1796_v1, %v1796_v1  ;;  %v1828_v7 = vmul.f32 %v1796_v1, %v1622_v12  ;;  %v1864_v2 = vmul.f32 %v1796_v1, %v1796_v1 }
 0x1dd   : > { %v1552_v15 = vpack.c.bf16 %v1542_v51, %v1542_v51  ;;  %v1632_v16 = vmul.f32 %v1617_v42, %v1542_v51  ;;  %v1669_v18 = vmul.f32 %v1542_v51, %v1542_v51 }
 0x1de   : > { %1818 = vst.msk [vmem:[%s2817_s25 + $0x24] sm:$0xf] %vm594_vm0, %v1808_v58  ;;  %v1846_v29 = vsel %vm704_vm1, %v1828_v7, 0.0  ;;  %v1874_v27 = vmul.f32 %v1864_v2, %v1622_v12  ;;  %v1321_v23 = vpop.f32.mrf.mxu2 }
 0x1df   : > { %v1847_v22 = vadd.f32 %v1846_v29, %v1845_v45  ;;  %1562 = vst.msk [vmem:[%s2836_s28 + $0x20] sm:$0xf] %vm594_vm0, %v1552_v15  ;;  %v1649_v17 = vsel %vm704_vm1, %v1632_v16, 0.0  ;;  %v1679_v49 = vmul.f32 %v1669_v18, %v1617_v42  ;;  %v1333_v50 = vadd.f32 %v1321_v23, %v2825_v8 }
 0x1e0   : > { %v1650_v53 = vadd.f32 %v1649_v17, %v1648_v62  ;;  %v1892_v43 = vsel %vm704_vm1, %v1874_v27, 0.0 }
 0x1e1   : > { %v1848_v32 = vrot.slane %v1847_v22, 4  ;;  %v1696_v35 = vsel %vm704_vm1, %v1679_v49, 0.0  ;;  %v1893_v36 = vadd.f32 %v1892_v43, %v1891_v28  ;;  %v1459_v10 = vadd.f32 %v1447_v31, %v1333_v50 }
 0x1e2   : > { %v1531_v4 = vpop.f32.mrf.mxu0  ;;  %v1697_v37 = vadd.f32 %v1696_v35, %v1695_v14 }
 0x1e3   : > { %v1849_v54 = vadd.f32 %v1848_v32, %v1847_v22  ;;  %v1894_v13 = vrot.slane %v1893_v36, 4  ;;  %v1543_v33 = vadd.f32 %v1531_v4, %v1459_v10 }
 0x1e5   : > { %v1850_v21 = vrot.slane %v1849_v54, 2  ;;  %v1895_v42 = vadd.f32 %v1894_v13, %v1893_v36  ;;  %v1553_v41 = vpack.c.bf16 %v1543_v33, %v1543_v33  ;;  %v1633_v8 = vmul.f32 %v1622_v12, %v1543_v33 }
 0x1e6   : > { %v1670_v19 = vmul.f32 %v1543_v33, %v1543_v33 }
 0x1e7   : > { %v1851_v0 = vadd.f32 %v1850_v21, %v1849_v54  ;;  %v1896_v40 = vrot.slane %v1895_v42, 2  ;;  %1563 = vst.msk [vmem:[%s2836_s28 + $0x24] sm:$0xf] %vm594_vm0, %v1553_v41  ;;  %v1651_v44 = vsel %vm704_vm1, %v1633_v8, 0.0 }
 0x1e8   : > { %v1680_v46 = vmul.f32 %v1670_v19, %v1622_v12  ;;  %v1652_v30 = vadd.f32 %v1651_v44, %v1650_v53 }
 0x1e9   : > { %v1852_v3 = vrot.slane %v1851_v0, 1  ;;  %v1897_v47 = vadd.f32 %v1896_v40, %v1895_v42 }
 0x1ea   : > { %v1698_v52 = vsel %vm704_vm1, %v1680_v46, 0.0  ;;  %v1653_v6 = vrot.slane %v1652_v30, 4 }
 0x1eb   : > { %v1853_v34 = vadd.f32 %v1852_v3, %v1851_v0  ;;  %v1699_v57 = vadd.f32 %v1698_v52, %v1697_v37  ;;  %v1898_v56 = vrot.slane %v1897_v47, 1 }
 0x1ec   : > { %v1654_v59 = vadd.f32 %v1653_v6, %v1652_v30 }
 0x1ed   : > { %1854 = vst.msk [vmem:[%s402_s12 + $0x2] sm:$0x1] %vm1659_vm8, %v1853_v34  ;;  %v1700_v25 = vrot.slane %v1699_v57, 4  ;;  %v1899_v60 = vadd.f32 %v1898_v56, %v1897_v47 }
 0x1ee   : > { %v1655_v24 = vrot.slane %v1654_v59, 2 }
 0x1ef   : > { %v1701_v39 = vadd.f32 %v1700_v25, %v1699_v57  ;;  %1900 = vst.msk [vmem:[%s402_s12 + $0x3] sm:$0x1] %vm1659_vm8, %v1899_v60 }
 0x1f0   : > { %v1656_v62 = vadd.f32 %v1655_v24, %v1654_v59 }
 0x1f1   : > { %v1702_v20 = vrot.slane %v1701_v39, 2 }
 0x1f2   : > { %v1657_v63 = vrot.slane %v1656_v62, 1 }
 0x1f3   : > { %v1703_v5 = vadd.f32 %v1702_v20, %v1701_v39 }
 0x1f4   : > { %v1658_v9 = vadd.f32 %v1657_v63, %v1656_v62 }
 0x1f5   : > { %v1704_v48 = vrot.slane %v1703_v5, 1 }
 0x1f6   : > { %1660 = vst.msk [vmem:[%s402_s12] sm:$0x1] %vm1659_vm8, %v1658_v9 }
 0x1f7   : > { %v1705_v11 = vadd.f32 %v1704_v48, %v1703_v5 }
 0x1f9   : > { %1706 = vst.msk [vmem:[%s402_s12 + $0x1] sm:$0x1] %vm1659_vm8, %v1705_v11 }
 0x1fa PF: > { %s21_s13 = sadd.s32 1, %s2310_s13  }
 0x1fb   : > { %p18_p4 = scmp.ge.s32.totalorder %s21_s13, 4  }
 0x1fd   :  { %20 = sbr.rel (!%p18_p4) target bundleno = 1 (0x1), region = 117 }

</bundles_post_ra>
